<compile_context>
chip_gen: v5e
topology: v5e:2x2
jax: 0.10.0
libtpu: 0.0.40
codegen_flags: <defaults>
</compile_context>

<pallas_src>
import functools

import jax
import jax.numpy as jnp
from jax.experimental import pallas as pl
from jax.experimental.pallas import tpu as pltpu

LANE = 128
# <= ~48 MiB keeps v7x (64 MiB VMEM/TC) safe; v5e/v6e have 128 MiB headroom.
VMEM_LIMIT_BYTES = 48 * 1024 * 1024


def _round_up(x, m):
    return (x + m - 1) // m * m


# --------------------------- parameter folding / packing ---------------------------
def fuse_bn_film(bn, film, eps=1e-5):
    """Fold inference BatchNorm followed by FiLM into one per-channel scale/shift."""
    s_bn = bn["weight"] / jnp.sqrt(bn["running_var"] + eps)
    b_bn = bn["bias"] - bn["running_mean"] * s_bn
    scale = s_bn * film["gamma"]
    shift = b_bn * film["gamma"] + film["beta"]
    return scale.astype(jnp.float32), shift.astype(jnp.float32)


def _pack_conv3x3(w_oihw, cin_p, cout_p):
    """[Cout,Cin,3,3] -> [9*cin_p, cout_p] (tap-major rows, k = ki*3 + kj)."""
    cout, cin, kh, kw = w_oihw.shape
    w = jnp.transpose(w_oihw, (2, 3, 1, 0)).reshape(kh * kw, cin, cout)
    w = jnp.pad(w, ((0, 0), (0, cin_p - cin), (0, cout_p - cout)))
    return w.reshape(kh * kw * cin_p, cout_p)


def _pack_conv1_weights(w1_oihw, wsc_oihw, cin_p, cout_p):
    """conv1 taps; the 1x1 shortcut (if any) is folded in as extra output columns
    that live only in the centre-tap (k=4) row block -> one MXU dot does both."""
    w1 = _pack_conv3x3(w1_oihw, cin_p, cout_p)
    if wsc_oihw is None:
        return w1.astype(jnp.bfloat16)
    cout, cin = wsc_oihw.shape[:2]
    wsc = jnp.transpose(wsc_oihw[:, :, 0, 0], (1, 0))            # (cin, cout)
    sc_cols = jnp.zeros((9, cin_p, cout_p), w1.dtype)
    sc_cols = sc_cols.at[4, :cin, :cout].set(wsc)
    sc_cols = sc_cols.reshape(9 * cin_p, cout_p)
    return jnp.concatenate([w1, sc_cols], axis=1).astype(jnp.bfloat16)


# --------------------------------- fused kernel ---------------------------------
def _block_kernel(stride, has_shortcut, Ho, Wo, Cin, cin_p, cout_p,
                  xph_ref, w1_ref, w2_ref, s1_ref, b1_ref, s2_ref, b2_ref,
                  out_ref, h1_ref, h2_ref, *extra):
    """One full pre-activation block for one batch frame.

    xph_ref : (P, Ho, Wo, Cin) f32   stride*stride input phases (P=1 when stride=1)
    w1_ref  : (9*cin_p, cout_p [+cout_p]) bf16   conv1 taps (+ folded 1x1 shortcut)
    w2_ref  : (9*cout_p, cout_p) bf16            conv2 taps
    h1_ref  : (P, Ho+2, Wo+2, cin_p) f32 scratch  zero-bordered h1 phase slabs
    h2_ref  : (Ho+2, Wo+2, cout_p)  f32 scratch  zero-bordered h2
    """
    s = stride
    P = s * s
    M = Ho * Wo
    sc_ref = extra[0] if has_shortcut else None

    # Fresh zero halo / zero padded-lanes every step (scratch is per-core, so do
    # not rely on a step-0-only init under a 'parallel' grid axis).
    h1_ref[...] = jnp.zeros_like(h1_ref)
    h2_ref[...] = jnp.zeros_like(h2_ref)

    # ---- stage 1: h1 = relu(film1(bn1(x))); channel pad + conv1 halo handled
    #      here in VMEM (no XLA pad / channel-pad / phase materialization of h1).
    s1 = s1_ref[...].reshape(1, 1, Cin)
    b1 = b1_ref[...].reshape(1, 1, Cin)
    for idx in range(P):
        y = jnp.maximum(xph_ref[idx] * s1 + b1, 0.0)             # (Ho, Wo, Cin) f32
        h1_ref[idx, 1:Ho + 1, 1:Wo + 1, :Cin] = y                # lanes >= Cin stay 0

    # ---- stage 2: conv1 (3x3, stride s) as ONE K-concatenated MXU matmul.
    #      Scratch phase (p, q) holds h1 rows ==p (mod s) / cols ==q (mod s),
    #      shifted by the +1 spatial pad; every tap is a contiguous window.
    cols = []
    for ki in range(3):
        for kj in range(3):
            p, q = (ki - 1) % s, (kj - 1) % s
            r0, c0 = (ki - 1) // s + 1, (kj - 1) // s + 1
            win = h1_ref[p * s + q, r0:r0 + Ho, c0:c0 + Wo, :]   # (Ho, Wo, cin_p)
            cols.append(win.astype(jnp.bfloat16).reshape(M, cin_p))
    lhs1 = jnp.concatenate(cols, axis=-1)                        # (M, 9*cin_p) bf16
    acc1 = jnp.dot(lhs1, w1_ref[...], preferred_element_type=jnp.float32)
    if has_shortcut:
        # Extra output columns of the same dot = 1x1 strided shortcut
        # (its operand is exactly the centre-tap window).
        sc_ref[...] = acc1[:, cout_p:]
        acc1 = acc1[:, :cout_p]

    # ---- stage 3: h2 = relu(film2(bn2(conv1))) fused epilogue, written into the
    #      zero-bordered conv2-input scratch (conv2 halo also handled in VMEM).
    h2 = jnp.maximum(acc1 * s2_ref[...] + b2_ref[...], 0.0)      # (M, cout_p) f32
    h2_ref[1:Ho + 1, 1:Wo + 1, :] = h2.reshape(Ho, Wo, cout_p)

    # ---- stage 4: conv2 (3x3, stride 1) as one matmul + fused residual add.
    cols2 = []
    for ki in range(3):
        for kj in range(3):
            win = h2_ref[ki:ki + Ho, kj:kj + Wo, :]
            cols2.append(win.astype(jnp.bfloat16).reshape(M, cout_p))
    lhs2 = jnp.concatenate(cols2, axis=-1)                       # (M, 9*cout_p) bf16
    acc2 = jnp.dot(lhs2, w2_ref[...], preferred_element_type=jnp.float32)

    if has_shortcut:
        out_ref[...] = (acc2 + sc_ref[...]).reshape(Ho, Wo, cout_p)
    else:
        out_full = acc2.reshape(Ho, Wo, cout_p)
        if cout_p == Cin:
            out_ref[...] = out_full + xph_ref[0]
        else:
            out_ref[...] = out_full
            out_ref[:, :, :Cin] = out_full[:, :, :Cin] + xph_ref[0]


def fused_block(xph, w1, w2, s1, b1, s2, b2, *, stride, has_shortcut,
                Ho, Wo, Cin, cin_p, cout_p):
    N, P, Hx, Wx, _ = xph.shape
    assert Hx == Ho and Wx == Wo and P == stride * stride
    w1cols = w1.shape[1]
    kern = functools.partial(_block_kernel, stride, has_shortcut,
                             Ho, Wo, Cin, cin_p, cout_p)
    scratch = [pltpu.VMEM((P, Ho + 2, Wo + 2, cin_p), jnp.float32),   # h1 (padded)
               pltpu.VMEM((Ho + 2, Wo + 2, cout_p), jnp.float32)]     # h2 (padded)
    if has_shortcut:
        scratch.append(pltpu.VMEM((Ho * Wo, cout_p), jnp.float32))    # shortcut
    cost = pl.CostEstimate(
        flops=int(2 * N * Ho * Wo * (9 * cin_p * w1cols + 9 * cout_p * cout_p)
                  + 4 * N * P * Ho * Wo * Cin),
        transcendentals=0,
        bytes_accessed=int(xph.size * 4 + w1.size * 2 + w2.size * 2
                           + N * Ho * Wo * cout_p * 4 + 2 * (Cin + cout_p) * 4))
    return pl.pallas_call(
        kern,
        out_shape=jax.ShapeDtypeStruct((N, Ho, Wo, cout_p), jnp.float32),
        grid_spec=pltpu.PrefetchScalarGridSpec(
            num_scalar_prefetch=0,
            grid=(N,),
            in_specs=[
                pl.BlockSpec((None, P, Ho, Wo, Cin), lambda b: (b, 0, 0, 0, 0)),
                pl.BlockSpec((9 * cin_p, w1cols), lambda b: (0, 0)),
                pl.BlockSpec((9 * cout_p, cout_p), lambda b: (0, 0)),
                pl.BlockSpec((1, Cin), lambda b: (0, 0)),
                pl.BlockSpec((1, Cin), lambda b: (0, 0)),
                pl.BlockSpec((1, cout_p), lambda b: (0, 0)),
                pl.BlockSpec((1, cout_p), lambda b: (0, 0)),
            ],
            out_specs=pl.BlockSpec((None, Ho, Wo, cout_p), lambda b: (b, 0, 0, 0)),
            scratch_shapes=scratch),
        compiler_params=pltpu.CompilerParams(
            dimension_semantics=("parallel",),
            vmem_limit_bytes=VMEM_LIMIT_BYTES),
        cost_estimate=cost,
    )(xph, w1, w2,
      s1.reshape(1, Cin), b1.reshape(1, Cin),
      s2.reshape(1, cout_p), b2.reshape(1, cout_p))


# ------------------------------------ wrapper ------------------------------------
@functools.partial(jax.jit, static_argnames=("stride",))
def block_forward(x_nchw, params, stride):
    assert stride in (1, 2)
    N, Cin, H, W = x_nchw.shape
    assert H % stride == 0 and W % stride == 0
    planes = params["conv1_w"].shape[0]
    cin_p = _round_up(Cin, LANE)
    cout_p = _round_up(planes, LANE)
    Ho, Wo = H // stride, W // stride
    has_sc = "shortcut_w" in params
    if not has_sc:
        assert stride == 1 and Cin == planes, "identity shortcut needs matching shapes"

    # NCHW -> NHWC, channels left UNPADDED (the 128-lane pad happens in-register
    # inside the kernel).  For stride=2 the 2x2 phase split of the raw input is
    # the only remaining XLA-side data movement; h1/h2/shortcut stay in VMEM.
    x = jnp.transpose(x_nchw, (0, 2, 3, 1)).astype(jnp.float32)
    if stride == 1:
        xph = x[:, None]                                   # (N, 1, H, W, Cin), no copy
    else:
        xph = jnp.stack([x[:, p::stride, q::stride, :]
                         for p in range(stride) for q in range(stride)], axis=1)

    s1, b1 = fuse_bn_film(params["bn1"], params["film1"])       # (Cin,)
    s2, b2 = fuse_bn_film(params["bn2"], params["film2"])       # (planes,)
    s2 = jnp.pad(s2, (0, cout_p - planes))                      # pad 0 -> relu keeps 0
    b2 = jnp.pad(b2, (0, cout_p - planes))

    w1 = _pack_conv1_weights(params["conv1_w"], params.get("shortcut_w"),
                             cin_p, cout_p)
    w2 = _pack_conv3x3(params["conv2_w"], cout_p, cout_p).astype(jnp.bfloat16)

    out = fused_block(xph, w1, w2, s1, b1, s2, b2,
                      stride=stride, has_shortcut=has_sc,
                      Ho=Ho, Wo=Wo, Cin=Cin, cin_p=cin_p, cout_p=cout_p)

    # TODO(synk): when chaining blocks, keep this padded-NHWC tensor as the
    # inter-block format and only convert at network boundaries.
    out = out[..., :planes]
    return jnp.transpose(out, (0, 3, 1, 2))                     # NHWC -> NCHW


def init_block_params(key, in_planes, planes, stride):
    ks = jax.random.split(key, 8)

    def bn_params(k, c):
        k1, k2, k3, k4 = jax.random.split(k, 4)
        return dict(
            weight=jax.random.uniform(k1, (c,), jnp.float32, 0.5, 1.5),
            bias=jax.random.normal(k2, (c,), jnp.float32) * 0.1,
            running_mean=jax.random.normal(k3, (c,), jnp.float32) * 0.1,
            running_var=jax.random.uniform(k4, (c,), jnp.float32, 0.5, 1.5),
        )

    def film_params(k, c):
        k1, k2 = jax.random.split(k, 2)
        return dict(
            gamma=1.0 + 0.1 * jax.random.normal(k1, (c,), jnp.float32),
            beta=0.1 * jax.random.normal(k2, (c,), jnp.float32),
        )

    params = dict(
        bn1=bn_params(ks[0], in_planes),
        film1=film_params(ks[1], in_planes),
        conv1_w=jax.random.normal(ks[2], (planes, in_planes, 3, 3), jnp.float32)
        * (1.0 / (3 * 3 * in_planes) ** 0.5),
        bn2=bn_params(ks[3], planes),
        film2=film_params(ks[4], planes),
        conv2_w=jax.random.normal(ks[5], (planes, planes, 3, 3), jnp.float32)
        * (1.0 / (3 * 3 * planes) ** 0.5),
    )
    if stride != 1 or in_planes != planes:
        params["shortcut_w"] = jax.random.normal(
            ks[6], (planes, in_planes, 1, 1), jnp.float32) * (1.0 / in_planes ** 0.5)
    return params


# ------------------------------ reference (pure JAX) ------------------------------
def _conv_nhwc(x_nhwc, w_oihw, stride, padding, op_dtype):
    w_hwio = jnp.transpose(w_oihw, (2, 3, 1, 0)).astype(op_dtype)
    return jax.lax.conv_general_dilated(
        x_nhwc.astype(op_dtype), w_hwio, (stride, stride),
        [(padding, padding), (padding, padding)],
        dimension_numbers=("NHWC", "HWIO", "NHWC"),
        preferred_element_type=jnp.float32)


def block_forward_ref(x_nchw, params, stride, op_dtype=jnp.float32):
    x = jnp.transpose(x_nchw, (0, 2, 3, 1)).astype(jnp.float32)
    s1, b1 = fuse_bn_film(params["bn1"], params["film1"])
    h1 = jnp.maximum(x * s1 + b1, 0.0)
    if "shortcut_w" in params:
        shortcut = _conv_nhwc(h1, params["shortcut_w"], stride, 0, op_dtype)
    else:
        shortcut = x
    c1 = _conv_nhwc(h1, params["conv1_w"], stride, 1, op_dtype)
    s2, b2 = fuse_bn_film(params["bn2"], params["film2"])
    h2 = jnp.maximum(c1 * s2 + b2, 0.0)
    out = _conv_nhwc(h2, params["conv2_w"], 1, 1, op_dtype) + shortcut
    return jnp.transpose(out, (0, 3, 1, 2))


# ----------------------------------- main -----------------------------------
if __name__ == "__main__":
    key = jax.random.PRNGKey(0)
    k_x1, k_p1, k_x2, k_p2 = jax.random.split(key, 4)

    # Config 1: downsampling block with a 1x1 conv shortcut (stride 2).
    in_planes, planes, stride = 4, 8, 2
    xa = jax.random.normal(k_x1, (2, in_planes, 16, 16), jnp.float32)   # NCHW
    pa = init_block_params(k_p1, in_planes, planes, stride)
    out_a = jax.block_until_ready(block_forward(xa, pa, stride))
    assert out_a.shape == (2, planes, 8, 8), out_a.shape
    ref_a = block_forward_ref(xa, pa, stride, jnp.bfloat16)     # kernel-precision ref
    ref_a32 = block_forward_ref(xa, pa, stride, jnp.float32)    # module-semantics ref
    assert jnp.allclose(out_a, ref_a, rtol=2e-2, atol=2e-2), \
        float(jnp.max(jnp.abs(out_a - ref_a)))
    assert jnp.allclose(out_a, ref_a32, rtol=2e-1, atol=2e-1), \
        float(jnp.max(jnp.abs(out_a - ref_a32)))

    # Config 2: identity-shortcut block (stride 1, in_planes == planes).
    in2, planes2, stride2 = 8, 8, 1
    xb = jax.random.normal(k_x2, (2, in2, 16, 16), jnp.float32)
    pb = init_block_params(k_p2, in2, planes2, stride2)
    out_b = jax.block_until_ready(block_forward(xb, pb, stride2))
    assert out_b.shape == (2, planes2, 16, 16), out_b.shape
    ref_b = block_forward_ref(xb, pb, stride2, jnp.bfloat16)
    ref_b32 = block_forward_ref(xb, pb, stride2, jnp.float32)
    assert jnp.allclose(out_b, ref_b, rtol=2e-2, atol=2e-2), \
        float(jnp.max(jnp.abs(out_b - ref_b)))
    assert jnp.allclose(out_b, ref_b32, rtol=2e-1, atol=2e-1), \
        float(jnp.max(jnp.abs(out_b - ref_b32)))

    print("KERNEL_OK")
</pallas_src>

<mosaic_0001>
module attributes {stable_mosaic.version = 11 : i64} {
  func.func @_block_kernel(%arg0: i32, %arg1: memref<1x4x8x8x4xf32, #tpu.memory_space<vmem>>, %arg2: memref<1152x256xbf16, #tpu.memory_space<vmem>>, %arg3: memref<1152x128xbf16, #tpu.memory_space<vmem>>, %arg4: memref<1x4xf32, #tpu.memory_space<vmem>>, %arg5: memref<1x4xf32, #tpu.memory_space<vmem>>, %arg6: memref<1x128xf32, #tpu.memory_space<vmem>>, %arg7: memref<1x128xf32, #tpu.memory_space<vmem>>, %arg8: memref<1x8x8x128xf32, #tpu.memory_space<vmem>>, %arg9: memref<4x10x10x128xf32, #tpu.memory_space<vmem>>, %arg10: memref<10x10x128xf32, #tpu.memory_space<vmem>>, %arg11: memref<64x128xf32, #tpu.memory_space<vmem>>) attributes {dimension_semantics = [#tpu.dimension_semantics<parallel>], iteration_bounds = array<i64: 2>, scalar_prefetch = 0 : i64, scratch_operands = 3 : i64, tpu.core_type = #tpu.core_type<tc>, window_params = [{transform_indices = @transform_0, window_bounds = array<i64: 1, 4, 8, 8, 4>}, {pipeline_mode = #tpu.pipeline_mode<synchronous>, transform_indices = @transform_1, window_bounds = array<i64: 1152, 256>}, {pipeline_mode = #tpu.pipeline_mode<synchronous>, transform_indices = @transform_2, window_bounds = array<i64: 1152, 128>}, {pipeline_mode = #tpu.pipeline_mode<synchronous>, transform_indices = @transform_3, window_bounds = array<i64: 1, 4>}, {pipeline_mode = #tpu.pipeline_mode<synchronous>, transform_indices = @transform_4, window_bounds = array<i64: 1, 4>}, {pipeline_mode = #tpu.pipeline_mode<synchronous>, transform_indices = @transform_5, window_bounds = array<i64: 1, 128>}, {pipeline_mode = #tpu.pipeline_mode<synchronous>, transform_indices = @transform_6, window_bounds = array<i64: 1, 128>}, {transform_indices = @transform_7, window_bounds = array<i64: 1, 8, 8, 128>}]} {
    %cst = arith.constant 0.000000e+00 : f32
    %0 = vector.broadcast %cst : f32 to vector<4x10x10x128xf32>
    %c0 = arith.constant 0 : index
    %c0_0 = arith.constant 0 : index
    %c0_1 = arith.constant 0 : index
    %c0_2 = arith.constant 0 : index
    %1 = vector.load %arg9[%c0, %c0_0, %c0_1, %c0_2] : memref<4x10x10x128xf32, #tpu.memory_space<vmem>>, vector<4x10x10x128xf32>
    tpu.vector_store %arg9[%c0, %c0_0, %c0_1, %c0_2], %0 {strides = array<i32>} : memref<4x10x10x128xf32, #tpu.memory_space<vmem>>, vector<4x10x10x128xf32>,
    %cst_3 = arith.constant 0.000000e+00 : f32
    %2 = vector.broadcast %cst_3 : f32 to vector<10x10x128xf32>
    %c0_4 = arith.constant 0 : index
    %c0_5 = arith.constant 0 : index
    %c0_6 = arith.constant 0 : index
    %3 = vector.load %arg10[%c0_4, %c0_5, %c0_6] : memref<10x10x128xf32, #tpu.memory_space<vmem>>, vector<10x10x128xf32>
    tpu.vector_store %arg10[%c0_4, %c0_5, %c0_6], %2 {strides = array<i32>} : memref<10x10x128xf32, #tpu.memory_space<vmem>>, vector<10x10x128xf32>,
    %c0_7 = arith.constant 0 : index
    %c0_8 = arith.constant 0 : index
    %4 = vector.load %arg4[%c0_7, %c0_8] : memref<1x4xf32, #tpu.memory_space<vmem>>, vector<1x4xf32>
    %5 = vector.shape_cast %4 : vector<1x4xf32> to vector<1x1x4xf32>
    %c0_9 = arith.constant 0 : index
    %c0_10 = arith.constant 0 : index
    %6 = vector.load %arg5[%c0_9, %c0_10] : memref<1x4xf32, #tpu.memory_space<vmem>>, vector<1x4xf32>
    %7 = vector.shape_cast %6 : vector<1x4xf32> to vector<1x1x4xf32>
    %c0_11 = arith.constant 0 : index
    %c0_12 = arith.constant 0 : index
    %c0_13 = arith.constant 0 : index
    %c0_14 = arith.constant 0 : index
    %c0_15 = arith.constant 0 : index
    %8 = vector.load %arg1[%c0_11, %c0_12, %c0_13, %c0_14, %c0_15] : memref<1x4x8x8x4xf32, #tpu.memory_space<vmem>>, vector<1x1x8x8x4xf32>
    %9 = vector.shape_cast %8 : vector<1x1x8x8x4xf32> to vector<8x8x4xf32>
    %10 = vector.broadcast %5 : vector<1x1x4xf32> to vector<8x8x4xf32>
    %11 = arith.mulf %9, %10 : vector<8x8x4xf32>
    %12 = vector.broadcast %7 : vector<1x1x4xf32> to vector<8x8x4xf32>
    %13 = arith.addf %11, %12 : vector<8x8x4xf32>
    %cst_16 = arith.constant 0.000000e+00 : f32
    %14 = vector.broadcast %cst_16 : f32 to vector<8x8x4xf32>
    %15 = arith.maximumf %13, %14 : vector<8x8x4xf32>
    %c0_17 = arith.constant 0 : index
    %c1 = arith.constant 1 : index
    %c1_18 = arith.constant 1 : index
    %c0_19 = arith.constant 0 : index
    %16 = vector.load %arg9[%c0_17, %c1, %c1_18, %c0_19] : memref<4x10x10x128xf32, #tpu.memory_space<vmem>>, vector<1x8x8x4xf32>
    %17 = vector.shape_cast %16 : vector<1x8x8x4xf32> to vector<8x8x4xf32>
    %18 = vector.shape_cast %15 : vector<8x8x4xf32> to vector<1x8x8x4xf32>
    tpu.vector_store %arg9[%c0_17, %c1, %c1_18, %c0_19], %18 {strides = array<i32>} : memref<4x10x10x128xf32, #tpu.memory_space<vmem>>, vector<1x8x8x4xf32>,
    %c0_20 = arith.constant 0 : index
    %c1_21 = arith.constant 1 : index
    %c0_22 = arith.constant 0 : index
    %c0_23 = arith.constant 0 : index
    %c0_24 = arith.constant 0 : index
    %19 = vector.load %arg1[%c0_20, %c1_21, %c0_22, %c0_23, %c0_24] : memref<1x4x8x8x4xf32, #tpu.memory_space<vmem>>, vector<1x1x8x8x4xf32>
    %20 = vector.shape_cast %19 : vector<1x1x8x8x4xf32> to vector<8x8x4xf32>
    %21 = vector.broadcast %5 : vector<1x1x4xf32> to vector<8x8x4xf32>
    %22 = arith.mulf %20, %21 : vector<8x8x4xf32>
    %23 = vector.broadcast %7 : vector<1x1x4xf32> to vector<8x8x4xf32>
    %24 = arith.addf %22, %23 : vector<8x8x4xf32>
    %cst_25 = arith.constant 0.000000e+00 : f32
    %25 = vector.broadcast %cst_25 : f32 to vector<8x8x4xf32>
    %26 = arith.maximumf %24, %25 : vector<8x8x4xf32>
    %c1_26 = arith.constant 1 : index
    %c1_27 = arith.constant 1 : index
    %c1_28 = arith.constant 1 : index
    %c0_29 = arith.constant 0 : index
    %27 = vector.load %arg9[%c1_26, %c1_27, %c1_28, %c0_29] : memref<4x10x10x128xf32, #tpu.memory_space<vmem>>, vector<1x8x8x4xf32>
    %28 = vector.shape_cast %27 : vector<1x8x8x4xf32> to vector<8x8x4xf32>
    %29 = vector.shape_cast %26 : vector<8x8x4xf32> to vector<1x8x8x4xf32>
    tpu.vector_store %arg9[%c1_26, %c1_27, %c1_28, %c0_29], %29 {strides = array<i32>} : memref<4x10x10x128xf32, #tpu.memory_space<vmem>>, vector<1x8x8x4xf32>,
    %c0_30 = arith.constant 0 : index
    %c2 = arith.constant 2 : index
    %c0_31 = arith.constant 0 : index
    %c0_32 = arith.constant 0 : index
    %c0_33 = arith.constant 0 : index
    %30 = vector.load %arg1[%c0_30, %c2, %c0_31, %c0_32, %c0_33] : memref<1x4x8x8x4xf32, #tpu.memory_space<vmem>>, vector<1x1x8x8x4xf32>
    %31 = vector.shape_cast %30 : vector<1x1x8x8x4xf32> to vector<8x8x4xf32>
    %32 = vector.broadcast %5 : vector<1x1x4xf32> to vector<8x8x4xf32>
    %33 = arith.mulf %31, %32 : vector<8x8x4xf32>
    %34 = vector.broadcast %7 : vector<1x1x4xf32> to vector<8x8x4xf32>
    %35 = arith.addf %33, %34 : vector<8x8x4xf32>
    %cst_34 = arith.constant 0.000000e+00 : f32
    %36 = vector.broadcast %cst_34 : f32 to vector<8x8x4xf32>
    %37 = arith.maximumf %35, %36 : vector<8x8x4xf32>
    %c2_35 = arith.constant 2 : index
    %c1_36 = arith.constant 1 : index
    %c1_37 = arith.constant 1 : index
    %c0_38 = arith.constant 0 : index
    %38 = vector.load %arg9[%c2_35, %c1_36, %c1_37, %c0_38] : memref<4x10x10x128xf32, #tpu.memory_space<vmem>>, vector<1x8x8x4xf32>
    %39 = vector.shape_cast %38 : vector<1x8x8x4xf32> to vector<8x8x4xf32>
    %40 = vector.shape_cast %37 : vector<8x8x4xf32> to vector<1x8x8x4xf32>
    tpu.vector_store %arg9[%c2_35, %c1_36, %c1_37, %c0_38], %40 {strides = array<i32>} : memref<4x10x10x128xf32, #tpu.memory_space<vmem>>, vector<1x8x8x4xf32>,
    %c0_39 = arith.constant 0 : index
    %c3 = arith.constant 3 : index
    %c0_40 = arith.constant 0 : index
    %c0_41 = arith.constant 0 : index
    %c0_42 = arith.constant 0 : index
    %41 = vector.load %arg1[%c0_39, %c3, %c0_40, %c0_41, %c0_42] : memref<1x4x8x8x4xf32, #tpu.memory_space<vmem>>, vector<1x1x8x8x4xf32>
    %42 = vector.shape_cast %41 : vector<1x1x8x8x4xf32> to vector<8x8x4xf32>
    %43 = vector.broadcast %5 : vector<1x1x4xf32> to vector<8x8x4xf32>
    %44 = arith.mulf %42, %43 : vector<8x8x4xf32>
    %45 = vector.broadcast %7 : vector<1x1x4xf32> to vector<8x8x4xf32>
    %46 = arith.addf %44, %45 : vector<8x8x4xf32>
    %cst_43 = arith.constant 0.000000e+00 : f32
    %47 = vector.broadcast %cst_43 : f32 to vector<8x8x4xf32>
    %48 = arith.maximumf %46, %47 : vector<8x8x4xf32>
    %c3_44 = arith.constant 3 : index
    %c1_45 = arith.constant 1 : index
    %c1_46 = arith.constant 1 : index
    %c0_47 = arith.constant 0 : index
    %49 = vector.load %arg9[%c3_44, %c1_45, %c1_46, %c0_47] : memref<4x10x10x128xf32, #tpu.memory_space<vmem>>, vector<1x8x8x4xf32>
    %50 = vector.shape_cast %49 : vector<1x8x8x4xf32> to vector<8x8x4xf32>
    %51 = vector.shape_cast %48 : vector<8x8x4xf32> to vector<1x8x8x4xf32>
    tpu.vector_store %arg9[%c3_44, %c1_45, %c1_46, %c0_47], %51 {strides = array<i32>} : memref<4x10x10x128xf32, #tpu.memory_space<vmem>>, vector<1x8x8x4xf32>,
    %c3_48 = arith.constant 3 : index
    %c0_49 = arith.constant 0 : index
    %c0_50 = arith.constant 0 : index
    %c0_51 = arith.constant 0 : index
    %52 = vector.load %arg9[%c3_48, %c0_49, %c0_50, %c0_51] : memref<4x10x10x128xf32, #tpu.memory_space<vmem>>, vector<1x8x8x128xf32>
    %53 = vector.shape_cast %52 : vector<1x8x8x128xf32> to vector<8x8x128xf32>
    %54 = arith.truncf %53 : vector<8x8x128xf32> to vector<8x8x128xbf16>
    %55 = vector.shape_cast %54 : vector<8x8x128xbf16> to vector<64x128xbf16>
    %c2_52 = arith.constant 2 : index
    %c0_53 = arith.constant 0 : index
    %c1_54 = arith.constant 1 : index
    %c0_55 = arith.constant 0 : index
    %56 = vector.load %arg9[%c2_52, %c0_53, %c1_54, %c0_55] : memref<4x10x10x128xf32, #tpu.memory_space<vmem>>, vector<1x8x8x128xf32>
    %57 = vector.shape_cast %56 : vector<1x8x8x128xf32> to vector<8x8x128xf32>
    %58 = arith.truncf %57 : vector<8x8x128xf32> to vector<8x8x128xbf16>
    %59 = vector.shape_cast %58 : vector<8x8x128xbf16> to vector<64x128xbf16>
    %c3_56 = arith.constant 3 : index
    %c0_57 = arith.constant 0 : index
    %c1_58 = arith.constant 1 : index
    %c0_59 = arith.constant 0 : index
    %60 = vector.load %arg9[%c3_56, %c0_57, %c1_58, %c0_59] : memref<4x10x10x128xf32, #tpu.memory_space<vmem>>, vector<1x8x8x128xf32>
    %61 = vector.shape_cast %60 : vector<1x8x8x128xf32> to vector<8x8x128xf32>
    %62 = arith.truncf %61 : vector<8x8x128xf32> to vector<8x8x128xbf16>
    %63 = vector.shape_cast %62 : vector<8x8x128xbf16> to vector<64x128xbf16>
    %c1_60 = arith.constant 1 : index
    %c1_61 = arith.constant 1 : index
    %c0_62 = arith.constant 0 : index
    %c0_63 = arith.constant 0 : index
    %64 = vector.load %arg9[%c1_60, %c1_61, %c0_62, %c0_63] : memref<4x10x10x128xf32, #tpu.memory_space<vmem>>, vector<1x8x8x128xf32>
    %65 = vector.shape_cast %64 : vector<1x8x8x128xf32> to vector<8x8x128xf32>
    %66 = arith.truncf %65 : vector<8x8x128xf32> to vector<8x8x128xbf16>
    %67 = vector.shape_cast %66 : vector<8x8x128xbf16> to vector<64x128xbf16>
    %c0_64 = arith.constant 0 : index
    %c1_65 = arith.constant 1 : index
    %c1_66 = arith.constant 1 : index
    %c0_67 = arith.constant 0 : index
    %68 = vector.load %arg9[%c0_64, %c1_65, %c1_66, %c0_67] : memref<4x10x10x128xf32, #tpu.memory_space<vmem>>, vector<1x8x8x128xf32>
    %69 = vector.shape_cast %68 : vector<1x8x8x128xf32> to vector<8x8x128xf32>
    %70 = arith.truncf %69 : vector<8x8x128xf32> to vector<8x8x128xbf16>
    %71 = vector.shape_cast %70 : vector<8x8x128xbf16> to vector<64x128xbf16>
    %c1_68 = arith.constant 1 : index
    %c1_69 = arith.constant 1 : index
    %c1_70 = arith.constant 1 : index
    %c0_71 = arith.constant 0 : index
    %72 = vector.load %arg9[%c1_68, %c1_69, %c1_70, %c0_71] : memref<4x10x10x128xf32, #tpu.memory_space<vmem>>, vector<1x8x8x128xf32>
    %73 = vector.shape_cast %72 : vector<1x8x8x128xf32> to vector<8x8x128xf32>
    %74 = arith.truncf %73 : vector<8x8x128xf32> to vector<8x8x128xbf16>
    %75 = vector.shape_cast %74 : vector<8x8x128xbf16> to vector<64x128xbf16>
    %c3_72 = arith.constant 3 : index
    %c1_73 = arith.constant 1 : index
    %c0_74 = arith.constant 0 : index
    %c0_75 = arith.constant 0 : index
    %76 = vector.load %arg9[%c3_72, %c1_73, %c0_74, %c0_75] : memref<4x10x10x128xf32, #tpu.memory_space<vmem>>, vector<1x8x8x128xf32>
    %77 = vector.shape_cast %76 : vector<1x8x8x128xf32> to vector<8x8x128xf32>
    %78 = arith.truncf %77 : vector<8x8x128xf32> to vector<8x8x128xbf16>
    %79 = vector.shape_cast %78 : vector<8x8x128xbf16> to vector<64x128xbf16>
    %c2_76 = arith.constant 2 : index
    %c1_77 = arith.constant 1 : index
    %c1_78 = arith.constant 1 : index
    %c0_79 = arith.constant 0 : index
    %80 = vector.load %arg9[%c2_76, %c1_77, %c1_78, %c0_79] : memref<4x10x10x128xf32, #tpu.memory_space<vmem>>, vector<1x8x8x128xf32>
    %81 = vector.shape_cast %80 : vector<1x8x8x128xf32> to vector<8x8x128xf32>
    %82 = arith.truncf %81 : vector<8x8x128xf32> to vector<8x8x128xbf16>
    %83 = vector.shape_cast %82 : vector<8x8x128xbf16> to vector<64x128xbf16>
    %c3_80 = arith.constant 3 : index
    %c1_81 = arith.constant 1 : index
    %c1_82 = arith.constant 1 : index
    %c0_83 = arith.constant 0 : index
    %84 = vector.load %arg9[%c3_80, %c1_81, %c1_82, %c0_83] : memref<4x10x10x128xf32, #tpu.memory_space<vmem>>, vector<1x8x8x128xf32>
    %85 = vector.shape_cast %84 : vector<1x8x8x128xf32> to vector<8x8x128xf32>
    %86 = arith.truncf %85 : vector<8x8x128xf32> to vector<8x8x128xbf16>
    %87 = vector.shape_cast %86 : vector<8x8x128xbf16> to vector<64x128xbf16>
    %88 = tpu.concatenate %55, %59, %63, %67, %71, %75, %79, %83, %87 in 1 : vector<64x128xbf16>, vector<64x128xbf16>, vector<64x128xbf16>, vector<64x128xbf16>, vector<64x128xbf16>, vector<64x128xbf16>, vector<64x128xbf16>, vector<64x128xbf16>, vector<64x128xbf16> -> vector<64x1152xbf16>
    %c0_84 = arith.constant 0 : index
    %c0_85 = arith.constant 0 : index
    %89 = vector.load %arg2[%c0_84, %c0_85] : memref<1152x256xbf16, #tpu.memory_space<vmem>>, vector<1152x256xbf16>
    %cst_86 = arith.constant dense<0.000000e+00> : vector<64x256xf32>
    %90 = tpu.matmul %88, %89, %cst_86 {dimension_numbers = #tpu.dot_dimension_numbers<[1], [0], [0], [1], [0, 0, 1, 1], [], []>} : vector<64x1152xbf16>, vector<1152x256xbf16>, vector<64x256xf32> -> vector<64x256xf32>
    %91 = vector.extract_strided_slice %90 {offsets = [0, 128], sizes = [64, 128], strides = [1, 1]} : vector<64x256xf32> to vector<64x128xf32>
    %c0_87 = arith.constant 0 : index
    %c0_88 = arith.constant 0 : index
    %92 = vector.load %arg11[%c0_87, %c0_88] : memref<64x128xf32, #tpu.memory_space<vmem>>, vector<64x128xf32>
    tpu.vector_store %arg11[%c0_87, %c0_88], %91 {strides = array<i32>} : memref<64x128xf32, #tpu.memory_space<vmem>>, vector<64x128xf32>,
    %93 = vector.extract_strided_slice %90 {offsets = [0, 0], sizes = [64, 128], strides = [1, 1]} : vector<64x256xf32> to vector<64x128xf32>
    %c0_89 = arith.constant 0 : index
    %c0_90 = arith.constant 0 : index
    %94 = vector.load %arg6[%c0_89, %c0_90] : memref<1x128xf32, #tpu.memory_space<vmem>>, vector<1x128xf32>
    %95 = vector.broadcast %94 : vector<1x128xf32> to vector<64x128xf32>
    %96 = arith.mulf %93, %95 : vector<64x128xf32>
    %c0_91 = arith.constant 0 : index
    %c0_92 = arith.constant 0 : index
    %97 = vector.load %arg7[%c0_91, %c0_92] : memref<1x128xf32, #tpu.memory_space<vmem>>, vector<1x128xf32>
    %98 = vector.broadcast %97 : vector<1x128xf32> to vector<64x128xf32>
    %99 = arith.addf %96, %98 : vector<64x128xf32>
    %cst_93 = arith.constant 0.000000e+00 : f32
    %100 = vector.broadcast %cst_93 : f32 to vector<64x128xf32>
    %101 = arith.maximumf %99, %100 : vector<64x128xf32>
    %102 = vector.shape_cast %101 : vector<64x128xf32> to vector<8x8x128xf32>
    %c1_94 = arith.constant 1 : index
    %c1_95 = arith.constant 1 : index
    %c0_96 = arith.constant 0 : index
    %103 = vector.load %arg10[%c1_94, %c1_95, %c0_96] : memref<10x10x128xf32, #tpu.memory_space<vmem>>, vector<8x8x128xf32>
    tpu.vector_store %arg10[%c1_94, %c1_95, %c0_96], %102 {strides = array<i32>} : memref<10x10x128xf32, #tpu.memory_space<vmem>>, vector<8x8x128xf32>,
    %c0_97 = arith.constant 0 : index
    %c0_98 = arith.constant 0 : index
    %c0_99 = arith.constant 0 : index
    %104 = vector.load %arg10[%c0_97, %c0_98, %c0_99] : memref<10x10x128xf32, #tpu.memory_space<vmem>>, vector<8x8x128xf32>
    %105 = arith.truncf %104 : vector<8x8x128xf32> to vector<8x8x128xbf16>
    %106 = vector.shape_cast %105 : vector<8x8x128xbf16> to vector<64x128xbf16>
    %c0_100 = arith.constant 0 : index
    %c1_101 = arith.constant 1 : index
    %c0_102 = arith.constant 0 : index
    %107 = vector.load %arg10[%c0_100, %c1_101, %c0_102] : memref<10x10x128xf32, #tpu.memory_space<vmem>>, vector<8x8x128xf32>
    %108 = arith.truncf %107 : vector<8x8x128xf32> to vector<8x8x128xbf16>
    %109 = vector.shape_cast %108 : vector<8x8x128xbf16> to vector<64x128xbf16>
    %c0_103 = arith.constant 0 : index
    %c2_104 = arith.constant 2 : index
    %c0_105 = arith.constant 0 : index
    %110 = vector.load %arg10[%c0_103, %c2_104, %c0_105] : memref<10x10x128xf32, #tpu.memory_space<vmem>>, vector<8x8x128xf32>
    %111 = arith.truncf %110 : vector<8x8x128xf32> to vector<8x8x128xbf16>
    %112 = vector.shape_cast %111 : vector<8x8x128xbf16> to vector<64x128xbf16>
    %c1_106 = arith.constant 1 : index
    %c0_107 = arith.constant 0 : index
    %c0_108 = arith.constant 0 : index
    %113 = vector.load %arg10[%c1_106, %c0_107, %c0_108] : memref<10x10x128xf32, #tpu.memory_space<vmem>>, vector<8x8x128xf32>
    %114 = arith.truncf %113 : vector<8x8x128xf32> to vector<8x8x128xbf16>
    %115 = vector.shape_cast %114 : vector<8x8x128xbf16> to vector<64x128xbf16>
    %c1_109 = arith.constant 1 : index
    %c1_110 = arith.constant 1 : index
    %c0_111 = arith.constant 0 : index
    %116 = vector.load %arg10[%c1_109, %c1_110, %c0_111] : memref<10x10x128xf32, #tpu.memory_space<vmem>>, vector<8x8x128xf32>
    %117 = arith.truncf %116 : vector<8x8x128xf32> to vector<8x8x128xbf16>
    %118 = vector.shape_cast %117 : vector<8x8x128xbf16> to vector<64x128xbf16>
    %c1_112 = arith.constant 1 : index
    %c2_113 = arith.constant 2 : index
    %c0_114 = arith.constant 0 : index
    %119 = vector.load %arg10[%c1_112, %c2_113, %c0_114] : memref<10x10x128xf32, #tpu.memory_space<vmem>>, vector<8x8x128xf32>
    %120 = arith.truncf %119 : vector<8x8x128xf32> to vector<8x8x128xbf16>
    %121 = vector.shape_cast %120 : vector<8x8x128xbf16> to vector<64x128xbf16>
    %c2_115 = arith.constant 2 : index
    %c0_116 = arith.constant 0 : index
    %c0_117 = arith.constant 0 : index
    %122 = vector.load %arg10[%c2_115, %c0_116, %c0_117] : memref<10x10x128xf32, #tpu.memory_space<vmem>>, vector<8x8x128xf32>
    %123 = arith.truncf %122 : vector<8x8x128xf32> to vector<8x8x128xbf16>
    %124 = vector.shape_cast %123 : vector<8x8x128xbf16> to vector<64x128xbf16>
    %c2_118 = arith.constant 2 : index
    %c1_119 = arith.constant 1 : index
    %c0_120 = arith.constant 0 : index
    %125 = vector.load %arg10[%c2_118, %c1_119, %c0_120] : memref<10x10x128xf32, #tpu.memory_space<vmem>>, vector<8x8x128xf32>
    %126 = arith.truncf %125 : vector<8x8x128xf32> to vector<8x8x128xbf16>
    %127 = vector.shape_cast %126 : vector<8x8x128xbf16> to vector<64x128xbf16>
    %c2_121 = arith.constant 2 : index
    %c2_122 = arith.constant 2 : index
    %c0_123 = arith.constant 0 : index
    %128 = vector.load %arg10[%c2_121, %c2_122, %c0_123] : memref<10x10x128xf32, #tpu.memory_space<vmem>>, vector<8x8x128xf32>
    %129 = arith.truncf %128 : vector<8x8x128xf32> to vector<8x8x128xbf16>
    %130 = vector.shape_cast %129 : vector<8x8x128xbf16> to vector<64x128xbf16>
    %131 = tpu.concatenate %106, %109, %112, %115, %118, %121, %124, %127, %130 in 1 : vector<64x128xbf16>, vector<64x128xbf16>, vector<64x128xbf16>, vector<64x128xbf16>, vector<64x128xbf16>, vector<64x128xbf16>, vector<64x128xbf16>, vector<64x128xbf16>, vector<64x128xbf16> -> vector<64x1152xbf16>
    %c0_124 = arith.constant 0 : index
    %c0_125 = arith.constant 0 : index
    %132 = vector.load %arg3[%c0_124, %c0_125] : memref<1152x128xbf16, #tpu.memory_space<vmem>>, vector<1152x128xbf16>
    %cst_126 = arith.constant dense<0.000000e+00> : vector<64x128xf32>
    %133 = tpu.matmul %131, %132, %cst_126 {dimension_numbers = #tpu.dot_dimension_numbers<[1], [0], [0], [1], [0, 0, 1, 1], [], []>} : vector<64x1152xbf16>, vector<1152x128xbf16>, vector<64x128xf32> -> vector<64x128xf32>
    %c0_127 = arith.constant 0 : index
    %c0_128 = arith.constant 0 : index
    %134 = vector.load %arg11[%c0_127, %c0_128] : memref<64x128xf32, #tpu.memory_space<vmem>>, vector<64x128xf32>
    %135 = arith.addf %133, %134 : vector<64x128xf32>
    %136 = vector.shape_cast %135 : vector<64x128xf32> to vector<8x8x128xf32>
    %c0_129 = arith.constant 0 : index
    %c0_130 = arith.constant 0 : index
    %c0_131 = arith.constant 0 : index
    %c0_132 = arith.constant 0 : index
    %137 = vector.load %arg8[%c0_129, %c0_130, %c0_131, %c0_132] : memref<1x8x8x128xf32, #tpu.memory_space<vmem>>, vector<1x8x8x128xf32>
    %138 = vector.shape_cast %137 : vector<1x8x8x128xf32> to vector<8x8x128xf32>
    %139 = vector.shape_cast %136 : vector<8x8x128xf32> to vector<1x8x8x128xf32>
    tpu.vector_store %arg8[%c0_129, %c0_130, %c0_131, %c0_132], %139 {strides = array<i32>} : memref<1x8x8x128xf32, #tpu.memory_space<vmem>>, vector<1x8x8x128xf32>,
    return
  }
  func.func @transform_0(%arg0: i32) -> (i32, i32, i32, i32, i32) {
    %c0_i32 = arith.constant 0 : i32
    %c0_i32_0 = arith.constant 0 : i32
    %c0_i32_1 = arith.constant 0 : i32
    %c0_i32_2 = arith.constant 0 : i32
    %c0_i32_3 = arith.constant 0 : i32
    return %arg0, %c0_i32, %c0_i32_0, %c0_i32_1, %c0_i32_2 : i32, i32, i32, i32, i32
  }
  func.func @transform_1(%arg0: i32) -> (i32, i32) {
    %c0_i32 = arith.constant 0 : i32
    %c0_i32_0 = arith.constant 0 : i32
    %c0_i32_1 = arith.constant 0 : i32
    return %c0_i32, %c0_i32_0 : i32, i32
  }
  func.func @transform_2(%arg0: i32) -> (i32, i32) {
    %c0_i32 = arith.constant 0 : i32
    %c0_i32_0 = arith.constant 0 : i32
    %c0_i32_1 = arith.constant 0 : i32
    return %c0_i32, %c0_i32_0 : i32, i32
  }
  func.func @transform_3(%arg0: i32) -> (i32, i32) {
    %c0_i32 = arith.constant 0 : i32
    %c0_i32_0 = arith.constant 0 : i32
    %c0_i32_1 = arith.constant 0 : i32
    return %c0_i32, %c0_i32_0 : i32, i32
  }
  func.func @transform_4(%arg0: i32) -> (i32, i32) {
    %c0_i32 = arith.constant 0 : i32
    %c0_i32_0 = arith.constant 0 : i32
    %c0_i32_1 = arith.constant 0 : i32
    return %c0_i32, %c0_i32_0 : i32, i32
  }
  func.func @transform_5(%arg0: i32) -> (i32, i32) {
    %c0_i32 = arith.constant 0 : i32
    %c0_i32_0 = arith.constant 0 : i32
    %c0_i32_1 = arith.constant 0 : i32
    return %c0_i32, %c0_i32_0 : i32, i32
  }
  func.func @transform_6(%arg0: i32) -> (i32, i32) {
    %c0_i32 = arith.constant 0 : i32
    %c0_i32_0 = arith.constant 0 : i32
    %c0_i32_1 = arith.constant 0 : i32
    return %c0_i32, %c0_i32_0 : i32, i32
  }
  func.func @transform_7(%arg0: i32) -> (i32, i32, i32, i32) {
    %c0_i32 = arith.constant 0 : i32
    %c0_i32_0 = arith.constant 0 : i32
    %c0_i32_1 = arith.constant 0 : i32
    %c0_i32_2 = arith.constant 0 : i32
    return %arg0, %c0_i32, %c0_i32_0, %c0_i32_1 : i32, i32, i32, i32
  }
}

</mosaic_0001>

<bundles_post_ra>
// kernel: block_forward.1
= control target key start
LH: loop header
LB: loop body
LE: loop exit
PB: predicated region body
PF: predicated region fallthrough
CT: control target
= control target key end

     0   :  { %s4828_s24 = smov 0   ;;  %s6835_s0 = inlined_call_operand.vmem [shape: f32[2,4,8,8,4], index: 0, kind: input, shape index: {}]   ;;  %s6836_s1 = inlined_call_operand.vmem [shape: bf16[1152,256], index: 1, kind: input, shape index: {}]   ;;  %s6837_s2 = inlined_call_operand.vmem [shape: bf16[1152,128], index: 2, kind: input, shape index: {}]   ;;  %s6838_s3 = inlined_call_operand.vmem [shape: f32[1,4], index: 3, kind: input, shape index: {}]   ;;  %s6839_s4 = inlined_call_operand.vmem [shape: f32[1,4], index: 4, kind: input, shape index: {}]   ;;  %s6840_s5 = inlined_call_operand.vmem [shape: f32[1,128], index: 5, kind: input, shape index: {}]   ;;  %s6841_s6 = inlined_call_operand.vmem [shape: f32[1,128], index: 6, kind: input, shape index: {}]   ;;  %s6842_s7 = inlined_call_operand.vmem [shape: f32[2,8,8,128], index: 7, kind: output, shape index: {}]  }
   0x1 LB: > { %s3621_s25 = sadd.s32 4294967295, %s4784_s24   ;;  %p3625_p0 = scmp.ge.s32.totalorder %s4784_s24, 1  ;;  %s4784_s24 = sphi %s4828_s24, %s17_s24  }
   0x2   : > { %p237_p1 = scmp.lt.s32.totalorder %s4784_s24, 3 }
   0x4   : > { %p238_p2 = pnand %p3625_p0, %p237_p1 }
   0x5   : > { %p269_p3 = scmp.lt.s32.totalorder (!%p238_p2), %s3621_s25, 1 }
   0x6   : > { %241 = sbr.rel (%p238_p2) target bundleno = 689 (0x2b1), region = 48 }
   0xb   : > { %v3712_v0 = vld [vmem:[%s6836_s1 + $0x70] sm:$0xf]  ;;  %v4537_v1 = vld [vmem:[%s6836_s1 + $0x74] sm:$0xf0]  ;;  %v3704_v9 = vld [vmem:[%s6836_s1 + $0x60] sm:$0xf] }
   0xc   : > { %v3776_v2 = vld [vmem:[%s6836_s1 + $0xf0] sm:$0xf]  ;;  %v3713_v3 = vor.u32 %v4537_v1, %v3712_v0  ;;  %v4553_v4 = vld [vmem:[%s6836_s1 + $0xf4] sm:$0xf0]  ;;  %v4535_v10 = vld [vmem:[%s6836_s1 + $0x64] sm:$0xf0] }
   0xd   : > { %v3840_v5 = vld [vmem:[%s6836_s1 + $0x170] sm:$0xf]  ;;  %v4569_v6 = vld [vmem:[%s6836_s1 + $0x174] sm:$0xf0]  ;;  %v3777_v7 = vor.u32 %v4553_v4, %v3776_v2  ;;  %v3768_v11 = vld [vmem:[%s6836_s1 + $0xe0] sm:$0xf]  ;;  %v3705_v12 = vor.u32 %v4535_v10, %v3704_v9 }
   0xe   : > { %v3841_v8 = vor.u32 %v4569_v6, %v3840_v5  ;;  %1781 = vmatpush.bf16.msra.mxu0 %v3713_v3  ;;  %4738 = vmatpush.bf16.msra.mxu3 %v3713_v3  ;;  %v4551_v13 = vld [vmem:[%s6836_s1 + $0xe4] sm:$0xf0]  ;;  %v3832_v14 = vld [vmem:[%s6836_s1 + $0x160] sm:$0xf]  ;;  %v3696_v18 = vld [vmem:[%s6836_s1 + $0x50] sm:$0xf] }
   0xf   : > { %v4567_v15 = vld [vmem:[%s6836_s1 + $0x164] sm:$0xf0]  ;;  %1810 = vmatpush.bf16.msra.mxu1 %v3777_v7  ;;  %v3769_v16 = vor.u32 %v4551_v13, %v3768_v11  ;;  %v4533_v19 = vld [vmem:[%s6836_s1 + $0x54] sm:$0xf0]  ;;  %v3760_v20 = vld [vmem:[%s6836_s1 + $0xd0] sm:$0xf] }
  0x10   : > { %1839 = vmatpush.bf16.msra.mxu2 %v3841_v8  ;;  %v3833_v17 = vor.u32 %v4567_v15, %v3832_v14  ;;  %v4549_v21 = vld [vmem:[%s6836_s1 + $0xd4] sm:$0xf0]  ;;  %v3824_v22 = vld [vmem:[%s6836_s1 + $0x150] sm:$0xf]  ;;  %v3697_v24 = vor.u32 %v4533_v19, %v3696_v18  ;;  %v3688_v27 = vld [vmem:[%s6836_s1 + $0x40] sm:$0xf] }
  0x11   : > { %v4565_v23 = vld [vmem:[%s6836_s1 + $0x154] sm:$0xf0]  ;;  %v3761_v25 = vor.u32 %v4549_v21, %v3760_v20  ;;  %v4531_v28 = vld [vmem:[%s6836_s1 + $0x44] sm:$0xf0]  ;;  %v3752_v29 = vld [vmem:[%s6836_s1 + $0xc0] sm:$0xf] }
  0x12   : > { %1782 = vmatpush.bf16.msra.mxu0 %v3705_v12  ;;  %4739 = vmatpush.bf16.msra.mxu3 %v3705_v12  ;;  %v3825_v26 = vor.u32 %v4565_v23, %v3824_v22  ;;  %v4547_v30 = vld [vmem:[%s6836_s1 + $0xc4] sm:$0xf0]  ;;  %v3816_v31 = vld [vmem:[%s6836_s1 + $0x140] sm:$0xf]  ;;  %v3689_v33 = vor.u32 %v4531_v28, %v3688_v27  ;;  %v3680_v36 = vld [vmem:[%s6836_s1 + $0x30] sm:$0xf] }
  0x13   : > { %1811 = vmatpush.bf16.msra.mxu1 %v3769_v16  ;;  %v4563_v32 = vld [vmem:[%s6836_s1 + $0x144] sm:$0xf0]  ;;  %v3753_v34 = vor.u32 %v4547_v30, %v3752_v29  ;;  %v4529_v37 = vld [vmem:[%s6836_s1 + $0x34] sm:$0xf0]  ;;  %v3744_v38 = vld [vmem:[%s6836_s1 + $0xb0] sm:$0xf] }
  0x14   : > { %1840 = vmatpush.bf16.msra.mxu2 %v3833_v17  ;;  %v3817_v35 = vor.u32 %v4563_v32, %v3816_v31  ;;  %v4545_v39 = vld [vmem:[%s6836_s1 + $0xb4] sm:$0xf0]  ;;  %v3808_v40 = vld [vmem:[%s6836_s1 + $0x130] sm:$0xf]  ;;  %v3672_v42 = vld [vmem:[%s6836_s1 + $0x20] sm:$0xf]  ;;  %v3681_v43 = vor.u32 %v4529_v37, %v3680_v36 }
  0x15   : > { %v4561_v41 = vld [vmem:[%s6836_s1 + $0x134] sm:$0xf0]  ;;  %v4527_v44 = vld [vmem:[%s6836_s1 + $0x24] sm:$0xf0]  ;;  %v3736_v45 = vld [vmem:[%s6836_s1 + $0xa0] sm:$0xf]  ;;  %v3745_v47 = vor.u32 %v4545_v39, %v3744_v38 }
  0x16   : > { %1783 = vmatpush.bf16.msra.mxu0 %v3697_v24  ;;  %4740 = vmatpush.bf16.msra.mxu3 %v3697_v24  ;;  %v4543_v46 = vld [vmem:[%s6836_s1 + $0xa4] sm:$0xf0]  ;;  %v3809_v48 = vor.u32 %v4561_v41, %v3808_v40  ;;  %v3800_v49 = vld [vmem:[%s6836_s1 + $0x120] sm:$0xf]  ;;  %v4786_v51 = vmov 0.0   ;;  %s6844_s25 = smov (!%p269_p3, %s3621_s25), 1  ;;  %v3673_v54 = vor.u32 %v4527_v44, %v3672_v42 }
  0x17   : > { %1812 = vmatpush.bf16.msra.mxu1 %v3761_v25  ;;  %v4559_v50 = vld [vmem:[%s6836_s1 + $0x124] sm:$0xf0]  ;;  %279 = vst [vmem:[#allocation2] sm:$0xff] %v4786_v51  ;;  %v3664_v52 = vld [vmem:[%s6836_s1 + $0x10] sm:$0xf]  ;;  %v3737_v58 = vor.u32 %v4543_v46, %v3736_v45  ;;  %s4520_s26 = sshll.u32 %s6844_s25, 8 }
  0x18   : > { %1841 = vmatpush.bf16.msra.mxu2 %v3825_v26  ;;  %v4525_v53 = vld [vmem:[%s6836_s1 + $0x14] sm:$0xf0]  ;;  %v3728_v55 = vld [vmem:[%s6836_s1 + $0x90] sm:$0xf]  ;;  %v4966_v57 = vld [vmem:[%s6838_s3] ss:$0 sm:$0xff]  ;;  %v3801_v59 = vor.u32 %v4559_v50, %v3800_v49  ;;  %s4978_s8 = scalar_lea.vmem %s6835_s0, %s4520_s26 }
  0x19   : > { %v4541_v56 = vld [vmem:[%s6836_s1 + $0x94] sm:$0xf0]  ;;  %v3792_v60 = vld [vmem:[%s6836_s1 + $0x110] sm:$0xf]  ;;  %v4983_v62 = vld [vmem:[%s6839_s4] ss:$0 sm:$0xff]  ;;  %v3665_v0 = vor.u32 %v4525_v53, %v3664_v52 }
  0x1a   : > { %1784 = vmatpush.bf16.msra.mxu0 %v3689_v33  ;;  %4741 = vmatpush.bf16.msra.mxu3 %v3689_v33  ;;  %v4557_v61 = vld [vmem:[%s6836_s1 + $0x114] sm:$0xf0]  ;;  %v3646_v63 = vld [vmem:[%s4978_s8 + $0xc0] sm:$0xff]  ;;  %v4523_v2 = vld [vmem:[%s6836_s1 + $0x4] sm:$0xf0]  ;;  %v3729_v4 = vor.u32 %v4541_v56, %v3728_v55  ;;  %339 = vst [vmem:[#allocation2 + $0x1e0] sm:$0xff] %v4786_v51 }
  0x1b   : > { %1813 = vmatpush.bf16.msra.mxu1 %v3753_v34  ;;  %v3656_v1 = vld [vmem:[%s6836_s1] sm:$0xf]  ;;  %v522_v3 = vmul.f32 %v4966_v57, %v3646_v63  ;;  %v3793_v5 = vor.u32 %v4557_v61, %v3792_v60  ;;  %v4539_v7 = vld [vmem:[%s6836_s1 + $0x84] sm:$0xf0]  ;;  %341 = vst [vmem:[#allocation2 + $0x1f0] sm:$0xff] %v4786_v51  ;;  %vm420_vm0 = vcmask 31744  }
  0x1c   : > { %1842 = vmatpush.bf16.msra.mxu2 %v3817_v35  ;;  %v3720_v6 = vld [vmem:[%s6836_s1 + $0x80] sm:$0xf]  ;;  %v4555_v9 = vld [vmem:[%s6836_s1 + $0x104] sm:$0xf0]  ;;  %v3657_v11 = vor.u32 %v4523_v2, %v3656_v1  ;;  %342 = vst [vmem:[#allocation2 + $0x1f8] sm:$0x3] %v4786_v51 }
  0x1d   : > { %v3784_v8 = vld [vmem:[%s6836_s1 + $0x100] sm:$0xf]  ;;  %v530_v10 = vadd.f32 %v4983_v62, %v522_v3  ;;  %v3721_v12 = vor.u32 %v4539_v7, %v3720_v6  ;;  %281 = vst [vmem:[#allocation2 + $0x10] sm:$0xff] %v4786_v51  ;;  %v4787_v17 = vmov 0.0|0.0   ;;  %v3649_v27 = vld [vmem:[%s4978_s8 + $0xd8] sm:$0xff]  ;;  %v3647_v33 = vld [vmem:[%s4978_s8 + $0xc8] sm:$0xff] }
  0x1e   : > { %1785 = vmatpush.bf16.msra.mxu0 %v3681_v43  ;;  %4742 = vmatpush.bf16.msra.mxu3 %v3681_v43  ;;  %v3785_v13 = vor.u32 %v4555_v9, %v3784_v8  ;;  %282 = vst [vmem:[#allocation2 + $0x18] sm:$0x3] %v4786_v51  ;;  %v709_v18 = vunpack.c.l.b16 %v4787_v17  ;;  %v3650_v28 = vld [vmem:[%s4978_s8 + $0xe0] sm:$0xff]  ;;  %v3904_v31 = vld [vmem:[%s6836_s1 + $0x1f0] sm:$0xf]  ;;  %v3651_v38 = vld [vmem:[%s4978_s8 + $0xe8] sm:$0xff]  ;;  %v525_v43 = vmul.f32 %v4966_v57, %v3649_v27 }
  0x1f   : > { %1814 = vmatpush.bf16.msra.mxu1 %v3745_v47  ;;  %v538_v14 = vmax.f32 %v530_v10, 0.0  ;;  %283 = vst [vmem:[#allocation2 + $0x20] sm:$0xff] %v4786_v51  ;;  %v3638_v29 = vld [vmem:[%s4978_s8 + $0x80] sm:$0xff]  ;;  %v4585_v32 = vld [vmem:[%s6836_s1 + $0x1f4] sm:$0xf0]  ;;  %v3648_v37 = vld [vmem:[%s4978_s8 + $0xd0] sm:$0xff]  ;;  %v526_v47 = vmul.f32 %v4966_v57, %v3650_v28 }
  0x20   : > { %1843 = vmatpush.bf16.msra.mxu2 %v3809_v48  ;;  %284 = vst [vmem:[#allocation2 + $0x28] sm:$0x3] %v4786_v51  ;;  %v3905_v34 = vor.u32 %v4585_v32, %v3904_v31  ;;  %v3968_v35 = vld [vmem:[%s6836_s1 + $0x270] sm:$0xf]  ;;  %v4601_v36 = vld [vmem:[%s6836_s1 + $0x274] sm:$0xf0]  ;;  %v480_v48 = vmul.f32 %v4966_v57, %v3638_v29  ;;  %v524_v63 = vmul.f32 %v4966_v57, %v3648_v37 }
  0x21   : > { %547 = vst.msk [vmem:[#allocation2 + $0x1f1] sm:$0xff] %vm420_vm0, %v538_v14  ;;  %v4096_v39 = vld [vmem:[%s6836_s1 + $0x370] sm:$0xf]  ;;  %v4633_v40 = vld [vmem:[%s6836_s1 + $0x374] sm:$0xf0]  ;;  %v3969_v41 = vor.u32 %v4601_v36, %v3968_v35  ;;  %v3639_v53 = vld [vmem:[%s4978_s8 + $0x88] sm:$0xff]  ;;  %v5149_v2 = vadd.f32 %v4983_v62, %v525_v43  ;;  %v5160_v7 = vadd.f32 %v4983_v62, %v526_v47 }
  0x22   : > { %1786 = vmatpush.bf16.msra.mxu0 %v3673_v54  ;;  %4743 = vmatpush.bf16.msra.mxu3 %v3673_v54  ;;  %285 = vst [vmem:[#allocation2 + $0x30] sm:$0xff] %v4786_v51  ;;  %v3652_v42 = vld [vmem:[%s4978_s8 + $0xf0] sm:$0xff]  ;;  %v4097_v44 = vor.u32 %v4633_v40, %v4096_v39  ;;  %v3896_v45 = vld [vmem:[%s6836_s1 + $0x1e0] sm:$0xf]  ;;  %v4583_v46 = vld [vmem:[%s6836_s1 + $0x1e4] sm:$0xf0]  ;;  %v5163_v8 = vadd.f32 %v4983_v62, %v480_v48 }
  0x23   : > { %1815 = vmatpush.bf16.msra.mxu1 %v3737_v58  ;;  %286 = vst [vmem:[#allocation2 + $0x38] sm:$0x3] %v4786_v51  ;;  %v3897_v49 = vor.u32 %v4583_v46, %v3896_v45  ;;  %v4032_v50 = vld [vmem:[%s6836_s1 + $0x2f0] sm:$0xf]  ;;  %v4617_v52 = vld [vmem:[%s6836_s1 + $0x2f4] sm:$0xf0]  ;;  %v523_v58 = vmul.f32 %v4966_v57, %v3647_v33  ;;  %v528_v6 = vmul.f32 %v4966_v57, %v3652_v42 }
  0x24   : > { %1844 = vmatpush.bf16.msra.mxu2 %v3801_v59  ;;  %287 = vst [vmem:[#allocation2 + $0x40] sm:$0xff] %v4786_v51  ;;  %v4033_v54 = vor.u32 %v4617_v52, %v4032_v50  ;;  %v3960_v55 = vld [vmem:[%s6836_s1 + $0x260] sm:$0xf]  ;;  %v4599_v56 = vld [vmem:[%s6836_s1 + $0x264] sm:$0xf0]  ;;  %v3640_v1 = vld [vmem:[%s4978_s8 + $0x90] sm:$0xff] }
  0x25   : > { %288 = vst [vmem:[#allocation2 + $0x48] sm:$0x3] %v4786_v51  ;;  %v3961_v59 = vor.u32 %v4599_v56, %v3960_v55  ;;  %v3888_v60 = vld [vmem:[%s6836_s1 + $0x1d0] sm:$0xf]  ;;  %v4581_v61 = vld [vmem:[%s6836_s1 + $0x1d4] sm:$0xf0]  ;;  %v5204_v27 = vadd.f32 %v4983_v62, %v528_v6 }
  0x26   : > { %1787 = vmatpush.bf16.msra.mxu0 %v3665_v0  ;;  %4744 = vmatpush.bf16.msra.mxu3 %v3665_v0  ;;  %289 = vst [vmem:[#allocation2 + $0x50] sm:$0xff] %v4786_v51  ;;  %v527_v0 = vmul.f32 %v4966_v57, %v3651_v38  ;;  %v3889_v3 = vor.u32 %v4581_v61, %v3888_v60  ;;  %v3952_v10 = vld [vmem:[%s6836_s1 + $0x250] sm:$0xf]  ;;  %v4579_v14 = vld [vmem:[%s6836_s1 + $0x1c4] sm:$0xf0]  ;;  %v541_v28 = vmax.f32 %v5149_v2, 0.0 }
  0x27   : > { %1816 = vmatpush.bf16.msra.mxu1 %v3729_v4  ;;  %290 = vst [vmem:[#allocation2 + $0x58] sm:$0x3] %v4786_v51  ;;  %v4088_v4 = vld [vmem:[%s6836_s1 + $0x360] sm:$0xf]  ;;  %v542_v29 = vmax.f32 %v5160_v7, 0.0  ;;  %v496_v31 = vmax.f32 %v5163_v8, 0.0 }
  0x28   : > { %1845 = vmatpush.bf16.msra.mxu2 %v3793_v5  ;;  %v557_v15 = vld [vmem:[#allocation2 + $0x1f0] sm:$0xff]  ;;  %291 = vst [vmem:[#allocation2 + $0x60] sm:$0xff] %v4786_v51  ;;  %v4631_v5 = vld [vmem:[%s6836_s1 + $0x364] sm:$0xf0]  ;;  %v4024_v17 = vld [vmem:[%s6836_s1 + $0x2e0] sm:$0xf] }
  0x29   : > { %v565_v16 = vpack.c.bf16 %v557_v15, %v557_v15  ;;  %292 = vst [vmem:[#allocation2 + $0x68] sm:$0x3] %v4786_v51  ;;  %v590_v22 = vld [vmem:[#allocation2 + $0x1f1] sm:$0xff]  ;;  %v4089_v9 = vor.u32 %v4631_v5, %v4088_v4  ;;  %v5179_v15 = vadd.f32 %v4983_v62, %v523_v58  ;;  %v3642_v36 = vld [vmem:[%s4978_s8 + $0xa0] sm:$0xff]  ;;  %v544_v46 = vmax.f32 %v5204_v27, 0.0  ;;  %v382_v52 = vld [vmem:[%s4978_s8 + $0x8] sm:$0xff] }
  0x2a   : > { %1788 = vmatpush.bf16.msra.mxu0 %v3657_v11  ;;  %4745 = vmatpush.bf16.msra.mxu3 %v3657_v11  ;;  %293 = vst [vmem:[#allocation2 + $0x70] sm:$0xff] %v4786_v51  ;;  %v598_v24 = vpack.c.bf16 %v590_v22, %v590_v22  ;;  %v4597_v11 = vld [vmem:[%s6836_s1 + $0x254] sm:$0xf0]  ;;  %v482_v22 = vmul.f32 %v4966_v57, %v3640_v1  ;;  %v3630_v37 = vld [vmem:[%s4978_s8 + $0x40] sm:$0xff]  ;;  %v3872_v48 = vld [vmem:[%s6836_s1 + $0x1b0] sm:$0xf] }
  0x2b   : > { %1817 = vmatpush.bf16.msra.mxu1 %v3721_v12  ;;  %v710_v19 = vunpack.c.l.b16 %v565_v16  ;;  %294 = vst [vmem:[#allocation2 + $0x78] sm:$0x3] %v4786_v51  ;;  %v3953_v12 = vor.u32 %v4597_v11, %v3952_v10  ;;  %v481_v16 = vmul.f32 %v4966_v57, %v3639_v53  ;;  %v539_v33 = vmax.f32 %v5179_v15, 0.0  ;;  %v3641_v35 = vld [vmem:[%s4978_s8 + $0x98] sm:$0xff]  ;;  %v381_v43 = vld [vmem:[%s4978_s8] sm:$0xff]  ;;  %s4521_s18 = sshll.u32 %s6844_s25, 6 }
  0x2c   : > { %1846 = vmatpush.bf16.msra.mxu2 %v3785_v13  ;;  %295 = vst [vmem:[#allocation2 + $0x80] sm:$0xff] %v4786_v51  ;;  %v758_v26 = vunpack.c.l.b16 %v598_v24  ;;  %v3880_v13 = vld [vmem:[%s6836_s1 + $0x1c0] sm:$0xf]  ;;  %v5220_v38 = vadd.f32 %v4983_v62, %v482_v22  ;;  %v483_v39 = vmul.f32 %v4966_v57, %v3641_v35  ;;  %v484_v40 = vmul.f32 %v4966_v57, %v3642_v36  ;;  %v3936_v55 = vld [vmem:[%s6836_s1 + $0x230] sm:$0xf]  ;;  %s6818_s21 = scalar_lea.vmem %s6842_s7, %s4521_s18 }
  0x2d   : > { %v5021_v20 = vpack.c.b16 %v710_v19, %v709_v18  ;;  %296 = vst [vmem:[#allocation2 + $0x88] sm:$0x3] %v4786_v51  ;;  %v4615_v18 = vld [vmem:[%s6836_s1 + $0x2e4] sm:$0xf0]  ;;  %v5190_v19 = vadd.f32 %v4983_v62, %v524_v63  ;;  %v438_v42 = vmul.f32 %v4966_v57, %v3630_v37  ;;  %v392_v53 = vmul.f32 %v4966_v57, %v381_v43  ;;  %v4593_v56 = vld [vmem:[%s6836_s1 + $0x234] sm:$0xf0] }
  0x2e   : > { %301 = vst [vmem:[#allocation2 + $0xb0] sm:$0xff] %v4786_v51  ;;  %1868 = vmatpush.bf16.msrb.mxu3 %v3905_v34  ;;  %1897 = vmatpush.bf16.msrb.mxu0 %v3969_v41  ;;  %v4025_v24 = vor.u32 %v4615_v18, %v4024_v17  ;;  %v5213_v34 = vadd.f32 %v4983_v62, %v481_v16  ;;  %v3631_v41 = vld [vmem:[%s4978_s8 + $0x48] sm:$0xff]  ;;  %v4629_v61 = vld [vmem:[%s6836_s1 + $0x354] sm:$0xf0]  ;;  %v498_v1 = vmax.f32 %v5220_v38, 0.0 }
  0x2f   : > { %1789 = vmatmul.bf16.vlgmr.msra.gmra.mxu0 %v5021_v20  ;;  %302 = vst [vmem:[#allocation2 + $0xb8] sm:$0x3] %v4786_v51  ;;  %1926 = vmatpush.bf16.msrb.mxu1 %v4033_v54  ;;  %v439_v47 = vmul.f32 %v4966_v57, %v3631_v41  ;;  %v5240_v50 = vadd.f32 %v4983_v62, %v483_v39  ;;  %v4575_v4 = vld [vmem:[%s6836_s1 + $0x1a4] sm:$0xf0]  ;;  %v4016_v7 = vld [vmem:[%s6836_s1 + $0x2d0] sm:$0xf] }
  0x30   : > { %303 = vst [vmem:[#allocation2 + $0xc0] sm:$0xff] %v4786_v51  ;;  %1955 = vmatpush.bf16.msrb.mxu2 %v4097_v44  ;;  %v540_v44 = vmax.f32 %v5190_v19, 0.0  ;;  %v5252_v58 = vadd.f32 %v4983_v62, %v484_v40  ;;  %v497_v60 = vmax.f32 %v5213_v34, 0.0  ;;  %v3937_v63 = vor.u32 %v4593_v56, %v3936_v55  ;;  %v4613_v8 = vld [vmem:[%s6836_s1 + $0x2d4] sm:$0xf0] }
  0x31   : > { %304 = vst [vmem:[#allocation2 + $0xc8] sm:$0x3] %v4786_v51  ;;  %v5274_v5 = vadd.f32 %v4983_v62, %v439_v47  ;;  %v393_v10 = vmul.f32 %v4966_v57, %v382_v52  ;;  %v5286_v11 = vadd.f32 %v4983_v62, %v392_v53  ;;  %v3856_v17 = vld [vmem:[%s6836_s1 + $0x190] sm:$0xf]  ;;  %v4573_v18 = vld [vmem:[%s6836_s1 + $0x194] sm:$0xf0] }
  0x32   : > { %305 = vst [vmem:[#allocation2 + $0xd0] sm:$0xff] %v4786_v51  ;;  %1869 = vmatpush.bf16.msrb.mxu3 %v3897_v49  ;;  %1898 = vmatpush.bf16.msrb.mxu0 %v3961_v59  ;;  %v4577_v49 = vld [vmem:[%s6836_s1 + $0x1b4] sm:$0xf0]  ;;  %v500_v15 = vmax.f32 %v5252_v58, 0.0  ;;  %v3857_v22 = vor.u32 %v4573_v18, %v3856_v17  ;;  %v3920_v27 = vld [vmem:[%s6836_s1 + $0x210] sm:$0xf] }
  0x33   : > { %306 = vst [vmem:[#allocation2 + $0xd8] sm:$0x3] %v4786_v51  ;;  %1927 = vmatpush.bf16.msrb.mxu1 %v4025_v24  ;;  %v3873_v54 = vor.u32 %v4577_v49, %v3872_v48  ;;  %v4627_v24 = vld [vmem:[%s6836_s1 + $0x344] sm:$0xf0]  ;;  %v3848_v34 = vld [vmem:[%s6836_s1 + $0x180] sm:$0xf] }
  0x34   : > { %307 = vst [vmem:[#allocation2 + $0xe0] sm:$0xff] %v4786_v51  ;;  %1956 = vmatpush.bf16.msrb.mxu2 %v4089_v9  ;;  %v499_v9 = vmax.f32 %v5240_v50, 0.0  ;;  %v4571_v35 = vld [vmem:[%s6836_s1 + $0x184] sm:$0xf0]  ;;  %v4008_v38 = vld [vmem:[%s6836_s1 + $0x2c0] sm:$0xf] }
  0x35   : > { %308 = vst [vmem:[#allocation2 + $0xe8] sm:$0x3] %v4786_v51  ;;  %v4611_v39 = vld [vmem:[%s6836_s1 + $0x2c4] sm:$0xf0]  ;;  %v3849_v43 = vor.u32 %v4571_v35, %v3848_v34 }
  0x36   : > { %309 = vst [vmem:[#allocation2 + $0xf0] sm:$0xff] %v4786_v51  ;;  %1870 = vmatpush.bf16.msrb.mxu3 %v3889_v3  ;;  %1899 = vmatpush.bf16.msrb.mxu0 %v3953_v12  ;;  %v3864_v3 = vld [vmem:[%s6836_s1 + $0x1a0] sm:$0xf]  ;;  %v4017_v12 = vor.u32 %v4613_v8, %v4016_v7 }
  0x37   : > { %310 = vst [vmem:[#allocation2 + $0xf8] sm:$0x3] %v4786_v51  ;;  %v3865_v6 = vor.u32 %v4575_v4, %v3864_v3 }
  0x38   : > { %311 = vst [vmem:[#allocation2 + $0x100] sm:$0xff] %v4786_v51  ;;  %1928 = vmatpush.bf16.msrb.mxu1 %v4017_v12 }
  0x39   : > { %312 = vst [vmem:[#allocation2 + $0x108] sm:$0x3] %v4786_v51 }
  0x3a   : > { %313 = vst [vmem:[#allocation2 + $0x110] sm:$0xff] %v4786_v51 }
  0x3b   : > { %314 = vst [vmem:[#allocation2 + $0x118] sm:$0x3] %v4786_v51 }
  0x3c   : > { %315 = vst [vmem:[#allocation2 + $0x120] sm:$0xff] %v4786_v51 }
  0x3d   : > { %316 = vst [vmem:[#allocation2 + $0x128] sm:$0x3] %v4786_v51 }
  0x3e   : > { %319 = vst [vmem:[#allocation2 + $0x140] sm:$0xff] %v4786_v51 }
  0x3f   : > { %320 = vst [vmem:[#allocation2 + $0x148] sm:$0x3] %v4786_v51 }
  0x40   : > { %321 = vst [vmem:[#allocation2 + $0x150] sm:$0xff] %v4786_v51 }
  0x41   : > { %322 = vst [vmem:[#allocation2 + $0x158] sm:$0x3] %v4786_v51 }
  0x42   : > { %323 = vst [vmem:[#allocation2 + $0x160] sm:$0xff] %v4786_v51 }
  0x43   : > { %324 = vst [vmem:[#allocation2 + $0x168] sm:$0x3] %v4786_v51 }
  0x44   : > { %325 = vst [vmem:[#allocation2 + $0x170] sm:$0xff] %v4786_v51 }
  0x45   : > { %326 = vst [vmem:[#allocation2 + $0x178] sm:$0x3] %v4786_v51 }
  0x46   : > { %327 = vst [vmem:[#allocation2 + $0x180] sm:$0xff] %v4786_v51  ;;  %v573_v59 = vld [vmem:[#allocation2 + $0x141] sm:$0xff] }
  0x47   : > { %328 = vst [vmem:[#allocation2 + $0x188] sm:$0x3] %v4786_v51 }
  0x48   : > { %329 = vst [vmem:[#allocation2 + $0x190] sm:$0xff] %v4786_v51 }
  0x49   : > { %330 = vst [vmem:[#allocation2 + $0x198] sm:$0x3] %v4786_v51 }
  0x4a   : > { %331 = vst [vmem:[#allocation2 + $0x1a0] sm:$0xff] %v4786_v51 }
  0x4b   : > { %332 = vst [vmem:[#allocation2 + $0x1a8] sm:$0x3] %v4786_v51 }
  0x4c   : > { %333 = vst [vmem:[#allocation2 + $0x1b0] sm:$0xff] %v4786_v51 }
  0x4d   : > { %334 = vst [vmem:[#allocation2 + $0x1b8] sm:$0x3] %v4786_v51 }
  0x4e   : > { %335 = vst [vmem:[#allocation2 + $0x1c0] sm:$0xff] %v4786_v51 }
  0x4f   : > { %336 = vst [vmem:[#allocation2 + $0x1c8] sm:$0x3] %v4786_v51 }
  0x50   : > { %340 = vst [vmem:[#allocation2 + $0x1e8] sm:$0x3] %v4786_v51 }
  0x51   : > { %343 = vst [vmem:[#allocation2 + $0x200] sm:$0xff] %v4786_v51 }
  0x52   : > { %344 = vst [vmem:[#allocation2 + $0x208] sm:$0x3] %v4786_v51 }
  0x53   : > { %345 = vst [vmem:[#allocation2 + $0x210] sm:$0xff] %v4786_v51 }
  0x54   : > { %346 = vst [vmem:[#allocation2 + $0x218] sm:$0x3] %v4786_v51 }
  0x55   : > { %347 = vst [vmem:[#allocation2 + $0x220] sm:$0xff] %v4786_v51 }
  0x56   : > { %348 = vst [vmem:[#allocation2 + $0x228] sm:$0x3] %v4786_v51 }
  0x57   : > { %349 = vst [vmem:[#allocation2 + $0x230] sm:$0xff] %v4786_v51  ;;  %v589_v21 = vld [vmem:[#allocation2 + $0x1e1] sm:$0xff] }
  0x58   : > { %350 = vst [vmem:[#allocation2 + $0x238] sm:$0x3] %v4786_v51  ;;  %v597_v23 = vpack.c.bf16 %v589_v21, %v589_v21  ;;  %v5193_v21 = vadd.f32 %v4983_v62, %v527_v0  ;;  %v5263_v0 = vadd.f32 %v4983_v62, %v438_v42 }
  0x59   : > { %351 = vst [vmem:[#allocation2 + $0x240] sm:$0xff] %v4786_v51 }
  0x5a   : > { %352 = vst [vmem:[#allocation2 + $0x248] sm:$0x3] %v4786_v51  ;;  %v757_v25 = vunpack.c.l.b16 %v597_v23  ;;  %v3881_v23 = vor.u32 %v4579_v14, %v3880_v13  ;;  %v543_v45 = vmax.f32 %v5193_v21, 0.0  ;;  %v3928_v13 = vld [vmem:[%s6836_s1 + $0x220] sm:$0xf]  ;;  %v454_v19 = vmax.f32 %v5263_v0, 0.0 }
  0x5b   : > { %353 = vst [vmem:[#allocation2 + $0x250] sm:$0xff] %v4786_v51  ;;  %v4591_v14 = vld [vmem:[%s6836_s1 + $0x224] sm:$0xf0]  ;;  %v581_v21 = vpack.c.bf16 %v573_v59, %v573_v59 }
  0x5c   : > { %354 = vst [vmem:[#allocation2 + $0x258] sm:$0x3] %v4786_v51  ;;  %v5084_v30 = vpack.c.b16 %v758_v26, %v757_v25  ;;  %v3944_v25 = vld [vmem:[%s6836_s1 + $0x240] sm:$0xf]  ;;  %v4595_v26 = vld [vmem:[%s6836_s1 + $0x244] sm:$0xf0]  ;;  %1871 = vmatpush.bf16.msrb.mxu3 %v3881_v23  ;;  %v3929_v16 = vor.u32 %v4591_v14, %v3928_v13 }
  0x5d   : > { %355 = vst [vmem:[#allocation2 + $0x260] sm:$0xff] %v4786_v51  ;;  %v3945_v32 = vor.u32 %v4595_v26, %v3944_v25  ;;  %v4072_v23 = vld [vmem:[%s6836_s1 + $0x340] sm:$0xf]  ;;  %v455_v25 = vmax.f32 %v5274_v5, 0.0  ;;  %v733_v42 = vunpack.c.l.b16 %v581_v21  ;;  %v4064_v13 = vld [vmem:[%s6836_s1 + $0x330] sm:$0xf] }
  0x5e   : > { %356 = vst [vmem:[#allocation2 + $0x268] sm:$0x3] %v4786_v51  ;;  %1847 = vmatmul.bf16.vlgmr.msra.gmra.mxu2 %v5084_v30  ;;  %v4073_v26 = vor.u32 %v4627_v24, %v4072_v23  ;;  %v4625_v14 = vld [vmem:[%s6836_s1 + $0x334] sm:$0xf0]  ;;  %v4000_v24 = vld [vmem:[%s6836_s1 + $0x2b0] sm:$0xf] }
  0x5f   : > { %359 = vst [vmem:[#allocation3] sm:$0xff] %v4786_v51  ;;  %1900 = vmatpush.bf16.msrb.mxu0 %v3945_v32  ;;  %v4065_v18 = vor.u32 %v4625_v14, %v4064_v13  ;;  %v4649_v21 = vld [vmem:[%s6836_s1 + $0x3f4] sm:$0xf0] }
  0x60   : > { %360 = vst [vmem:[#allocation3 + $0x8] sm:$0x3] %v4786_v51  ;;  %1872 = vmatpush.bf16.msrb.mxu3 %v3873_v54 }
  0x61   : > { %361 = vst [vmem:[#allocation3 + $0x10] sm:$0xff] %v4786_v51 }
  0x62   : > { %362 = vst [vmem:[#allocation3 + $0x18] sm:$0x3] %v4786_v51 }
  0x63   : > { %363 = vst [vmem:[#allocation3 + $0x20] sm:$0xff] %v4786_v51  ;;  %1901 = vmatpush.bf16.msrb.mxu0 %v3937_v63 }
  0x64   : > { %364 = vst [vmem:[#allocation3 + $0x28] sm:$0x3] %v4786_v51  ;;  %1873 = vmatpush.bf16.msrb.mxu3 %v3865_v6 }
  0x65   : > { %365 = vst [vmem:[#allocation3 + $0x30] sm:$0xff] %v4786_v51 }
  0x66   : > { %366 = vst [vmem:[#allocation3 + $0x38] sm:$0x3] %v4786_v51 }
  0x67   : > { %367 = vst [vmem:[#allocation3 + $0x40] sm:$0xff] %v4786_v51  ;;  %1902 = vmatpush.bf16.msrb.mxu0 %v3929_v16 }
  0x68   : > { %368 = vst [vmem:[#allocation3 + $0x48] sm:$0x3] %v4786_v51  ;;  %1874 = vmatpush.bf16.msrb.mxu3 %v3857_v22 }
  0x69   : > { %369 = vst [vmem:[#allocation3 + $0x50] sm:$0xff] %v4786_v51 }
  0x6a   : > { %370 = vst [vmem:[#allocation3 + $0x58] sm:$0x3] %v4786_v51 }
  0x6b   : > { %371 = vst [vmem:[#allocation3 + $0x60] sm:$0xff] %v4786_v51 }
  0x6c   : > { %372 = vst [vmem:[#allocation3 + $0x68] sm:$0x3] %v4786_v51  ;;  %1875 = vmatpush.bf16.msrb.mxu3 %v3849_v43 }
  0x6d   : > { %373 = vst [vmem:[#allocation3 + $0x70] sm:$0xff] %v4786_v51 }
  0x6e   : > { %374 = vst [vmem:[#allocation3 + $0x78] sm:$0x3] %v4786_v51 }
  0x6f   : > { %375 = vst [vmem:[#allocation3 + $0x80] sm:$0xff] %v4786_v51 }
  0x70   : > { %376 = vst [vmem:[#allocation3 + $0x88] sm:$0x3] %v4786_v51 }
  0x71   : > { %377 = vst [vmem:[#allocation3 + $0x90] sm:$0xff] %v4786_v51 }
  0x72   : > { %378 = vst [vmem:[#allocation3 + $0x98] sm:$0x3] %v4786_v51  ;;  %v4080_v51 = vld [vmem:[%s6836_s1 + $0x350] sm:$0xf] }
  0x73   : > { %550 = vst.msk [vmem:[#allocation2 + $0x221] sm:$0xff] %vm420_vm0, %v541_v28  ;;  %v4081_v2 = vor.u32 %v4629_v61, %v4080_v51  ;;  %v4589_v28 = vld [vmem:[%s6836_s1 + $0x214] sm:$0xf0] }
  0x74   : > { %551 = vst.msk [vmem:[#allocation2 + $0x231] sm:$0xff] %vm420_vm0, %v542_v29  ;;  %v404_v29 = vadd.f32 %v4983_v62, %v393_v10 }
  0x75   : > { %505 = vst.msk [vmem:[#allocation2 + $0x151] sm:$0xff] %vm420_vm0, %v496_v31  ;;  %1957 = vmatpush.bf16.msrb.mxu2 %v4081_v2  ;;  %v411_v31 = vmax.f32 %v5286_v11, 0.0 }
  0x76   : > { %548 = vst.msk [vmem:[#allocation2 + $0x201] sm:$0xff] %vm420_vm0, %v539_v33  ;;  %v3921_v33 = vor.u32 %v4589_v28, %v3920_v27  ;;  %v412_v53 = vmax.f32 %v404_v29, 0.0  ;;  %v4224_v29 = vld [vmem:[%s6836_s1 + $0x470] sm:$0xf] }
  0x77   : > { %549 = vst.msk [vmem:[#allocation2 + $0x211] sm:$0xff] %vm420_vm0, %v540_v44  ;;  %v4009_v44 = vor.u32 %v4611_v39, %v4008_v38  ;;  %v4056_v38 = vld [vmem:[%s6836_s1 + $0x320] sm:$0xf]  ;;  %v4623_v39 = vld [vmem:[%s6836_s1 + $0x324] sm:$0xf0] }
  0x78   : > { %552 = vst.msk [vmem:[#allocation2 + $0x241] sm:$0xff] %vm420_vm0, %v543_v45  ;;  %v3912_v45 = vld [vmem:[%s6836_s1 + $0x200] sm:$0xf]  ;;  %1903 = vmatpush.bf16.msrb.mxu0 %v3921_v33  ;;  %v3632_v33 = vld [vmem:[%s4978_s8 + $0x50] sm:$0xff] }
  0x79   : > { %553 = vst.msk [vmem:[#allocation2 + $0x251] sm:$0xff] %vm420_vm0, %v544_v46  ;;  %1958 = vmatpush.bf16.msrb.mxu2 %v4073_v26  ;;  %v4587_v46 = vld [vmem:[%s6836_s1 + $0x204] sm:$0xf0]  ;;  %1929 = vmatpush.bf16.msrb.mxu1 %v4009_v44  ;;  %v3644_v26 = vld [vmem:[%s4978_s8 + $0xb0] sm:$0xff] }
  0x7a   : > { %v560_v32 = vld [vmem:[#allocation2 + $0x220] sm:$0xff]  ;;  %506 = vst.msk [vmem:[#allocation2 + $0x161] sm:$0xff] %vm420_vm0, %v497_v60  ;;  %v3913_v52 = vor.u32 %v4587_v46, %v3912_v45  ;;  %v4057_v45 = vor.u32 %v4623_v39, %v4056_v38 }
  0x7b   : > { %v561_v36 = vld [vmem:[#allocation2 + $0x230] sm:$0xff]  ;;  %v568_v37 = vpack.c.bf16 %v560_v32, %v560_v32  ;;  %507 = vst.msk [vmem:[#allocation2 + $0x171] sm:$0xff] %vm420_vm0, %v498_v1  ;;  %v593_v6 = vld [vmem:[#allocation2 + $0x221] sm:$0xff] }
  0x7c   : > { %v569_v40 = vpack.c.bf16 %v561_v36, %v561_v36  ;;  %v574_v41 = vld [vmem:[#allocation2 + $0x151] sm:$0xff]  ;;  %508 = vst.msk [vmem:[#allocation2 + $0x181] sm:$0xff] %vm420_vm0, %v499_v9  ;;  %1904 = vmatpush.bf16.msrb.mxu0 %v3913_v52  ;;  %v3643_v9 = vld [vmem:[%s4978_s8 + $0xa8] sm:$0xff]  ;;  %v601_v17 = vpack.c.bf16 %v593_v6, %v593_v6  ;;  %v4152_v46 = vld [vmem:[%s6836_s1 + $0x3e0] sm:$0xf] }
  0x7d   : > { %v5342_v47 = vunpack.c.l.b16 %v568_v37  ;;  %v582_v48 = vpack.c.bf16 %v574_v41, %v574_v41  ;;  %v558_v49 = vld [vmem:[#allocation2 + $0x200] sm:$0xff]  ;;  %509 = vst.msk [vmem:[#allocation2 + $0x191] sm:$0xff] %vm420_vm0, %v500_v15  ;;  %v594_v8 = vld [vmem:[#allocation2 + $0x231] sm:$0xff]  ;;  %1959 = vmatpush.bf16.msrb.mxu2 %v4065_v18  ;;  %v485_v32 = vmul.f32 %v4966_v57, %v3643_v9  ;;  %v440_v9 = vmul.f32 %v4966_v57, %v3632_v33  ;;  %v386_v33 = vld [vmem:[%s4978_s8 + $0x28] sm:$0xff] }
  0x7e   : > { %v591_v50 = vld [vmem:[#allocation2 + $0x201] sm:$0xff]  ;;  %v714_v54 = vunpack.c.l.b16 %v569_v40  ;;  %v559_v55 = vld [vmem:[#allocation2 + $0x210] sm:$0xff]  ;;  %v566_v56 = vpack.c.bf16 %v558_v49, %v558_v49  ;;  %463 = vst.msk [vmem:[#allocation2 + $0xb1] sm:$0xff] %vm420_vm0, %v454_v19  ;;  %v602_v22 = vpack.c.bf16 %v594_v8, %v594_v8  ;;  %v3633_v40 = vld [vmem:[%s4978_s8 + $0x58] sm:$0xff]  ;;  %v5412_v43 = vunpack.c.l.b16 %v601_v17 }
  0x7f   : > { %v592_v58 = vld [vmem:[#allocation2 + $0x211] sm:$0xff]  ;;  %v599_v59 = vpack.c.bf16 %v591_v50, %v591_v50  ;;  %v734_v60 = vunpack.c.l.b16 %v582_v48  ;;  %v567_v51 = vpack.c.bf16 %v559_v55, %v559_v55  ;;  %464 = vst.msk [vmem:[#allocation2 + $0xc1] sm:$0xff] %vm420_vm0, %v455_v25  ;;  %v562_v4 = vld [vmem:[#allocation2 + $0x240] sm:$0xff]  ;;  %v4647_v48 = vld [vmem:[%s6836_s1 + $0x3e4] sm:$0xf0]  ;;  %v486_v49 = vmul.f32 %v4966_v57, %v3644_v26 }
  0x80   : > { %v600_v61 = vpack.c.bf16 %v592_v58, %v592_v58  ;;  %v5348_v63 = vpack.c.b16 %v714_v54, %v5342_v47  ;;  %v5350_v0 = vunpack.c.l.b16 %v566_v56  ;;  %421 = vst.msk [vmem:[#allocation2 + $0x11] sm:$0xff] %vm420_vm0, %v411_v31  ;;  %v563_v7 = vld [vmem:[#allocation2 + $0x250] sm:$0xff]  ;;  %v570_v15 = vpack.c.bf16 %v562_v4, %v562_v4  ;;  %v4609_v25 = vld [vmem:[%s6836_s1 + $0x2b4] sm:$0xf0]  ;;  %v3992_v55 = vld [vmem:[%s6836_s1 + $0x2a0] sm:$0xf] }
  0x81   : > { %v5352_v1 = vunpack.c.l.b16 %v599_v59  ;;  %v5355_v2 = vpack.c.b16 %v734_v60, %v733_v42  ;;  %v5357_v3 = vunpack.c.l.b16 %v567_v51  ;;  %422 = vst.msk [vmem:[#allocation2 + $0x21] sm:$0xff] %vm420_vm0, %v412_v53  ;;  %v575_v11 = vld [vmem:[#allocation2 + $0x161] sm:$0xff]  ;;  %v4160_v19 = vld [vmem:[%s6836_s1 + $0x3f0] sm:$0xf]  ;;  %v571_v27 = vpack.c.bf16 %v563_v7, %v563_v7  ;;  %v4665_v31 = vld [vmem:[%s6836_s1 + $0x474] sm:$0xf0]  ;;  %1960 = vmatpush.bf16.msrb.mxu2 %v4057_v45 }
  0x82   : > { %v5359_v5 = vunpack.c.l.b16 %v600_v61  ;;  %1799 = vmatmul.bf16.vlgmr.msra.gmra.mxu3 %v5348_v63  ;;  %v576_v16 = vld [vmem:[#allocation2 + $0x171] sm:$0xff]  ;;  %v4161_v23 = vor.u32 %v4649_v21, %v4160_v19  ;;  %v4001_v28 = vor.u32 %v4609_v25, %v4000_v24  ;;  %v583_v34 = vpack.c.bf16 %v575_v11, %v575_v11  ;;  %v4607_v56 = vld [vmem:[%s6836_s1 + $0x2a4] sm:$0xf0]  ;;  %v4216_v58 = vld [vmem:[%s6836_s1 + $0x460] sm:$0xf] }
  0x83   : > { %1818 = vmatmul.bf16.vlgmr.msra.gmra.mxu1 %v5355_v2  ;;  %v5367_v10 = vpack.c.b16 %v5357_v3, %v5350_v0  ;;  %v584_v35 = vpack.c.bf16 %v576_v16, %v576_v16  ;;  %v4225_v37 = vor.u32 %v4665_v31, %v4224_v29  ;;  %v383_v41 = vld [vmem:[%s4978_s8 + $0x10] sm:$0xff]  ;;  %v5410_v42 = vunpack.c.l.b16 %v570_v15  ;;  %v4663_v51 = vld [vmem:[%s6836_s1 + $0x464] sm:$0xf0]  ;;  %v384_v11 = vld [vmem:[%s4978_s8 + $0x18] sm:$0xff] }
  0x84   : > { %v5371_v12 = vpack.c.b16 %v5359_v5, %v5352_v1  ;;  %1984 = vmatpush.bf16.msra.mxu3 %v4161_v23  ;;  %1930 = vmatpush.bf16.msrb.mxu1 %v4001_v28  ;;  %v5421_v50 = vunpack.c.l.b16 %v602_v22  ;;  %v4153_v54 = vor.u32 %v4647_v48, %v4152_v46  ;;  %v716_v59 = vunpack.c.l.b16 %v571_v27  ;;  %v3634_v25 = vld [vmem:[%s4978_s8 + $0x60] sm:$0xff]  ;;  %v3635_v26 = vld [vmem:[%s4978_s8 + $0x68] sm:$0xff]  ;;  %v578_v45 = vld [vmem:[#allocation2 + $0x191] sm:$0xff] }
  0x85   : > { %1794 = vmatmul.bf16.gmra.mxu0 %v5367_v10  ;;  %v3993_v60 = vor.u32 %v4607_v56, %v3992_v55  ;;  %v493_v61 = vadd.f32 %v4983_v62, %v485_v32  ;;  %v494_v4 = vadd.f32 %v4983_v62, %v486_v49  ;;  %v5437_v6 = vunpack.c.l.b16 %v583_v34  ;;  %v385_v27 = vld [vmem:[%s4978_s8 + $0x20] sm:$0xff]  ;;  %v605_v46 = vld [vmem:[#allocation2 + $0xb0] sm:$0xff] }
  0x86   : > { %1852 = vmatmul.bf16.gmra.mxu2 %v5371_v12  ;;  %2013 = vmatpush.bf16.msra.mxu0 %v4225_v37  ;;  %v5439_v7 = vunpack.c.l.b16 %v584_v35  ;;  %v4217_v8 = vor.u32 %v4663_v51, %v4216_v58  ;;  %v441_v15 = vmul.f32 %v4966_v57, %v3633_v40  ;;  %v394_v16 = vmul.f32 %v4966_v57, %v383_v41  ;;  %v606_v48 = vld [vmem:[#allocation2 + $0xc0] sm:$0xff]  ;;  %v4144_v56 = vld [vmem:[%s6836_s1 + $0x3d0] sm:$0xf]  ;;  %v4645_v58 = vld [vmem:[%s6836_s1 + $0x3d4] sm:$0xf0] }
  0x87   : > { %v621_v36 = vld [vmem:[#allocation2 + $0x11] sm:$0xff]  ;;  %v501_v13 = vmax.f32 %v493_v61, 0.0  ;;  %v502_v14 = vmax.f32 %v494_v4, 0.0  ;;  %v448_v19 = vadd.f32 %v4983_v62, %v440_v9  ;;  %v5447_v21 = vpack.c.b16 %v716_v59, %v5410_v42  ;;  %v595_v51 = vld [vmem:[#allocation2 + $0x241] sm:$0xff] }
  0x88   : > { %v622_v44 = vld [vmem:[#allocation2 + $0x21] sm:$0xff]  ;;  %v629_v52 = vpack.c.bf16 %v621_v36, %v621_v36  ;;  %1985 = vmatpush.bf16.msra.mxu3 %v4153_v54  ;;  %1931 = vmatpush.bf16.msrb.mxu1 %v3993_v60  ;;  %v449_v22 = vadd.f32 %v4983_v62, %v441_v15  ;;  %v395_v23 = vmul.f32 %v4966_v57, %v384_v11  ;;  %v3984_v4 = vld [vmem:[%s6836_s1 + $0x290] sm:$0xf] }
  0x89   : > { %v630_v53 = vpack.c.bf16 %v622_v44, %v622_v44  ;;  %510 = vst.msk [vmem:[#allocation2 + $0x1a1] sm:$0xff] %vm420_vm0, %v501_v13  ;;  %v405_v24 = vadd.f32 %v4983_v62, %v394_v16  ;;  %v5458_v28 = vpack.c.b16 %v5439_v7, %v5437_v6  ;;  %v5462_v29 = vpack.c.b16 %v5421_v50, %v5412_v43  ;;  %v577_v44 = vld [vmem:[#allocation2 + $0x181] sm:$0xff]  ;;  %v4208_v16 = vld [vmem:[%s6836_s1 + $0x450] sm:$0xf] }
  0x8a   : > { %v805_v17 = vunpack.c.l.b16 %v629_v52  ;;  %2014 = vmatpush.bf16.msra.mxu0 %v4217_v8  ;;  %511 = vst.msk [vmem:[#allocation2 + $0x1b1] sm:$0xff] %vm420_vm0, %v502_v14  ;;  %v456_v31 = vmax.f32 %v448_v19, 0.0  ;;  %v442_v32 = vmul.f32 %v4966_v57, %v3634_v25  ;;  %v457_v34 = vmax.f32 %v449_v22, 0.0  ;;  %v4605_v8 = vld [vmem:[%s6836_s1 + $0x294] sm:$0xf0] }
  0x8b   : > { %v806_v18 = vunpack.c.l.b16 %v630_v53  ;;  %v406_v35 = vadd.f32 %v4983_v62, %v395_v23  ;;  %v413_v36 = vmax.f32 %v405_v24, 0.0  ;;  %v443_v37 = vmul.f32 %v4966_v57, %v3635_v26  ;;  %v4048_v53 = vld [vmem:[%s6836_s1 + $0x310] sm:$0xf]  ;;  %v4619_v23 = vld [vmem:[%s6836_s1 + $0x304] sm:$0xf0] }
  0x8c   : > { %465 = vst.msk [vmem:[#allocation2 + $0xd1] sm:$0xff] %vm420_vm0, %v456_v31  ;;  %v450_v39 = vadd.f32 %v4983_v62, %v442_v32  ;;  %v396_v40 = vmul.f32 %v4966_v57, %v385_v27  ;;  %v397_v41 = vmul.f32 %v4966_v57, %v386_v33  ;;  %v4621_v57 = vld [vmem:[%s6836_s1 + $0x314] sm:$0xf0]  ;;  %v4145_v61 = vor.u32 %v4645_v58, %v4144_v56  ;;  %v4136_v24 = vld [vmem:[%s6836_s1 + $0x3c0] sm:$0xf] }
  0x8d   : > { %v5469_v38 = vpack.c.b16 %v806_v18, %v805_v17  ;;  %466 = vst.msk [vmem:[#allocation2 + $0xe1] sm:$0xff] %vm420_vm0, %v457_v34  ;;  %v414_v49 = vmax.f32 %v406_v35, 0.0  ;;  %v451_v52 = vadd.f32 %v4983_v62, %v443_v37  ;;  %v4049_v55 = vor.u32 %v4621_v57, %v4048_v53  ;;  %v596_v14 = vld [vmem:[#allocation2 + $0x251] sm:$0xff]  ;;  %v4643_v26 = vld [vmem:[%s6836_s1 + $0x3c4] sm:$0xf0] }
  0x8e   : > { %423 = vst.msk [vmem:[#allocation2 + $0x31] sm:$0xff] %vm420_vm0, %v413_v36  ;;  %v458_v54 = vmax.f32 %v450_v39, 0.0  ;;  %v407_v60 = vadd.f32 %v4983_v62, %v396_v40  ;;  %v408_v9 = vadd.f32 %v4983_v62, %v397_v41  ;;  %v613_v11 = vpack.c.bf16 %v605_v46, %v605_v46  ;;  %v4661_v17 = vld [vmem:[%s6836_s1 + $0x454] sm:$0xf0]  ;;  %1986 = vmatpush.bf16.msra.mxu3 %v4145_v61  ;;  %v4040_v62 = vld [vmem:[%s6836_s1 + $0x300] sm:$0xf] }
  0x8f   : > { %424 = vst.msk [vmem:[#allocation2 + $0x41] sm:$0xff] %vm420_vm0, %v414_v49  ;;  %v459_v59 = vmax.f32 %v451_v52, 0.0  ;;  %v614_v13 = vpack.c.bf16 %v606_v48, %v606_v48  ;;  %1961 = vmatpush.bf16.msrb.mxu2 %v4049_v55  ;;  %v3985_v15 = vor.u32 %v4605_v8, %v3984_v4  ;;  %v585_v18 = vpack.c.bf16 %v577_v44, %v577_v44  ;;  %v3976_v27 = vld [vmem:[%s6836_s1 + $0x280] sm:$0xf]  ;;  %v4603_v35 = vld [vmem:[%s6836_s1 + $0x284] sm:$0xf0] }
  0x90   : > { %467 = vst.msk [vmem:[#allocation2 + $0xf1] sm:$0xff] %vm420_vm0, %v458_v54  ;;  %v586_v19 = vpack.c.bf16 %v578_v45, %v578_v45  ;;  %v4209_v22 = vor.u32 %v4661_v17, %v4208_v16  ;;  %v4041_v25 = vor.u32 %v4619_v23, %v4040_v62  ;;  %v415_v31 = vmax.f32 %v407_v60, 0.0  ;;  %v4200_v36 = vld [vmem:[%s6836_s1 + $0x440] sm:$0xf]  ;;  %v4659_v45 = vld [vmem:[%s6836_s1 + $0x444] sm:$0xf0] }
  0x91   : > { %468 = vst.msk [vmem:[#allocation2 + $0x101] sm:$0xff] %vm420_vm0, %v459_v59  ;;  %1932 = vmatpush.bf16.msrb.mxu1 %v3985_v15  ;;  %v603_v32 = vpack.c.bf16 %v595_v51, %v595_v51  ;;  %v604_v33 = vpack.c.bf16 %v596_v14, %v596_v14  ;;  %v4137_v34 = vor.u32 %v4643_v26, %v4136_v24  ;;  %v416_v37 = vmax.f32 %v408_v9, 0.0  ;;  %v3636_v60 = vld [vmem:[%s4978_s8 + $0x70] sm:$0xff]  ;;  %v3637_v51 = vld [vmem:[%s4978_s8 + $0x78] sm:$0xff]  ;;  %v5555_v9 = vld [vmem:[#allocation2 + $0x1a1] sm:$0xff] }
  0x92   : > { %1804 = vmatmul.bf16.gmra.mxu3 %v5447_v21  ;;  %2015 = vmatpush.bf16.msra.mxu0 %v4209_v22  ;;  %v781_v39 = vunpack.c.l.b16 %v613_v11  ;;  %v782_v40 = vunpack.c.l.b16 %v614_v13  ;;  %v3977_v44 = vor.u32 %v4603_v35, %v3976_v27  ;;  %425 = vst.msk [vmem:[#allocation2 + $0x51] sm:$0xff] %vm420_vm0, %v415_v31  ;;  %v5536_v46 = vunpack.c.l.b16 %v585_v18  ;;  %v387_v61 = vld [vmem:[%s4978_s8 + $0x30] sm:$0xff]  ;;  %v388_v8 = vld [vmem:[%s4978_s8 + $0x38] sm:$0xff]  ;;  %v5560_v11 = vld [vmem:[%s6838_s3] ss:$0 sm:$0xff] }
  0x93   : > { %1823 = vmatmul.bf16.gmra.mxu1 %v5458_v28  ;;  %1962 = vmatpush.bf16.msrb.mxu2 %v4041_v25  ;;  %v5538_v48 = vunpack.c.l.b16 %v586_v19  ;;  %v4201_v53 = vor.u32 %v4659_v45, %v4200_v36  ;;  %426 = vst.msk [vmem:[#allocation2 + $0x61] sm:$0xff] %vm420_vm0, %v416_v37  ;;  %v5541_v54 = vunpack.c.l.b16 %v603_v32  ;;  %v5543_v55 = vunpack.c.l.b16 %v604_v33  ;;  %v5564_v15 = vld [vmem:[#allocation2 + $0x1b1] sm:$0xff]  ;;  %v5601_v37 = vld [vmem:[%s6839_s4] ss:$0 sm:$0xff] }
  0x94   : > { %1987 = vmatpush.bf16.msra.mxu3 %v4137_v34  ;;  %v5545_v58 = vpack.c.b16 %v782_v40, %v781_v39  ;;  %v444_v13 = vmul.f32 %v5560_v11, %v3636_v60  ;;  %v445_v14 = vmul.f32 %v5560_v11, %v3637_v51  ;;  %v398_v18 = vmul.f32 %v5560_v11, %v387_v61  ;;  %v607_v22 = vld [vmem:[#allocation2 + $0xd0] sm:$0xff]  ;;  %v608_v62 = vld [vmem:[#allocation2 + $0xe0] sm:$0xff]  ;;  %v4641_v26 = vld [vmem:[%s6836_s1 + $0x3b4] sm:$0xf0] }
  0x95   : > { %1905 = vmatmul.bf16.vlgmr.msrb.gmra.mxu0 %v5469_v38  ;;  %v623_v41 = vld [vmem:[#allocation2 + $0x31] sm:$0xff]  ;;  %1933 = vmatpush.bf16.msrb.mxu1 %v3977_v44  ;;  %v5552_v4 = vpack.c.b16 %v5538_v48, %v5536_v46  ;;  %v5568_v16 = vpack.c.b16 %v5543_v55, %v5541_v54  ;;  %v399_v19 = vmul.f32 %v5560_v11, %v388_v8  ;;  %v3778_v34 = vld [vmem:[%s6836_s1 + $0xf8] sm:$0xf0]  ;;  %v4639_v61 = vld [vmem:[%s6836_s1 + $0x3a4] sm:$0xf0] }
  0x96   : > { %1857 = vmatmul.bf16.gmra.mxu2 %v5462_v29  ;;  %v624_v49 = vld [vmem:[#allocation2 + $0x41] sm:$0xff]  ;;  %v631_v52 = vpack.c.bf16 %v623_v41, %v623_v41  ;;  %2016 = vmatpush.bf16.msra.mxu0 %v4201_v53  ;;  %v5575_v23 = vld [vmem:[#allocation2 + $0x1f0] sm:$0xff]  ;;  %v587_v24 = vpack.c.bf16 %v5555_v9, %v5555_v9  ;;  %v4657_v36 = vld [vmem:[%s6836_s1 + $0x434] sm:$0xf0]  ;;  %v452_v39 = vadd.f32 %v5601_v37, %v444_v13 }
  0x97   : > { %v632_v57 = vpack.c.bf16 %v624_v49, %v624_v49  ;;  %v4128_v25 = vld [vmem:[%s6836_s1 + $0x3b0] sm:$0xf]  ;;  %v4552_v27 = vld [vmem:[%s6836_s1 + $0xf4] sm:$0xf]  ;;  %v453_v40 = vadd.f32 %v5601_v37, %v445_v14  ;;  %v409_v41 = vadd.f32 %v5601_v37, %v398_v18  ;;  %v4120_v53 = vld [vmem:[%s6836_s1 + $0x3a0] sm:$0xf]  ;;  %v616_v60 = vpack.c.bf16 %v608_v62, %v608_v62 }
  0x98   : > { %v807_v56 = vunpack.c.l.b16 %v631_v52  ;;  %v4129_v33 = vor.u32 %v4641_v26, %v4128_v25  ;;  %v4192_v35 = vld [vmem:[%s6836_s1 + $0x430] sm:$0xf]  ;;  %v3781_v44 = vor.u32 %v4552_v27, %v3778_v34  ;;  %v4536_v49 = vld [vmem:[%s6836_s1 + $0x74] sm:$0xf]  ;;  %v3714_v52 = vld [vmem:[%s6836_s1 + $0x78] sm:$0xf0]  ;;  %v661_v13 = vpack.c.bf16 %v5575_v23, %v5575_v23 }
  0x99   : > { %v808_v59 = vunpack.c.l.b16 %v632_v57  ;;  %v625_v31 = vld [vmem:[#allocation2 + $0x51] sm:$0xff]  ;;  %v4193_v45 = vor.u32 %v4657_v36, %v4192_v35  ;;  %v410_v57 = vadd.f32 %v5601_v37, %v399_v19  ;;  %v3717_v51 = vor.u32 %v4536_v49, %v3714_v52  ;;  %v4550_v8 = vld [vmem:[%s6836_s1 + $0xe4] sm:$0xf]  ;;  %v3770_v9 = vld [vmem:[%s6836_s1 + $0xe8] sm:$0xf0] }
  0x9a   : > { %v626_v32 = vld [vmem:[#allocation2 + $0x61] sm:$0xff]  ;;  %1988 = vmatpush.bf16.msra.mxu3 %v4129_v33  ;;  %2071 = vmatpush.bf16.msra.mxu2 %v3781_v44  ;;  %v4121_v14 = vor.u32 %v4639_v61, %v4120_v53  ;;  %v3706_v23 = vld [vmem:[%s6836_s1 + $0x68] sm:$0xf0]  ;;  %v460_v25 = vmax.f32 %v452_v39, 0.0  ;;  %v461_v26 = vmax.f32 %v453_v40, 0.0  ;;  %v417_v27 = vmax.f32 %v409_v41, 0.0 }
  0x9b   : > { %v5570_v17 = vpack.c.b16 %v808_v59, %v807_v56  ;;  %v588_v56 = vpack.c.bf16 %v5564_v15, %v5564_v15  ;;  %v615_v59 = vpack.c.bf16 %v607_v22, %v607_v22  ;;  %2017 = vmatpush.bf16.msra.mxu0 %v4193_v45  ;;  %v3773_v15 = vor.u32 %v4550_v8, %v3770_v9  ;;  %v4184_v18 = vld [vmem:[%s6836_s1 + $0x420] sm:$0xf]  ;;  %v4655_v19 = vld [vmem:[%s6836_s1 + $0x424] sm:$0xf0]  ;;  %v4534_v22 = vld [vmem:[%s6836_s1 + $0x64] sm:$0xf] }
  0x9c   : > { %2042 = vmatpush.bf16.msra.mxu1 %v3717_v51  ;;  %v4185_v62 = vor.u32 %v4655_v19, %v4184_v18  ;;  %v633_v33 = vpack.c.bf16 %v625_v31, %v625_v31  ;;  %v634_v34 = vpack.c.bf16 %v626_v32, %v626_v32  ;;  %v3709_v35 = vor.u32 %v4534_v22, %v3706_v23  ;;  %v610_v51 = vld [vmem:[#allocation2 + $0x100] sm:$0xff]  ;;  %v4112_v61 = vld [vmem:[%s6836_s1 + $0x390] sm:$0xf]  ;;  %v4653_v18 = vld [vmem:[%s6836_s1 + $0x414] sm:$0xf0] }
  0x9d   : > { %v418_v36 = vmax.f32 %v410_v57, 0.0  ;;  %v783_v44 = vunpack.c.l.b16 %v615_v59  ;;  %v784_v45 = vunpack.c.l.b16 %v616_v60  ;;  %469 = vst.msk [vmem:[#allocation2 + $0x111] sm:$0xff] %vm420_vm0, %v460_v25  ;;  %v5644_v49 = vunpack.c.l.b16 %v587_v24  ;;  %v637_v59 = vld [vmem:[#allocation2 + $0xb1] sm:$0xff]  ;;  %v638_v60 = vld [vmem:[#allocation2 + $0xc1] sm:$0xff]  ;;  %v3698_v25 = vld [vmem:[%s6836_s1 + $0x58] sm:$0xf0] }
  0x9e   : > { %1989 = vmatpush.bf16.msra.mxu3 %v4121_v14  ;;  %v5646_v52 = vunpack.c.l.b16 %v588_v56  ;;  %2072 = vmatpush.bf16.msra.mxu2 %v3773_v15  ;;  %470 = vst.msk [vmem:[#allocation2 + $0x121] sm:$0xff] %vm420_vm0, %v461_v26  ;;  %v809_v31 = vunpack.c.l.b16 %v633_v33  ;;  %v810_v32 = vunpack.c.l.b16 %v634_v34  ;;  %v853_v39 = vunpack.c.l.b16 %v661_v13  ;;  %v609_v56 = vld [vmem:[#allocation2 + $0xf0] sm:$0xff]  ;;  %v3762_v13 = vld [vmem:[%s6836_s1 + $0xd8] sm:$0xf0]  ;;  %v4104_v26 = vld [vmem:[%s6836_s1 + $0x380] sm:$0xf] }
  0x9f   : > { %2018 = vmatpush.bf16.msra.mxu0 %v4185_v62  ;;  %427 = vst.msk [vmem:[#allocation2 + $0x71] sm:$0xff] %vm420_vm0, %v417_v27  ;;  %v5651_v40 = vpack.c.b16 %v784_v45, %v783_v44  ;;  %v5664_v57 = vpack.c.b16 %v5342_v47, %v5357_v3  ;;  %v4548_v3 = vld [vmem:[%s6836_s1 + $0xd4] sm:$0xf]  ;;  %v4176_v15 = vld [vmem:[%s6836_s1 + $0x410] sm:$0xf]  ;;  %v617_v22 = vpack.c.bf16 %v609_v56, %v609_v56 }
  0xa0   : > { %2043 = vmatpush.bf16.msra.mxu1 %v3709_v35  ;;  %428 = vst.msk [vmem:[#allocation2 + $0x81] sm:$0xff] %vm420_vm0, %v418_v36  ;;  %v5655_v24 = vpack.c.b16 %v5646_v52, %v5644_v49  ;;  %v5657_v41 = vpack.c.b16 %v810_v32, %v809_v31  ;;  %v5660_v53 = vpack.c.b16 %v5350_v0, %v853_v39  ;;  %v4637_v0 = vld [vmem:[%s6836_s1 + $0x394] sm:$0xf0]  ;;  %v4532_v19 = vld [vmem:[%s6836_s1 + $0x54] sm:$0xf] }
  0xa1   : > { %v4113_v47 = vor.u32 %v4637_v0, %v4112_v61  ;;  %v3765_v14 = vor.u32 %v4548_v3, %v3762_v13  ;;  %v618_v62 = vpack.c.bf16 %v610_v51, %v610_v51  ;;  %v4177_v23 = vor.u32 %v4653_v18, %v4176_v15  ;;  %v4635_v27 = vld [vmem:[%s6836_s1 + $0x384] sm:$0xf0]  ;;  %v4546_v44 = vld [vmem:[%s6836_s1 + $0xc4] sm:$0xf]  ;;  %v3754_v45 = vld [vmem:[%s6836_s1 + $0xc8] sm:$0xf0] }
  0xa2   : > { %1876 = vmatmul.bf16.vlgmr.msrb.gmra.mxu3 %v5545_v58  ;;  %v645_v33 = vpack.c.bf16 %v637_v59, %v637_v59  ;;  %v646_v34 = vpack.c.bf16 %v638_v60, %v638_v60  ;;  %v3701_v35 = vor.u32 %v4532_v19, %v3698_v25  ;;  %v4105_v36 = vor.u32 %v4635_v27, %v4104_v26  ;;  %v4168_v31 = vld [vmem:[%s6836_s1 + $0x400] sm:$0xf]  ;;  %v4651_v39 = vld [vmem:[%s6836_s1 + $0x404] sm:$0xf0]  ;;  %v4530_v56 = vld [vmem:[%s6836_s1 + $0x44] sm:$0xf] }
  0xa3   : > { %1828 = vmatmul.bf16.gmra.mxu1 %v5552_v4  ;;  %1990 = vmatpush.bf16.msra.mxu3 %v4113_v47  ;;  %v3757_v32 = vor.u32 %v4546_v44, %v3754_v45  ;;  %v3690_v59 = vld [vmem:[%s6836_s1 + $0x48] sm:$0xf0]  ;;  %v4169_v61 = vor.u32 %v4651_v39, %v4168_v31  ;;  %v785_v47 = vunpack.c.l.b16 %v617_v22  ;;  %v786_v3 = vunpack.c.l.b16 %v618_v62  ;;  %v639_v26 = vld [vmem:[#allocation2 + $0xd1] sm:$0xff]  ;;  %v640_v27 = vld [vmem:[#allocation2 + $0xe1] sm:$0xff] }
  0xa4   : > { %2073 = vmatpush.bf16.msra.mxu2 %v3765_v14  ;;  %2019 = vmatpush.bf16.msra.mxu0 %v4177_v23  ;;  %v3693_v0 = vor.u32 %v4530_v56, %v3690_v59  ;;  %v829_v13 = vunpack.c.l.b16 %v645_v33  ;;  %v830_v14 = vunpack.c.l.b16 %v646_v34  ;;  %v3653_v23 = vld [vmem:[%s4978_s8 + $0xf8] sm:$0xff]  ;;  %v611_v22 = vld [vmem:[#allocation2 + $0x110] sm:$0xff] }
  0xa5   : > { %1910 = vmatmul.bf16.gmra.mxu0 %v5570_v17  ;;  %2044 = vmatpush.bf16.msra.mxu1 %v3701_v35  ;;  %v5718_v19 = vpack.c.b16 %v786_v3, %v785_v47  ;;  %v612_v62 = vld [vmem:[#allocation2 + $0x120] sm:$0xff]  ;;  %v4544_v33 = vld [vmem:[%s6836_s1 + $0xb4] sm:$0xf]  ;;  %v3746_v34 = vld [vmem:[%s6836_s1 + $0xb8] sm:$0xf0]  ;;  %v619_v47 = vpack.c.bf16 %v611_v22, %v611_v22 }
  0xa6   : > { %1862 = vmatmul.bf16.gmra.mxu2 %v5568_v16  ;;  %v627_v8 = vld [vmem:[#allocation2 + $0x71] sm:$0xff]  ;;  %v5721_v25 = vpack.c.b16 %v830_v14, %v829_v13  ;;  %v3749_v45 = vor.u32 %v4544_v33, %v3746_v34  ;;  %v3842_v31 = vld [vmem:[%s6836_s1 + $0x178] sm:$0xf0]  ;;  %v620_v3 = vpack.c.bf16 %v612_v62, %v612_v62  ;;  %v647_v13 = vpack.c.bf16 %v639_v26, %v639_v26  ;;  %v4526_v26 = vld [vmem:[%s6836_s1 + $0x24] sm:$0xf] }
  0xa7   : > { %v628_v9 = vld [vmem:[#allocation2 + $0x81] sm:$0xff]  ;;  %v635_v60 = vpack.c.bf16 %v627_v8, %v627_v8  ;;  %1991 = vmatpush.bf16.msra.mxu3 %v4105_v36  ;;  %v529_v8 = vmul.f32 %v5560_v11, %v3653_v23  ;;  %v4568_v35 = vld [vmem:[%s6836_s1 + $0x174] sm:$0xf]  ;;  %v3682_v39 = vld [vmem:[%s6836_s1 + $0x38] sm:$0xf0] }
  0xa8   : > { %v636_v51 = vpack.c.bf16 %v628_v9, %v628_v9  ;;  %2074 = vmatpush.bf16.msra.mxu2 %v3757_v32  ;;  %2020 = vmatpush.bf16.msra.mxu0 %v4169_v61  ;;  %v657_v36 = vld [vmem:[#allocation2 + $0x230] sm:$0xff]  ;;  %v3845_v59 = vor.u32 %v4568_v35, %v3842_v31  ;;  %v3906_v61 = vld [vmem:[%s6836_s1 + $0x1f8] sm:$0xf0]  ;;  %v3834_v23 = vld [vmem:[%s6836_s1 + $0x168] sm:$0xf0] }
  0xa9   : > { %v811_v15 = vunpack.c.l.b16 %v635_v60  ;;  %2045 = vmatpush.bf16.msra.mxu1 %v3693_v0  ;;  %v685_v44 = vld [vmem:[#allocation2 + $0x1f1] sm:$0xff]  ;;  %v537_v56 = vadd.f32 %v5601_v37, %v529_v8  ;;  %v4542_v0 = vld [vmem:[%s6836_s1 + $0xa4] sm:$0xf]  ;;  %v648_v8 = vpack.c.bf16 %v640_v27, %v640_v27  ;;  %v3674_v33 = vld [vmem:[%s6836_s1 + $0x28] sm:$0xf0]  ;;  %v665_v31 = vpack.c.bf16 %v657_v36, %v657_v36 }
  0xaa   : > { %v812_v18 = vunpack.c.l.b16 %v636_v51  ;;  %v4528_v32 = vld [vmem:[%s6836_s1 + $0x34] sm:$0xf]  ;;  %v4582_v34 = vld [vmem:[%s6836_s1 + $0x1e4] sm:$0xf]  ;;  %v3677_v35 = vor.u32 %v4526_v26, %v3674_v33  ;;  %v3898_v27 = vld [vmem:[%s6836_s1 + $0x1e8] sm:$0xf0] }
  0xab   : > { %v3685_v60 = vor.u32 %v4528_v32, %v3682_v39  ;;  %v4584_v51 = vld [vmem:[%s6836_s1 + $0x1f4] sm:$0xf]  ;;  %2100 = vmatpush.bf16.msrb.mxu3 %v3845_v59  ;;  %v693_v32 = vpack.c.bf16 %v685_v44, %v685_v44  ;;  %v3901_v39 = vor.u32 %v4582_v34, %v3898_v27  ;;  %v787_v59 = vunpack.c.l.b16 %v619_v47  ;;  %v642_v47 = vld [vmem:[#allocation2 + $0x101] sm:$0xff]  ;;  %v3666_v33 = vld [vmem:[%s6836_s1 + $0x18] sm:$0xf0] }
  0xac   : > { %v5724_v9 = vpack.c.b16 %v812_v18, %v811_v15  ;;  %2075 = vmatpush.bf16.msra.mxu2 %v3749_v45  ;;  %v3909_v14 = vor.u32 %v4584_v51, %v3906_v61  ;;  %v3738_v15 = vld [vmem:[%s6836_s1 + $0xa8] sm:$0xf0]  ;;  %v4566_v18 = vld [vmem:[%s6836_s1 + $0x164] sm:$0xf]  ;;  %v545_v45 = vmax.f32 %v537_v56, 0.0  ;;  %v831_v51 = vunpack.c.l.b16 %v647_v13  ;;  %v641_v56 = vld [vmem:[#allocation2 + $0xf1] sm:$0xff] }
  0xad   : > { %2046 = vmatpush.bf16.msra.mxu1 %v3685_v60  ;;  %v3741_v22 = vor.u32 %v4542_v0, %v3738_v15  ;;  %v3837_v62 = vor.u32 %v4566_v18, %v3834_v23  ;;  %v788_v60 = vunpack.c.l.b16 %v620_v3  ;;  %v832_v61 = vunpack.c.l.b16 %v648_v8  ;;  %v669_v3 = vld [vmem:[#allocation2 + $0x151] sm:$0xff]  ;;  %v3730_v23 = vld [vmem:[%s6836_s1 + $0x98] sm:$0xf0] }
  0xae   : > { %2129 = vmatpush.bf16.msrb.mxu0 %v3909_v14  ;;  %554 = vst.msk [vmem:[#allocation2 + $0x261] sm:$0xff] %vm420_vm0, %v545_v45  ;;  %v857_v0 = vunpack.c.l.b16 %v665_v31  ;;  %v901_v14 = vunpack.c.l.b16 %v693_v32  ;;  %v4540_v13 = vld [vmem:[%s6836_s1 + $0x94] sm:$0xf]  ;;  %v3890_v45 = vld [vmem:[%s6836_s1 + $0x1d8] sm:$0xf0]  ;;  %v649_v32 = vpack.c.bf16 %v641_v56, %v641_v56 }
  0xaf   : > { %2101 = vmatpush.bf16.msrb.mxu3 %v3837_v62  ;;  %v5780_v15 = vpack.c.b16 %v788_v60, %v787_v59  ;;  %v5782_v18 = vpack.c.b16 %v832_v61, %v831_v51  ;;  %v3826_v62 = vld [vmem:[%s6836_s1 + $0x158] sm:$0xf0]  ;;  %v4524_v26 = vld [vmem:[%s6836_s1 + $0x14] sm:$0xf]  ;;  %v4538_v31 = vld [vmem:[%s6836_s1 + $0x84] sm:$0xf] }
  0xb0   : > { %2076 = vmatpush.bf16.msra.mxu2 %v3741_v22  ;;  %v5785_v36 = vpack.c.b16 %v5410_v42, %v857_v0  ;;  %v5788_v44 = vpack.c.b16 %v5352_v1, %v901_v14  ;;  %v4564_v1 = vld [vmem:[%s6836_s1 + $0x154] sm:$0xf]  ;;  %v3733_v22 = vor.u32 %v4540_v13, %v3730_v23  ;;  %v3722_v60 = vld [vmem:[%s6836_s1 + $0x88] sm:$0xf0]  ;;  %v4562_v51 = vld [vmem:[%s6836_s1 + $0x144] sm:$0xf]  ;;  %v650_v0 = vpack.c.bf16 %v642_v47, %v642_v47 }
  0xb1   : > { %2047 = vmatpush.bf16.msra.mxu1 %v3677_v35  ;;  %v659_v42 = vld [vmem:[#allocation2 + $0x250] sm:$0xff]  ;;  %v3829_v34 = vor.u32 %v4564_v1, %v3826_v62  ;;  %v3669_v35 = vor.u32 %v4524_v26, %v3666_v33  ;;  %v3818_v61 = vld [vmem:[%s6836_s1 + $0x148] sm:$0xf0]  ;;  %v3725_v14 = vor.u32 %v4538_v31, %v3722_v60  ;;  %v4578_v23 = vld [vmem:[%s6836_s1 + $0x1c4] sm:$0xf] }
  0xb2   : > { %1881 = vmatmul.bf16.gmra.mxu3 %v5651_v40  ;;  %2130 = vmatpush.bf16.msrb.mxu0 %v3901_v39  ;;  %v4580_v27 = vld [vmem:[%s6836_s1 + $0x1d4] sm:$0xf]  ;;  %v677_v39 = vpack.c.bf16 %v669_v3, %v669_v3  ;;  %v3821_v56 = vor.u32 %v4562_v51, %v3818_v61  ;;  %v4522_v3 = vld [vmem:[%s6836_s1 + $0x4] sm:$0xf]  ;;  %v3658_v13 = vld [vmem:[%s6836_s1 + $0x8] sm:$0xf0] }
  0xb3   : > { %1833 = vmatmul.bf16.gmra.mxu1 %v5655_v24  ;;  %v3893_v59 = vor.u32 %v4580_v27, %v3890_v45  ;;  %2102 = vmatpush.bf16.msrb.mxu3 %v3829_v34  ;;  %v3661_v1 = vor.u32 %v4522_v3, %v3658_v13  ;;  %v3882_v47 = vld [vmem:[%s6836_s1 + $0x1c8] sm:$0xf0]  ;;  %v833_v34 = vunpack.c.l.b16 %v649_v32  ;;  %v3874_v3 = vld [vmem:[%s6836_s1 + $0x1b8] sm:$0xf0]  ;;  %v4600_v13 = vld [vmem:[%s6836_s1 + $0x274] sm:$0xf] }
  0xb4   : > { %2077 = vmatpush.bf16.msra.mxu2 %v3733_v22  ;;  %v667_v22 = vpack.c.bf16 %v659_v42, %v659_v42  ;;  %v3885_v26 = vor.u32 %v4578_v23, %v3882_v47  ;;  %v877_v33 = vunpack.c.l.b16 %v677_v39  ;;  %v4616_v39 = vld [vmem:[%s6836_s1 + $0x2f4] sm:$0xf] }
  0xb5   : > { %1915 = vmatmul.bf16.gmra.mxu0 %v5657_v41  ;;  %v660_v8 = vld [vmem:[#allocation2 + $0x260] sm:$0xff]  ;;  %2048 = vmatpush.bf16.msra.mxu1 %v3669_v35  ;;  %v834_v35 = vunpack.c.l.b16 %v650_v0 }
  0xb6   : > { %1963 = vmatmul.bf16.vlgmr.msrb.gmra.mxu2 %v5660_v53  ;;  %2131 = vmatpush.bf16.msrb.mxu0 %v3893_v59  ;;  %v668_v62 = vpack.c.bf16 %v660_v8, %v660_v8  ;;  %v859_v27 = vunpack.c.l.b16 %v667_v22  ;;  %v5843_v31 = vpack.c.b16 %v5437_v6, %v877_v33  ;;  %v3645_v59 = vld [vmem:[%s4978_s8 + $0xb8] sm:$0xff]  ;;  %v5853_v8 = vpack.c.b16 %v5412_v43, %v5359_v5  ;;  %v4560_v6 = vld [vmem:[%s6836_s1 + $0x134] sm:$0xf]  ;;  %v644_v43 = vld [vmem:[#allocation2 + $0x121] sm:$0xff] }
  0xb7   : > { %2103 = vmatpush.bf16.msrb.mxu3 %v3821_v56  ;;  %v5846_v60 = vpack.c.b16 %v834_v35, %v833_v34  ;;  %v487_v51 = vmul.f32 %v5560_v11, %v3645_v59  ;;  %v3810_v11 = vld [vmem:[%s6836_s1 + $0x138] sm:$0xf0]  ;;  %v643_v5 = vld [vmem:[#allocation2 + $0x111] sm:$0xff]  ;;  %v652_v22 = vpack.c.bf16 %v644_v43, %v644_v43  ;;  %v3802_v33 = vld [vmem:[%s6836_s1 + $0x128] sm:$0xf0] }
  0xb8   : > { %2078 = vmatpush.bf16.msra.mxu2 %v3725_v14  ;;  %v860_v45 = vunpack.c.l.b16 %v668_v62  ;;  %v3813_v61 = vor.u32 %v4560_v6, %v3810_v11  ;;  %v4576_v56 = vld [vmem:[%s6836_s1 + $0x1b4] sm:$0xf]  ;;  %v651_v47 = vpack.c.bf16 %v643_v5, %v643_v5  ;;  %v4614_v34 = vld [vmem:[%s6836_s1 + $0x2e4] sm:$0xf]  ;;  %v3866_v6 = vld [vmem:[%s6836_s1 + $0x1a8] sm:$0xf0]  ;;  %v1790_v5 = vpop.f32.mrf.mxu0 }
  0xb9   : > { %2049 = vmatpush.bf16.msra.mxu1 %v3661_v1  ;;  %v495_v32 = vadd.f32 %v5601_v37, %v487_v51  ;;  %v4034_v37 = vld [vmem:[%s6836_s1 + $0x2f8] sm:$0xf0]  ;;  %v3877_v23 = vor.u32 %v4576_v56, %v3874_v3  ;;  %v836_v59 = vunpack.c.l.b16 %v652_v22  ;;  %v4598_v11 = vld [vmem:[%s6836_s1 + $0x264] sm:$0xf]  ;;  %v4612_v56 = vld [vmem:[%s6836_s1 + $0x2d4] sm:$0xf] }
  0xba   : > { %2132 = vmatpush.bf16.msrb.mxu0 %v3885_v26  ;;  %v5849_v42 = vpack.c.b16 %v860_v45, %v859_v27  ;;  %v4037_v14 = vor.u32 %v4616_v39, %v4034_v37  ;;  %v3970_v1 = vld [vmem:[%s6836_s1 + $0x278] sm:$0xf0]  ;;  %v4558_v26 = vld [vmem:[%s6836_s1 + $0x124] sm:$0xf]  ;;  %v4026_v27 = vld [vmem:[%s6836_s1 + $0x2e8] sm:$0xf0]  ;;  %v835_v45 = vunpack.c.l.b16 %v651_v47  ;;  %v5908_v39 = vpack.c.b16 %v5536_v46, %v5439_v7 }
  0xbb   : > { %v503_v0 = vmax.f32 %v495_v32, 0.0  ;;  %2104 = vmatpush.bf16.msrb.mxu3 %v3813_v61  ;;  %v3973_v62 = vor.u32 %v4600_v13, %v3970_v1  ;;  %v3805_v35 = vor.u32 %v4558_v26, %v3802_v33  ;;  %v4029_v51 = vor.u32 %v4614_v34, %v4026_v27  ;;  %v4574_v32 = vld [vmem:[%s6836_s1 + $0x1a4] sm:$0xf]  ;;  %v3962_v61 = vld [vmem:[%s6836_s1 + $0x268] sm:$0xf0] }
  0xbc   : > { %2187 = vmatpush.bf16.msrb.mxu2 %v4037_v14  ;;  %v3869_v43 = vor.u32 %v4574_v32, %v3866_v6  ;;  %v5913_v37 = vpack.c.b16 %v836_v59, %v835_v45  ;;  %v5917_v14 = vpack.c.b16 %v5541_v54, %v5421_v50  ;;  %v4556_v7 = vld [vmem:[%s6836_s1 + $0x114] sm:$0xf]  ;;  %v3794_v46 = vld [vmem:[%s6836_s1 + $0x118] sm:$0xf0]  ;;  %v692_v22 = vld [vmem:[#allocation2 + $0x261] sm:$0xff] }
  0xbd   : > { %512 = vst.msk [vmem:[#allocation2 + $0x1c1] sm:$0xff] %vm420_vm0, %v503_v0  ;;  %v3965_v0 = vor.u32 %v4598_v11, %v3962_v61  ;;  %v3797_v50 = vor.u32 %v4556_v7, %v3794_v46  ;;  %v4018_v54 = vld [vmem:[%s6836_s1 + $0x2d8] sm:$0xf0]  ;;  %v4596_v47 = vld [vmem:[%s6836_s1 + $0x254] sm:$0xf]  ;;  %v700_v34 = vpack.c.bf16 %v692_v22, %v692_v22 }
  0xbe   : > { %2133 = vmatpush.bf16.msrb.mxu0 %v3877_v23  ;;  %v4021_v13 = vor.u32 %v4612_v56, %v4018_v54  ;;  %v4572_v23 = vld [vmem:[%s6836_s1 + $0x194] sm:$0xf]  ;;  %v3858_v1 = vld [vmem:[%s6836_s1 + $0x198] sm:$0xf0]  ;;  %v3786_v27 = vld [vmem:[%s6836_s1 + $0x108] sm:$0xf0] }
  0xbf   : > { %2105 = vmatpush.bf16.msrb.mxu3 %v3805_v35  ;;  %v4554_v35 = vld [vmem:[%s6836_s1 + $0x104] sm:$0xf]  ;;  %v908_v6 = vunpack.c.l.b16 %v700_v34  ;;  %v3946_v56 = vld [vmem:[%s6836_s1 + $0x248] sm:$0xf0]  ;;  %v3938_v34 = vld [vmem:[%s6836_s1 + $0x238] sm:$0xf0] }
  0xc0   : > { %2188 = vmatpush.bf16.msrb.mxu2 %v4029_v51  ;;  %v1792_v33 = vpop.f32.mrf.mxu0  ;;  %v4610_v45 = vld [vmem:[%s6836_s1 + $0x2c4] sm:$0xf]  ;;  %v3789_v59 = vor.u32 %v4554_v35, %v3786_v27  ;;  %v4010_v51 = vld [vmem:[%s6836_s1 + $0x2c8] sm:$0xf0]  ;;  %v4648_v35 = vld [vmem:[%s6836_s1 + $0x3f4] sm:$0xf] }
  0xc1   : > { %v4013_v32 = vor.u32 %v4610_v45, %v4010_v51  ;;  %v4570_v11 = vld [vmem:[%s6836_s1 + $0x184] sm:$0xf] }
  0xc2   : > { %1886 = vmatmul.bf16.gmra.mxu3 %v5718_v19  ;;  %2134 = vmatpush.bf16.msrb.mxu0 %v3869_v43  ;;  %v3850_v43 = vld [vmem:[%s6836_s1 + $0x188] sm:$0xf0]  ;;  %v4594_v61 = vld [vmem:[%s6836_s1 + $0x244] sm:$0xf] }
  0xc3   : > { %1934 = vmatmul.bf16.vlgmr.msrb.gmra.mxu1 %v5721_v25  ;;  %2106 = vmatpush.bf16.msrb.mxu3 %v3797_v50  ;;  %v3853_v46 = vor.u32 %v4570_v11, %v3850_v43  ;;  %v3949_v50 = vor.u32 %v4594_v61, %v3946_v56  ;;  %v3994_v11 = vld [vmem:[%s6836_s1 + $0x2a8] sm:$0xf0]  ;;  %v4630_v43 = vld [vmem:[%s6836_s1 + $0x364] sm:$0xf] }
  0xc4   : > { %2158 = vmatpush.bf16.msrb.mxu1 %v3973_v62  ;;  %v3861_v62 = vor.u32 %v4572_v23, %v3858_v1  ;;  %2189 = vmatpush.bf16.msrb.mxu2 %v4021_v13  ;;  %v5976_v23 = vpack.c.b16 %v908_v6, %v5543_v55  ;;  %v4632_v55 = vld [vmem:[%s6836_s1 + $0x374] sm:$0xf]  ;;  %v4606_v6 = vld [vmem:[%s6836_s1 + $0x2a4] sm:$0xf] }
  0xc5   : > { %1920 = vmatmul.bf16.gmra.mxu0 %v5724_v9  ;;  %v3997_v56 = vor.u32 %v4606_v6, %v3994_v11  ;;  %v4644_v6 = vld [vmem:[%s6836_s1 + $0x3d4] sm:$0xf] }
  0xc6   : > { %1968 = vmatmul.bf16.gmra.mxu2 %v5664_v57  ;;  %2135 = vmatpush.bf16.msrb.mxu0 %v3861_v62  ;;  %v4098_v62 = vld [vmem:[%s6836_s1 + $0x378] sm:$0xf0] }
  0xc7   : > { %2107 = vmatpush.bf16.msrb.mxu3 %v3789_v59 }
  0xc8   : > { %2159 = vmatpush.bf16.msrb.mxu1 %v3965_v0  ;;  %2190 = vmatpush.bf16.msrb.mxu2 %v4013_v32  ;;  %v5970_v0 = vpack.c.b16 %v5644_v49, %v5538_v48  ;;  %v4608_v49 = vld [vmem:[%s6836_s1 + $0x2b4] sm:$0xf] }
  0xca   : > { %2136 = vmatpush.bf16.msrb.mxu0 %v3853_v46 }
  0xd2   : > { %1891 = vmatmul.bf16.gmra.mxu3 %v5780_v15 }
  0xd3   : > { %1939 = vmatmul.bf16.gmra.mxu1 %v5782_v18 }
  0xd5   : > { %2021 = vmatmul.bf16.vlgmr.msra.gmra.mxu0 %v5788_v44 }
  0xd6   : > { %1973 = vmatmul.bf16.gmra.mxu2 %v5785_v36 }
  0xe1   : > { %v1848_v3 = vpop.f32.mrf.mxu2 }
  0xe2   : > { %1992 = vmatmul.bf16.vlgmr.msra.gmra.mxu3 %v5843_v31 }
  0xe3   : > { %1944 = vmatmul.bf16.gmra.mxu1 %v5846_v60 }
  0xe5   : > { %2026 = vmatmul.bf16.gmra.mxu0 %v5853_v8 }
  0xe6   : > { %1978 = vmatmul.bf16.gmra.mxu2 %v5849_v42 }
  0xe9   : > { %v1850_v7 = vpop.f32.mrf.mxu2 }
  0xf2   : > { %1997 = vmatmul.bf16.gmra.mxu3 %v5908_v39 }
  0xf3   : > { %1949 = vmatmul.bf16.gmra.mxu1 %v5913_v37 }
  0xf5   : > { %2031 = vmatmul.bf16.gmra.mxu0 %v5917_v14 }
  0xf6   : > { %2079 = vmatmul.bf16.vlgmr.msra.gmra.mxu2 %v5355_v2  ;;  %v3954_v2 = vld [vmem:[%s6836_s1 + $0x258] sm:$0xf0] }
  0xf7   : > { %v3957_v26 = vor.u32 %v4596_v47, %v3954_v2  ;;  %v676_v47 = vld [vmem:[#allocation2 + $0x1c1] sm:$0xff] }
  0xf8   : > { %v684_v2 = vpack.c.bf16 %v676_v47, %v676_v47 }
  0xf9   : > { %2160 = vmatpush.bf16.msrb.mxu1 %v3957_v26  ;;  %v4592_v26 = vld [vmem:[%s6836_s1 + $0x234] sm:$0xf] }
  0xfa   : > { %v3941_v27 = vor.u32 %v4592_v26, %v3938_v34  ;;  %v884_v61 = vunpack.c.l.b16 %v684_v2 }
  0xfc   : > { %v6027_v47 = vpack.c.b16 %v884_v61, %v5646_v52 }
  0xfd   : > { %2161 = vmatpush.bf16.msrb.mxu1 %v3949_v50 }
 0x100   : > { %v1819_v54 = vpop.f32.mrf.mxu1 }
 0x101   : > { %v1820_v13 = vadd.f32 %v1819_v54, %v1790_v5  ;;  %v4002_v5 = vld [vmem:[%s6836_s1 + $0x2b8] sm:$0xf0]  ;;  %2162 = vmatpush.bf16.msrb.mxu1 %v3941_v27 }
 0x102   : > { %2002 = vmatmul.bf16.gmra.mxu3 %v5970_v0  ;;  %v1795_v1 = vpop.f32.mrf.mxu0  ;;  %v4005_v22 = vor.u32 %v4608_v49, %v4002_v5  ;;  %v4590_v49 = vld [vmem:[%s6836_s1 + $0x224] sm:$0xf]  ;;  %v3930_v5 = vld [vmem:[%s6836_s1 + $0x228] sm:$0xf0]  ;;  %v3986_v27 = vld [vmem:[%s6836_s1 + $0x298] sm:$0xf0] }
 0x103   : > { %2050 = vmatmul.bf16.vlgmr.msra.gmra.mxu1 %v5021_v20  ;;  %v5980_v48 = vadd.f32 %v1848_v3, %v1820_v13  ;;  %v4101_v3 = vor.u32 %v4632_v55, %v4098_v62  ;;  %v3933_v55 = vor.u32 %v4590_v49, %v3930_v5  ;;  %v4626_v49 = vld [vmem:[%s6836_s1 + $0x344] sm:$0xf] }
 0x104   : > { %2191 = vmatpush.bf16.msrb.mxu2 %v4005_v22  ;;  %v4154_v22 = vld [vmem:[%s6836_s1 + $0x3e8] sm:$0xf0] }
 0x105   : > { %v5994_v20 = vpop.f32.mrf.mxu3  ;;  %2036 = vmatmul.bf16.gmra.mxu0 %v5976_v23  ;;  %2216 = vmatpush.bf16.msra.mxu3 %v4101_v3 }
 0x106   : > { %2084 = vmatmul.bf16.gmra.mxu2 %v5458_v28  ;;  %v4162_v28 = vld [vmem:[%s6836_s1 + $0x3f8] sm:$0xf0]  ;;  %2163 = vmatpush.bf16.msrb.mxu1 %v3933_v55 }
 0x107   : > { %v4165_v51 = vor.u32 %v4648_v35, %v4162_v28  ;;  %v4604_v35 = vld [vmem:[%s6836_s1 + $0x294] sm:$0xf] }
 0x108   : > { %v1821_v45 = vpop.f32.mrf.mxu1  ;;  %2192 = vmatpush.bf16.msrb.mxu2 %v3997_v56  ;;  %v3989_v28 = vor.u32 %v4604_v35, %v3986_v27  ;;  %v4642_v27 = vld [vmem:[%s6836_s1 + $0x3c4] sm:$0xf] }
 0x109   : > { %v1853_v59 = vpop.f32.mrf.mxu2  ;;  %v1822_v32 = vadd.f32 %v1821_v45, %v1792_v33  ;;  %2245 = vmatpush.bf16.msra.mxu0 %v4165_v51  ;;  %v4090_v33 = vld [vmem:[%s6836_s1 + $0x368] sm:$0xf0]  ;;  %v4082_v45 = vld [vmem:[%s6836_s1 + $0x358] sm:$0xf0]  ;;  %v4588_v51 = vld [vmem:[%s6836_s1 + $0x214] sm:$0xf] }
 0x10a   : > { %v1797_v46 = vpop.f32.mrf.mxu0  ;;  %v4093_v54 = vor.u32 %v4630_v43, %v4090_v33  ;;  %v4602_v33 = vld [vmem:[%s6836_s1 + $0x284] sm:$0xf] }
 0x10b   : > { %v6022_v50 = vadd.f32 %v1850_v7, %v1822_v32  ;;  %v4646_v7 = vld [vmem:[%s6836_s1 + $0x3e4] sm:$0xf]  ;;  %v3922_v32 = vld [vmem:[%s6836_s1 + $0x218] sm:$0xf0] }
 0x10c   : > { %2217 = vmatpush.bf16.msra.mxu3 %v4093_v54  ;;  %v4157_v3 = vor.u32 %v4646_v7, %v4154_v22  ;;  %2193 = vmatpush.bf16.msrb.mxu2 %v3989_v28  ;;  %v3925_v11 = vor.u32 %v4588_v51, %v3922_v32  ;;  %v3978_v54 = vld [vmem:[%s6836_s1 + $0x288] sm:$0xf0] }
 0x10d   : > { %v6024_v13 = vpop.f32.mrf.mxu3  ;;  %v3981_v7 = vor.u32 %v4602_v33, %v3978_v54 }
 0x10e   : > { %2246 = vmatpush.bf16.msra.mxu0 %v4157_v3  ;;  %2164 = vmatpush.bf16.msrb.mxu1 %v3925_v11  ;;  %v4586_v3 = vld [vmem:[%s6836_s1 + $0x204] sm:$0xf]  ;;  %v4066_v11 = vld [vmem:[%s6836_s1 + $0x338] sm:$0xf0] }
 0x110   : > { %v1824_v62 = vpop.f32.mrf.mxu1  ;;  %2194 = vmatpush.bf16.msrb.mxu2 %v3981_v7  ;;  %v4622_v7 = vld [vmem:[%s6836_s1 + $0x324] sm:$0xf] }
 0x111   : > { %v1855_v52 = vpop.f32.mrf.mxu2  ;;  %v1825_v2 = vadd.f32 %v1824_v62, %v1795_v1  ;;  %v4628_v1 = vld [vmem:[%s6836_s1 + $0x354] sm:$0xf] }
 0x112   : > { %2007 = vmatmul.bf16.gmra.mxu3 %v6027_v47  ;;  %v6042_v26 = vpop.f32.mrf.mxu0 }
 0x113   : > { %2055 = vmatmul.bf16.gmra.mxu1 %v5367_v10  ;;  %v6045_v34 = vadd.f32 %v1853_v59, %v1825_v2  ;;  %v4085_v59 = vor.u32 %v4628_v1, %v4082_v45  ;;  %v3914_v2 = vld [vmem:[%s6836_s1 + $0x208] sm:$0xf0] }
 0x114   : > { %v3917_v35 = vor.u32 %v4586_v3, %v3914_v2 }
 0x115   : > { %v6059_v10 = vpop.f32.mrf.mxu3  ;;  %2137 = vmatmul.bf16.vlgmr.msrb.gmra.mxu0 %v5545_v58  ;;  %2218 = vmatpush.bf16.msra.mxu3 %v4085_v59  ;;  %v4146_v58 = vld [vmem:[%s6836_s1 + $0x3d8] sm:$0xf0] }
 0x116   : > { %2089 = vmatmul.bf16.gmra.mxu2 %v5552_v4  ;;  %v4149_v61 = vor.u32 %v4644_v6, %v4146_v58  ;;  %2165 = vmatpush.bf16.msrb.mxu1 %v3917_v35  ;;  %v4624_v6 = vld [vmem:[%s6836_s1 + $0x334] sm:$0xf] }
 0x117   : > { %v4069_v58 = vor.u32 %v4624_v6, %v4066_v11 }
 0x118   : > { %v1826_v4 = vpop.f32.mrf.mxu1  ;;  %2247 = vmatpush.bf16.msra.mxu0 %v4149_v61  ;;  %v4664_v61 = vld [vmem:[%s6836_s1 + $0x474] sm:$0xf] }
 0x119   : > { %v1858_v43 = vpop.f32.mrf.mxu2  ;;  %v1827_v56 = vadd.f32 %v1826_v4, %v1797_v46  ;;  %v4074_v46 = vld [vmem:[%s6836_s1 + $0x348] sm:$0xf0]  ;;  %v4640_v4 = vld [vmem:[%s6836_s1 + $0x3b4] sm:$0xf] }
 0x11a   : > { %v6084_v5 = vpop.f32.mrf.mxu0  ;;  %v4077_v22 = vor.u32 %v4626_v49, %v4074_v46  ;;  %v4058_v46 = vld [vmem:[%s6836_s1 + $0x328] sm:$0xf0] }
 0x11b   : > { %v6089_v55 = vadd.f32 %v1855_v52, %v1827_v56  ;;  %v4138_v52 = vld [vmem:[%s6836_s1 + $0x3c8] sm:$0xf0] }
 0x11c   : > { %2219 = vmatpush.bf16.msra.mxu3 %v4077_v22  ;;  %v4141_v1 = vor.u32 %v4642_v27, %v4138_v52  ;;  %v4672_v22 = vld [vmem:[%s6837_s2 + $0x30] sm:$0xff]  ;;  %v4638_v27 = vld [vmem:[%s6836_s1 + $0x3a4] sm:$0xf]  ;;  %v4122_v52 = vld [vmem:[%s6836_s1 + $0x3a8] sm:$0xf0] }
 0x11d   : > { %v6091_v62 = vpop.f32.mrf.mxu3 }
 0x11e   : > { %2248 = vmatpush.bf16.msra.mxu0 %v4141_v1  ;;  %v4662_v1 = vld [vmem:[%s6836_s1 + $0x464] sm:$0xf] }
 0x120   : > { %v1829_v28 = vpop.f32.mrf.mxu1  ;;  %2220 = vmatpush.bf16.msra.mxu3 %v4069_v58 }
 0x121   : > { %v1860_v45 = vpop.f32.mrf.mxu2  ;;  %v1830_v59 = vadd.f32 %v1829_v28, %v5994_v20  ;;  %v4673_v20 = vld [vmem:[%s6837_s2 + $0x38] sm:$0xff]  ;;  %v4125_v28 = vor.u32 %v4638_v27, %v4122_v52 }
 0x122   : > { %2108 = vmatmul.bf16.vlgmr.msrb.gmra.mxu3 %v5084_v30  ;;  %v6107_v51 = vpop.f32.mrf.mxu0  ;;  %3297 = vmatpush.bf16.msra.mxu2 %v4673_v20 }
 0x123   : > { %2060 = vmatmul.bf16.gmra.mxu1 %v5348_v63  ;;  %v6110_v32 = vadd.f32 %v1858_v43, %v1830_v59  ;;  %v4130_v43 = vld [vmem:[%s6836_s1 + $0x3b8] sm:$0xf0] }
 0x124   : > { %v4133_v56 = vor.u32 %v4640_v4, %v4130_v43  ;;  %v4636_v43 = vld [vmem:[%s6836_s1 + $0x394] sm:$0xf] }
 0x125   : > { %v1877_v30 = vpop.f32.mrf.mxu3  ;;  %2142 = vmatmul.bf16.gmra.mxu0 %v5651_v40  ;;  %v4226_v40 = vld [vmem:[%s6836_s1 + $0x478] sm:$0xf0] }
 0x126   : > { %2094 = vmatmul.bf16.gmra.mxu2 %v5655_v24  ;;  %v1878_v63 = vadd.f32 %v1877_v30, %v5980_v48  ;;  %v4229_v54 = vor.u32 %v4664_v61, %v4226_v40  ;;  %2249 = vmatpush.bf16.msra.mxu0 %v4133_v56  ;;  %v4114_v61 = vld [vmem:[%s6836_s1 + $0x398] sm:$0xf0]  ;;  %v4660_v56 = vld [vmem:[%s6836_s1 + $0x454] sm:$0xf] }
 0x127   : > { %3298 = vmatpush.bf16.msra.mxu2 %v4672_v22  ;;  %v4117_v40 = vor.u32 %v4636_v43, %v4114_v61 }
 0x128   : > { %v1831_v24 = vpop.f32.mrf.mxu1  ;;  %v6137_v33 = vadd.f32 %v6042_v26, %v1878_v63  ;;  %2274 = vmatpush.bf16.msra.mxu1 %v4229_v54  ;;  %v4061_v26 = vor.u32 %v4622_v7, %v4058_v46  ;;  %v4620_v63 = vld [vmem:[%s6836_s1 + $0x314] sm:$0xf]  ;;  %v4042_v7 = vld [vmem:[%s6836_s1 + $0x308] sm:$0xf0]  ;;  %v4670_v46 = vld [vmem:[%s6837_s2 + $0x20] sm:$0xff] }
 0x129   : > { %v1863_v48 = vpop.f32.mrf.mxu2  ;;  %v1832_v49 = vadd.f32 %v1831_v24, %v6024_v13 }
 0x12a   : > { %v6149_v3 = vpop.f32.mrf.mxu0  ;;  %2221 = vmatpush.bf16.msra.mxu3 %v4061_v26  ;;  %2250 = vmatpush.bf16.msra.mxu0 %v4125_v28  ;;  %v4202_v28 = vld [vmem:[%s6836_s1 + $0x448] sm:$0xf0] }
 0x12b   : > { %v6151_v2 = vadd.f32 %v1860_v45, %v1832_v49  ;;  %v4218_v45 = vld [vmem:[%s6836_s1 + $0x468] sm:$0xf0]  ;;  %v4618_v49 = vld [vmem:[%s6836_s1 + $0x304] sm:$0xf] }
 0x12c   : > { %v4221_v11 = vor.u32 %v4662_v1, %v4218_v45  ;;  %v4658_v1 = vld [vmem:[%s6836_s1 + $0x444] sm:$0xf] }
 0x12d   : > { %v1879_v13 = vpop.f32.mrf.mxu3  ;;  %v4205_v45 = vor.u32 %v4658_v1, %v4202_v28  ;;  %v4666_v28 = vld [vmem:[%s6837_s2] sm:$0xff] }
 0x12e   : > { %v1880_v35 = vadd.f32 %v1879_v13, %v6022_v50  ;;  %2275 = vmatpush.bf16.msra.mxu1 %v4221_v11  ;;  %2251 = vmatpush.bf16.msra.mxu0 %v4117_v40  ;;  %v4634_v13 = vld [vmem:[%s6836_s1 + $0x384] sm:$0xf]  ;;  %v4680_v40 = vld [vmem:[%s6837_s2 + $0x70] sm:$0xff] }
 0x130   : > { %v1834_v59 = vpop.f32.mrf.mxu1  ;;  %v6167_v50 = vadd.f32 %v6084_v5, %v1880_v35  ;;  %v4050_v5 = vld [vmem:[%s6836_s1 + $0x318] sm:$0xf0]  ;;  %v4106_v35 = vld [vmem:[%s6836_s1 + $0x388] sm:$0xf0] }
 0x131   : > { %v1865_v6 = vpop.f32.mrf.mxu2  ;;  %v1835_v20 = vadd.f32 %v1834_v59, %v6059_v10  ;;  %v4671_v10 = vld [vmem:[%s6837_s2 + $0x28] sm:$0xff]  ;;  %v4053_v4 = vor.u32 %v4620_v63, %v4050_v5  ;;  %v4109_v52 = vor.u32 %v4634_v13, %v4106_v35  ;;  %v4681_v63 = vld [vmem:[%s6837_s2 + $0x78] sm:$0xff] }
 0x132   : > { %2113 = vmatmul.bf16.gmra.mxu3 %v5371_v12  ;;  %v1916_v58 = vpop.f32.mrf.mxu0  ;;  %3299 = vmatpush.bf16.msra.mxu2 %v4671_v10 }
 0x133   : > { %2065 = vmatmul.bf16.gmra.mxu1 %v5447_v21  ;;  %v6172_v30 = vadd.f32 %v1863_v48, %v1835_v20  ;;  %2222 = vmatpush.bf16.msra.mxu3 %v4053_v4  ;;  %v4669_v20 = vld [vmem:[%s6837_s2 + $0x18] sm:$0xff] }
 0x134   : > { %2252 = vmatpush.bf16.msra.mxu0 %v4109_v52  ;;  %v4170_v52 = vld [vmem:[%s6836_s1 + $0x408] sm:$0xf0] }
 0x135   : > { %v1882_v12 = vpop.f32.mrf.mxu3  ;;  %2147 = vmatmul.bf16.gmra.mxu0 %v5718_v19  ;;  %v4210_v19 = vld [vmem:[%s6836_s1 + $0x458] sm:$0xf0] }
 0x136   : > { %2195 = vmatmul.bf16.vlgmr.msrb.gmra.mxu2 %v5721_v25  ;;  %v1883_v21 = vadd.f32 %v1882_v12, %v6045_v34  ;;  %v4213_v48 = vor.u32 %v4660_v56, %v4210_v19 }
 0x137   : > { %3300 = vmatpush.bf16.msra.mxu2 %v4670_v46  ;;  %v4667_v46 = vld [vmem:[%s6837_s2 + $0x8] sm:$0xff] }
 0x138   : > { %v1836_v25 = vpop.f32.mrf.mxu1  ;;  %v6201_v24 = vadd.f32 %v6107_v51, %v1883_v21  ;;  %2276 = vmatpush.bf16.msra.mxu1 %v4213_v48  ;;  %v4045_v51 = vor.u32 %v4618_v49, %v4042_v7  ;;  %v4654_v48 = vld [vmem:[%s6836_s1 + $0x424] sm:$0xf] }
 0x139   : > { %v6198_v34 = vpop.f32.mrf.mxu2  ;;  %v1837_v54 = vadd.f32 %v1836_v25, %v6091_v62 }
 0x13a   : > { %v1918_v22 = vpop.f32.mrf.mxu0  ;;  %2223 = vmatpush.bf16.msra.mxu3 %v4045_v51  ;;  %v4178_v51 = vld [vmem:[%s6836_s1 + $0x418] sm:$0xf0] }
 0x13b   : > { %v6213_v26 = vadd.f32 %v1865_v6, %v1837_v54  ;;  %3301 = vmatpush.bf16.msra.mxu2 %v4669_v20 }
 0x13c   : > { %2277 = vmatpush.bf16.msra.mxu1 %v4205_v45 }
 0x13d   : > { %v1884_v62 = vpop.f32.mrf.mxu3 }
 0x13e   : > { %v1885_v27 = vadd.f32 %v1884_v62, %v6089_v55  ;;  %3326 = vmatpush.bf16.msrb.mxu3 %v4681_v63  ;;  %v4687_v63 = vld [vmem:[%s6837_s2 + $0xa8] sm:$0xff] }
 0x140   : > { %v6228_v59 = vpop.f32.mrf.mxu1  ;;  %v6233_v11 = vadd.f32 %v6149_v3, %v1885_v27  ;;  %v4650_v27 = vld [vmem:[%s6836_s1 + $0x404] sm:$0xf] }
 0x141   : > { %v6230_v6 = vpop.f32.mrf.mxu2  ;;  %v4173_v45 = vor.u32 %v4650_v27, %v4170_v52 }
 0x142   : > { %2118 = vmatmul.bf16.gmra.mxu3 %v5462_v29  ;;  %v1921_v55 = vpop.f32.mrf.mxu0 }
 0x143   : > { %2166 = vmatmul.bf16.vlgmr.msrb.gmra.mxu1 %v5469_v38  ;;  %3327 = vmatpush.bf16.msrb.mxu3 %v4680_v40 }
 0x145   : > { %v1887_v5 = vpop.f32.mrf.mxu3  ;;  %2152 = vmatmul.bf16.gmra.mxu0 %v5780_v15  ;;  %v4656_v15 = vld [vmem:[%s6836_s1 + $0x434] sm:$0xf] }
 0x146   : > { %2200 = vmatmul.bf16.gmra.mxu2 %v5782_v18  ;;  %v1888_v3 = vadd.f32 %v1887_v5, %v6110_v32  ;;  %v4194_v18 = vld [vmem:[%s6836_s1 + $0x438] sm:$0xf0] }
 0x147   : > { %v4689_v32 = vld [vmem:[%s6837_s2 + $0xb8] sm:$0xff]  ;;  %v4197_v56 = vor.u32 %v4656_v15, %v4194_v18  ;;  %v6338_v18 = vld [vmem:[%s6840_s5] ss:$0 sm:$0xff] }
 0x148   : > { %v6246_v29 = vpop.f32.mrf.mxu1  ;;  %v6250_v10 = vadd.f32 %v1916_v58, %v1888_v3  ;;  %3355 = vmatpush.bf16.msrb.mxu0 %v4689_v32  ;;  %v1936_v3 = vadd.f32 %v6228_v59, %v6137_v33  ;;  %v4705_v59 = vld [vmem:[%s6837_s2 + $0x138] sm:$0xff] }
 0x149   : > { %v6248_v38 = vpop.f32.mrf.mxu2  ;;  %2278 = vmatpush.bf16.msra.mxu1 %v4197_v56  ;;  %v1938_v32 = vadd.f32 %v6246_v29, %v6167_v50  ;;  %v4685_v50 = vld [vmem:[%s6837_s2 + $0x98] sm:$0xff] }
 0x14a   : > { %v1923_v4 = vpop.f32.mrf.mxu0  ;;  %v4697_v29 = vld [vmem:[%s6837_s2 + $0xf8] sm:$0xff] }
 0x14b   : > { %v1967_v40 = vadd.f32 %v6230_v6, %v1938_v32  ;;  %v4676_v6 = vld [vmem:[%s6837_s2 + $0x50] sm:$0xff] }
 0x14d   : > { %v1889_v12 = vpop.f32.mrf.mxu3 }
 0x14e   : > { %v1890_v21 = vadd.f32 %v1889_v12, %v6151_v2  ;;  %v4668_v2 = vld [vmem:[%s6837_s2 + $0x10] sm:$0xff] }
 0x14f   : > { %3302 = vmatpush.bf16.msra.mxu2 %v4668_v2 }
 0x150   : > { %v6253_v43 = vpop.f32.mrf.mxu1  ;;  %v6266_v58 = vadd.f32 %v1918_v22, %v1890_v21  ;;  %v4652_v22 = vld [vmem:[%s6836_s1 + $0x414] sm:$0xf]  ;;  %v1965_v21 = vadd.f32 %v6198_v34, %v1936_v3  ;;  %v4675_v3 = vld [vmem:[%s6837_s2 + $0x48] sm:$0xff] }
 0x151   : > { %v6255_v61 = vpop.f32.mrf.mxu2  ;;  %v4181_v13 = vor.u32 %v4652_v22, %v4178_v51 }
 0x152   : > { %2123 = vmatmul.bf16.gmra.mxu3 %v5568_v16  ;;  %v2022_v19 = vpop.f32.mrf.mxu0  ;;  %v4186_v16 = vld [vmem:[%s6836_s1 + $0x428] sm:$0xf0] }
 0x153   : > { %2171 = vmatmul.bf16.gmra.mxu1 %v5570_v17  ;;  %v4189_v49 = vor.u32 %v4654_v48, %v4186_v16  ;;  %3303 = vmatpush.bf16.msra.mxu2 %v4667_v46  ;;  %v4704_v46 = vld [vmem:[%s6837_s2 + $0x130] sm:$0xff] }
 0x155   : > { %v1892_v25 = vpop.f32.mrf.mxu3  ;;  %2253 = vmatmul.bf16.vlgmr.msra.gmra.mxu0 %v5843_v31  ;;  %2279 = vmatpush.bf16.msra.mxu1 %v4189_v49  ;;  %v4688_v31 = vld [vmem:[%s6837_s2 + $0xb0] sm:$0xff] }
 0x156   : > { %2205 = vmatmul.bf16.gmra.mxu2 %v5846_v60  ;;  %v1893_v54 = vadd.f32 %v1892_v25, %v6172_v30  ;;  %v4679_v30 = vld [vmem:[%s6837_s2 + $0x68] sm:$0xff]  ;;  %3356 = vmatpush.bf16.msrb.mxu0 %v4688_v31 }
 0x157   : > { %3328 = vmatpush.bf16.msrb.mxu3 %v4679_v30  ;;  %3304 = vmatpush.bf16.msra.mxu2 %v4666_v28  ;;  %v1941_v30 = vadd.f32 %v6253_v43, %v6201_v24 }
 0x158   : > { %v6285_v17 = vpop.f32.mrf.mxu1  ;;  %v6292_v60 = vadd.f32 %v1921_v55, %v1893_v54 }
 0x159   : > { %v6287_v7 = vpop.f32.mrf.mxu2  ;;  %2280 = vmatpush.bf16.msra.mxu1 %v4181_v13 }
 0x15a   : > { %v2024_v62 = vpop.f32.mrf.mxu0  ;;  %3357 = vmatpush.bf16.msrb.mxu0 %v4687_v63 }
 0x15b   : > { %3413 = vmatpush.bf16.msrb.mxu2 %v4705_v59 }
 0x15d   : > { %v1894_v35 = vpop.f32.mrf.mxu3  ;;  %2281 = vmatpush.bf16.msra.mxu1 %v4173_v45 }
 0x15e   : > { %v1895_v1 = vadd.f32 %v1894_v35, %v6213_v26  ;;  %v4678_v26 = vld [vmem:[%s6837_s2 + $0x60] sm:$0xff] }
 0x15f   : > { %3329 = vmatpush.bf16.msrb.mxu3 %v4678_v26  ;;  %v4777_v35 = vld [vmem:[#allocation2] sm:$0xff]  ;;  %3414 = vmatpush.bf16.msrb.mxu2 %v4704_v46 }
 0x160   : > { %v6316_v55 = vpop.f32.mrf.mxu1  ;;  %v6323_v5 = vadd.f32 %v1923_v4, %v1895_v1  ;;  %v2360_v27 = vpack.c.bf16 %v4777_v35, %v4777_v35  ;;  %v4702_v46 = vld [vmem:[%s6837_s2 + $0x120] sm:$0xff] }
 0x161   : > { %v6318_v20 = vpop.f32.mrf.mxu2  ;;  %3384 = vmatpush.bf16.msrb.mxu1 %v4697_v29 }
 0x162   : > { %2224 = vmatmul.bf16.vlgmr.msra.gmra.mxu3 %v5660_v53  ;;  %v2027_v12 = vpop.f32.mrf.mxu0  ;;  %v6343_v53 = vld [vmem:[%s6841_s6] ss:$0 sm:$0xff]  ;;  %v6396_v63 = vunpack.c.l.b16 %v2360_v27 }
 0x163   : > { %2176 = vmatmul.bf16.gmra.mxu1 %v5657_v41 }
 0x165   : > { %v1993_v4 = vpop.f32.mrf.mxu3  ;;  %2258 = vmatmul.bf16.gmra.mxu0 %v5908_v39  ;;  %v4686_v39 = vld [vmem:[%s6837_s2 + $0xa0] sm:$0xff] }
 0x166   : > { %2210 = vmatmul.bf16.gmra.mxu2 %v5913_v37  ;;  %v1994_v15 = vadd.f32 %v1993_v4, %v1965_v21  ;;  %v4677_v37 = vld [vmem:[%s6837_s2 + $0x58] sm:$0xff]  ;;  %3358 = vmatpush.bf16.msrb.mxu0 %v4686_v39  ;;  %v4703_v21 = vld [vmem:[%s6837_s2 + $0x128] sm:$0xff]  ;;  %v1943_v4 = vadd.f32 %v6285_v17, %v6233_v11 }
 0x167   : > { %3330 = vmatpush.bf16.msrb.mxu3 %v4677_v37  ;;  %v4683_v37 = vld [vmem:[%s6837_s2 + $0x88] sm:$0xff]  ;;  %3415 = vmatpush.bf16.msrb.mxu2 %v4703_v21 }
 0x168   : > { %v2023_v41 = vadd.f32 %v2022_v19, %v1994_v15  ;;  %v6345_v33 = vpop.f32.mrf.mxu1 }
 0x169   : > { %v6347_v34 = vpop.f32.mrf.mxu2 }
 0x16a   : > { %v2315_v56 = vmul.f32 %v6338_v18, %v2023_v41  ;;  %v6361_v2 = vpop.f32.mrf.mxu0  ;;  %3359 = vmatpush.bf16.msrb.mxu0 %v4685_v50 }
 0x16b   : > { %3331 = vmatpush.bf16.msrb.mxu3 %v4676_v6  ;;  %v4695_v6 = vld [vmem:[%s6837_s2 + $0xe8] sm:$0xff]  ;;  %3416 = vmatpush.bf16.msrb.mxu2 %v4702_v46 }
 0x16c   : > { %v2327_v19 = vadd.f32 %v6343_v53, %v2315_v56  ;;  %v1972_v56 = vadd.f32 %v6255_v61, %v1943_v4  ;;  %v4682_v61 = vld [vmem:[%s6837_s2 + $0x80] sm:$0xff]  ;;  %v4721_v4 = vld [vmem:[%s6837_s2 + $0x1b8] sm:$0xff] }
 0x16d   : > { %v1995_v25 = vpop.f32.mrf.mxu3 }
 0x16e   : > { %v2335_v48 = vmax.f32 %v2327_v19, 0.0  ;;  %v1996_v16 = vadd.f32 %v1995_v25, %v1967_v40 }
 0x16f   : > { %3332 = vmatpush.bf16.msrb.mxu3 %v4675_v3  ;;  %v4713_v3 = vld [vmem:[%s6837_s2 + $0x178] sm:$0xff] }
 0x170   : > { %2344 = vst [vmem:[#allocation3 + $0x11] sm:$0xff] %v2335_v48  ;;  %v2025_v54 = vadd.f32 %v2024_v62, %v1996_v16  ;;  %v6365_v49 = vpop.f32.mrf.mxu1  ;;  %v1970_v62 = vadd.f32 %v6248_v38, %v1941_v30  ;;  %v4674_v16 = vld [vmem:[%s6837_s2 + $0x40] sm:$0xff] }
 0x171   : > { %v6367_v31 = vpop.f32.mrf.mxu2 }
 0x172   : > { %v2316_v22 = vmul.f32 %v6338_v18, %v2025_v54  ;;  %2229 = vmatmul.bf16.gmra.mxu3 %v5664_v57  ;;  %v6385_v51 = vpop.f32.mrf.mxu0  ;;  %v4684_v57 = vld [vmem:[%s6837_s2 + $0x90] sm:$0xff] }
 0x173   : > { %2181 = vmatmul.bf16.gmra.mxu1 %v5724_v9  ;;  %v2377_v9 = vpack.c.bf16 %v2335_v48, %v2335_v48  ;;  %3360 = vmatpush.bf16.msrb.mxu0 %v4684_v57 }
 0x174   : > { %v2328_v13 = vadd.f32 %v6343_v53, %v2316_v22  ;;  %3333 = vmatpush.bf16.msrb.mxu3 %v4674_v16 }
 0x175   : > { %v1998_v52 = vpop.f32.mrf.mxu3  ;;  %2263 = vmatmul.bf16.gmra.mxu0 %v5970_v0  ;;  %v4696_v0 = vld [vmem:[%s6837_s2 + $0xf0] sm:$0xff]  ;;  %v6417_v59 = vunpack.c.l.b16 %v2377_v9  ;;  %v2384_v9 = vld [vmem:[#allocation3 + $0x2] sm:$0xff] }
 0x176   : > { %v2336_v24 = vmax.f32 %v2328_v13, 0.0  ;;  %v1999_v43 = vadd.f32 %v1998_v52, %v1970_v62  ;;  %3385 = vmatpush.bf16.msrb.mxu1 %v4696_v0  ;;  %v1946_v62 = vadd.f32 %v6316_v55, %v6250_v10  ;;  %v4694_v0 = vld [vmem:[%s6837_s2 + $0xe0] sm:$0xff] }
 0x177   : > { %v2353_v1 = vld [vmem:[#allocation3 + $0x10] sm:$0xff]  ;;  %3361 = vmatpush.bf16.msrb.mxu0 %v4683_v37 }
 0x178   : > { %2345 = vst [vmem:[#allocation3 + $0x21] sm:$0xff] %v2336_v24  ;;  %v2028_v28 = vadd.f32 %v2027_v12, %v1999_v43  ;;  %v6394_v38 = vpop.f32.mrf.mxu1  ;;  %v2361_v45 = vpack.c.bf16 %v2353_v1, %v2353_v1  ;;  %v2378_v12 = vpack.c.bf16 %v2336_v24, %v2336_v24  ;;  %v1975_v52 = vadd.f32 %v6287_v7, %v1946_v62 }
 0x179   : > { %v2080_v26 = vpop.f32.mrf.mxu2  ;;  %3442 = vmatpush.bf16.msra.mxu3 %v4713_v3  ;;  %v4691_v3 = vld [vmem:[%s6837_s2 + $0xc8] sm:$0xff] }
 0x17a   : > { %v2317_v15 = vmul.f32 %v6338_v18, %v2028_v28  ;;  %v6410_v41 = vunpack.c.l.b16 %v2361_v45  ;;  %v6412_v39 = vpop.f32.mrf.mxu0  ;;  %v6419_v32 = vunpack.c.l.b16 %v2378_v12  ;;  %3386 = vmatpush.bf16.msrb.mxu1 %v4695_v6  ;;  %v2385_v28 = vld [vmem:[#allocation3 + $0x12] sm:$0xff]  ;;  %v1948_v12 = vadd.f32 %v6345_v33, %v6266_v58 }
 0x17b   : > { %3362 = vmatpush.bf16.msrb.mxu0 %v4682_v61  ;;  %v4693_v58 = vld [vmem:[%s6837_s2 + $0xd8] sm:$0xff] }
 0x17c   : > { %v2329_v11 = vadd.f32 %v6343_v53, %v2317_v15  ;;  %v2513_v17 = vpack.c.b16 %v6410_v41, %v6396_v63  ;;  %v2609_v19 = vpack.c.b16 %v6419_v32, %v6417_v59  ;;  %v1977_v16 = vadd.f32 %v6318_v20, %v1948_v12  ;;  %v4720_v20 = vld [vmem:[%s6837_s2 + $0x1b0] sm:$0xff] }
 0x17d   : > { %v2000_v40 = vpop.f32.mrf.mxu3 }
 0x17e   : > { %v2337_v25 = vmax.f32 %v2329_v11, 0.0  ;;  %v2001_v48 = vadd.f32 %v2000_v40, %v1972_v56  ;;  %3305 = vmatmul.bf16.vlgmr.msra.gmra.mxu2 %v2513_v17  ;;  %3387 = vmatpush.bf16.msrb.mxu1 %v4694_v0  ;;  %v2392_v17 = vpack.c.bf16 %v2384_v9, %v2384_v9  ;;  %v2393_v40 = vpack.c.bf16 %v2385_v28, %v2385_v28 }
 0x17f   : > { %v2354_v27 = vld [vmem:[#allocation3 + $0x20] sm:$0xff]  ;;  %3471 = vmatpush.bf16.msra.mxu0 %v4721_v4 }
 0x180   : > { %2346 = vst [vmem:[#allocation3 + $0x31] sm:$0xff] %v2337_v25  ;;  %v2030_v54 = vadd.f32 %v6361_v2, %v2001_v48  ;;  %v2051_v50 = vpop.f32.mrf.mxu1  ;;  %v2379_v30 = vpack.c.bf16 %v2337_v25, %v2337_v25  ;;  %v2362_v57 = vpack.c.bf16 %v2354_v27, %v2354_v27  ;;  %v4700_v25 = vld [vmem:[%s6837_s2 + $0x110] sm:$0xff]  ;;  %v2553_v62 = vunpack.c.l.b16 %v2392_v17 }
 0x181   : > { %v2082_v29 = vpop.f32.mrf.mxu2  ;;  %v6440_v22 = vadd.f32 %v2080_v26, %v2051_v50  ;;  %v4712_v48 = vld [vmem:[%s6837_s2 + $0x170] sm:$0xff] }
 0x182   : > { %v2318_v2 = vmul.f32 %v6338_v18, %v2030_v54  ;;  %2234 = vmatmul.bf16.gmra.mxu3 %v5785_v36  ;;  %v6446_v13 = vpop.f32.mrf.mxu0  ;;  %v6448_v35 = vunpack.c.l.b16 %v2379_v30  ;;  %v6474_v37 = vunpack.c.l.b16 %v2362_v57  ;;  %3388 = vmatpush.bf16.msrb.mxu1 %v4693_v58  ;;  %v4692_v30 = vld [vmem:[%s6837_s2 + $0xd0] sm:$0xff] }
 0x183   : > { %2282 = vmatmul.bf16.vlgmr.msra.gmra.mxu1 %v5788_v44  ;;  %3443 = vmatpush.bf16.msra.mxu3 %v4712_v48  ;;  %v4710_v48 = vld [vmem:[%s6837_s2 + $0x160] sm:$0xff] }
 0x184   : > { %v2330_v24 = vadd.f32 %v6343_v53, %v2318_v2  ;;  %v2538_v10 = vpack.c.b16 %v6448_v35, %v6419_v32  ;;  %v6506_v2 = vunpack.c.l.b16 %v2393_v40  ;;  %3472 = vmatpush.bf16.msra.mxu0 %v4720_v20  ;;  %v2386_v20 = vld [vmem:[#allocation3 + $0x22] sm:$0xff] }
 0x185   : > { %v2003_v55 = vpop.f32.mrf.mxu3  ;;  %2268 = vmatmul.bf16.gmra.mxu0 %v6027_v47  ;;  %v4701_v47 = vld [vmem:[%s6837_s2 + $0x118] sm:$0xff] }
 0x186   : > { %v2338_v36 = vmax.f32 %v2330_v24, 0.0  ;;  %v2004_v43 = vadd.f32 %v2003_v55, %v1975_v52  ;;  %3417 = vmatpush.bf16.msrb.mxu2 %v4701_v47  ;;  %3389 = vmatpush.bf16.msrb.mxu1 %v4692_v30  ;;  %v2561_v28 = vpack.c.b16 %v6506_v2, %v2553_v62 }
 0x187   : > { %v2355_v1 = vld [vmem:[#allocation3 + $0x30] sm:$0xff] }
 0x188   : > { %2347 = vst [vmem:[#allocation3 + $0x41] sm:$0xff] %v2338_v36  ;;  %v2033_v44 = vadd.f32 %v6385_v51, %v2004_v43  ;;  %v2053_v45 = vpop.f32.mrf.mxu1  ;;  %v2363_v26 = vpack.c.bf16 %v2355_v1, %v2355_v1  ;;  %v2380_v21 = vpack.c.bf16 %v2338_v36, %v2338_v36  ;;  %v1951_v43 = vadd.f32 %v6365_v49, %v6292_v60  ;;  %v4711_v60 = vld [vmem:[%s6837_s2 + $0x168] sm:$0xff]  ;;  %v2387_v40 = vld [vmem:[#allocation3 + $0x32] sm:$0xff] }
 0x189   : > { %v2085_v7 = vpop.f32.mrf.mxu2  ;;  %v6468_v51 = vadd.f32 %v2082_v29, %v2053_v45  ;;  %3444 = vmatpush.bf16.msra.mxu3 %v4711_v60  ;;  %v2395_v62 = vpack.c.bf16 %v2387_v40, %v2387_v40 }
 0x18a   : > { %v2319_v15 = vmul.f32 %v6338_v18, %v2033_v44  ;;  %v6476_v56 = vunpack.c.l.b16 %v2363_v26  ;;  %v6478_v11 = vpop.f32.mrf.mxu0  ;;  %v6483_v33 = vunpack.c.l.b16 %v2380_v21  ;;  %3418 = vmatpush.bf16.msrb.mxu2 %v4700_v25  ;;  %v4699_v44 = vld [vmem:[%s6837_s2 + $0x108] sm:$0xff]  ;;  %3390 = vmatpush.bf16.msrb.mxu1 %v4691_v3  ;;  %v4698_v25 = vld [vmem:[%s6837_s2 + $0x100] sm:$0xff] }
 0x18b   : > { %v6572_v60 = vunpack.c.l.b16 %v2395_v62 }
 0x18c   : > { %v2331_v61 = vadd.f32 %v6343_v53, %v2319_v15  ;;  %v6495_v54 = vpack.c.b16 %v6476_v56, %v6474_v37  ;;  %v2610_v50 = vpack.c.b16 %v6483_v33, %v6448_v35 }
 0x18d   : > { %v2005_v29 = vpop.f32.mrf.mxu3  ;;  %3445 = vmatpush.bf16.msra.mxu3 %v4710_v48  ;;  %v4717_v48 = vld [vmem:[%s6837_s2 + $0x198] sm:$0xff] }
 0x18e   : > { %v2339_v6 = vmax.f32 %v2331_v61, 0.0  ;;  %v2006_v46 = vadd.f32 %v2005_v29, %v1977_v16  ;;  %3310 = vmatmul.bf16.gmra.mxu2 %v6495_v54 }
 0x18f   : > { %3419 = vmatpush.bf16.msrb.mxu2 %v4699_v44  ;;  %v4718_v44 = vld [vmem:[%s6837_s2 + $0x1a0] sm:$0xff] }
 0x190   : > { %2348 = vst [vmem:[#allocation3 + $0x51] sm:$0xff] %v2339_v6  ;;  %v2035_v27 = vadd.f32 %v6412_v39, %v2006_v46  ;;  %v2056_v52 = vpop.f32.mrf.mxu1  ;;  %v2381_v55 = vpack.c.bf16 %v2339_v6, %v2339_v6  ;;  %v2356_v39 = vld [vmem:[#allocation3 + $0x40] sm:$0xff] }
 0x191   : > { %v2087_v24 = vpop.f32.mrf.mxu2  ;;  %v6509_v36 = vadd.f32 %v2085_v7, %v2056_v52  ;;  %v2364_v47 = vpack.c.bf16 %v2356_v39, %v2356_v39 }
 0x192   : > { %v2320_v57 = vmul.f32 %v6338_v18, %v2035_v27  ;;  %2239 = vmatmul.bf16.gmra.mxu3 %v5849_v42  ;;  %v6515_v1 = vpop.f32.mrf.mxu0  ;;  %v6517_v9 = vunpack.c.l.b16 %v2381_v55  ;;  %v1980_v42 = vadd.f32 %v6347_v34, %v1951_v43  ;;  %v4719_v34 = vld [vmem:[%s6837_s2 + $0x1a8] sm:$0xff]  ;;  %v2394_v43 = vpack.c.bf16 %v2386_v20, %v2386_v20 }
 0x193   : > { %2287 = vmatmul.bf16.gmra.mxu1 %v5853_v8  ;;  %v2368_v8 = vld [vmem:[#allocation3 + $0x1] sm:$0xff]  ;;  %3473 = vmatpush.bf16.msra.mxu0 %v4719_v34  ;;  %v6549_v6 = vunpack.c.l.b16 %v2364_v47 }
 0x194   : > { %v2332_v49 = vadd.f32 %v6343_v53, %v2320_v57  ;;  %v2539_v45 = vpack.c.b16 %v6517_v9, %v6483_v33  ;;  %v2376_v58 = vpack.c.bf16 %v2368_v8, %v2368_v8  ;;  %3420 = vmatpush.bf16.msrb.mxu2 %v4698_v25  ;;  %v6578_v47 = vunpack.c.l.b16 %v2394_v43 }
 0x195   : > { %v2008_v26 = vpop.f32.mrf.mxu3  ;;  %3363 = vmatmul.bf16.vlgmr.msrb.gmra.mxu0 %v2561_v28 }
 0x196   : > { %v2340_v7 = vmax.f32 %v2332_v49, 0.0  ;;  %v2009_v0 = vadd.f32 %v2008_v26, %v1980_v42 }
 0x197   : > { %v2357_v21 = vld [vmem:[#allocation3 + $0x50] sm:$0xff]  ;;  %3474 = vmatpush.bf16.msra.mxu0 %v4718_v44 }
 0x198   : > { %2349 = vst [vmem:[#allocation3 + $0x61] sm:$0xff] %v2340_v7  ;;  %v2038_v12 = vadd.f32 %v6446_v13, %v2009_v0  ;;  %v2058_v4 = vpop.f32.mrf.mxu1  ;;  %v2365_v15 = vpack.c.bf16 %v2357_v21, %v2357_v21  ;;  %v2382_v61 = vpack.c.bf16 %v2340_v7, %v2340_v7  ;;  %v1953_v13 = vadd.f32 %v6394_v38, %v6323_v5 }
 0x199   : > { %v2090_v17 = vpop.f32.mrf.mxu2  ;;  %v6544_v16 = vadd.f32 %v2087_v24, %v2058_v4  ;;  %v2529_v38 = vunpack.c.l.b16 %v2376_v58  ;;  %v4709_v4 = vld [vmem:[%s6837_s2 + $0x158] sm:$0xff] }
 0x19a   : > { %v2321_v29 = vmul.f32 %v6338_v18, %v2038_v12  ;;  %v6551_v46 = vunpack.c.l.b16 %v2365_v15  ;;  %v6553_v30 = vpop.f32.mrf.mxu0  ;;  %v6555_v27 = vunpack.c.l.b16 %v2382_v61  ;;  %v1982_v52 = vadd.f32 %v6367_v31, %v1953_v13  ;;  %v4690_v31 = vld [vmem:[%s6837_s2 + $0xc0] sm:$0xff]  ;;  %3446 = vmatpush.bf16.msra.mxu3 %v4709_v4 }
 0x19b   : > { %v2537_v26 = vpack.c.b16 %v6417_v59, %v2529_v38  ;;  %3391 = vmatpush.bf16.msrb.mxu1 %v4690_v31  ;;  %v6588_v12 = vpack.c.b16 %v6572_v60, %v6578_v47  ;;  %3475 = vmatpush.bf16.msra.mxu0 %v4717_v48  ;;  %v6624_v38 = vld [vmem:[%s6837_s2 + $0x230] sm:$0xff]  ;;  %v2585_v59 = vpack.c.b16 %v6474_v37, %v6410_v41  ;;  %v4733_v41 = vld [vmem:[%s6837_s2 + $0x218] sm:$0xff] }
 0x19c   : > { %v2333_v24 = vadd.f32 %v6343_v53, %v2321_v29  ;;  %v6561_v5 = vpack.c.b16 %v6551_v46, %v6549_v6  ;;  %v2611_v57 = vpack.c.b16 %v6555_v27, %v6517_v9 }
 0x19d   : > { %v2010_v55 = vpop.f32.mrf.mxu3 }
 0x19e   : > { %v2341_v39 = vmax.f32 %v2333_v24, 0.0  ;;  %v2011_v28 = vadd.f32 %v2010_v55, %v1982_v52  ;;  %3315 = vmatmul.bf16.gmra.mxu2 %v6561_v5  ;;  %v4708_v24 = vld [vmem:[%s6837_s2 + $0x150] sm:$0xff] }
 0x19f   : > { %3447 = vmatpush.bf16.msra.mxu3 %v4708_v24 }
 0x1a0   : > { %2350 = vst [vmem:[#allocation3 + $0x71] sm:$0xff] %v2341_v39  ;;  %v2040_v42 = vadd.f32 %v6478_v11, %v2011_v28  ;;  %v2061_v49 = vpop.f32.mrf.mxu1  ;;  %v2383_v7 = vpack.c.bf16 %v2341_v39, %v2341_v39  ;;  %v2358_v11 = vld [vmem:[#allocation3 + $0x60] sm:$0xff] }
 0x1a1   : > { %v2092_v8 = vpop.f32.mrf.mxu2  ;;  %v6576_v0 = vadd.f32 %v2090_v17, %v2061_v49  ;;  %v2366_v25 = vpack.c.bf16 %v2358_v11, %v2358_v11  ;;  %v2388_v28 = vld [vmem:[#allocation3 + $0x42] sm:$0xff]  ;;  %v6647_v11 = vld [vmem:[%s6837_s2 + $0x1f0] sm:$0xff] }
 0x1a2   : > { %v2322_v3 = vmul.f32 %v6338_v18, %v2040_v42  ;;  %3334 = vmatmul.bf16.vlgmr.msrb.gmra.mxu3 %v2537_v26  ;;  %v6581_v34 = vpop.f32.mrf.mxu0  ;;  %v6583_v21 = vunpack.c.l.b16 %v2383_v7  ;;  %v6596_v18 = vld [vmem:[%s6837_s2 + $0x238] sm:$0xff]  ;;  %v2396_v26 = vpack.c.bf16 %v2388_v28, %v2388_v28 }
 0x1a3   : > { %2292 = vmatmul.bf16.gmra.mxu1 %v5917_v14  ;;  %3529 = vmatpush.bf16.msra.mxu2 %v6596_v18  ;;  %v6626_v43 = vunpack.c.l.b16 %v2366_v25 }
 0x1a4   : > { %v2334_v15 = vadd.f32 %v6343_v53, %v2322_v3  ;;  %v2540_v58 = vpack.c.b16 %v6583_v21, %v6555_v27  ;;  %v6610_v53 = vld [vmem:[%s6837_s2 + $0x1f8] sm:$0xff]  ;;  %v4716_v3 = vld [vmem:[%s6837_s2 + $0x190] sm:$0xff] }
 0x1a5   : > { %v2109_v14 = vpop.f32.mrf.mxu3  ;;  %3368 = vmatmul.bf16.gmra.mxu0 %v6588_v12  ;;  %4746 = vmatpush.bf16.msra.mxu1 %v6610_v53 }
 0x1a6   : > { %v2342_v17 = vmax.f32 %v2334_v15, 0.0  ;;  %v2110_v40 = vadd.f32 %v2109_v14, %v6440_v22  ;;  %v2389_v22 = vld [vmem:[#allocation3 + $0x52] sm:$0xff]  ;;  %3476 = vmatpush.bf16.msra.mxu0 %v4716_v3 }
 0x1a7   : > { %v2359_v61 = vld [vmem:[#allocation3 + $0x70] sm:$0xff]  ;;  %v2397_v31 = vpack.c.bf16 %v2389_v22, %v2389_v22  ;;  %3530 = vmatpush.bf16.msra.mxu2 %v6624_v38 }
 0x1a8   : > { %2351 = vst [vmem:[#allocation3 + $0x81] sm:$0xff] %v2342_v17  ;;  %v2063_v13 = vpop.f32.mrf.mxu1  ;;  %v2367_v29 = vpack.c.bf16 %v2359_v61, %v2359_v61  ;;  %v6613_v62 = vadd.f32 %v6515_v1, %v2110_v40  ;;  %v2431_v55 = vpack.c.bf16 %v2342_v17, %v2342_v17  ;;  %v6657_v40 = vunpack.c.l.b16 %v2396_v26  ;;  %v4735_v61 = vld [vmem:[%s6837_s2 + $0x228] sm:$0xff] }
 0x1a9   : > { %v2095_v20 = vpop.f32.mrf.mxu2  ;;  %v6616_v52 = vadd.f32 %v2092_v8, %v2063_v13  ;;  %v6649_v4 = vunpack.c.l.b16 %v2397_v31  ;;  %4747 = vmatpush.bf16.msra.mxu1 %v6647_v11  ;;  %v4734_v31 = vld [vmem:[%s6837_s2 + $0x220] sm:$0xff] }
 0x1aa   : > { %v6628_v1 = vunpack.c.l.b16 %v2367_v29  ;;  %v2145_v39 = vpop.f32.mrf.mxu0  ;;  %v6631_v44 = vunpack.c.l.b16 %v2431_v55  ;;  %v4727_v29 = vld [vmem:[%s6837_s2 + $0x1e8] sm:$0xff]  ;;  %v2391_v55 = vld [vmem:[#allocation3 + $0x72] sm:$0xff] }
 0x1ab   : > { %v6665_v48 = vpack.c.b16 %v6649_v4, %v6657_v40  ;;  %3531 = vmatpush.bf16.msra.mxu2 %v4735_v61  ;;  %v2390_v26 = vld [vmem:[#allocation3 + $0x62] sm:$0xff] }
 0x1ac   : > { %v6635_v42 = vpack.c.b16 %v6628_v1, %v6626_v43  ;;  %v2612_v8 = vpack.c.b16 %v6631_v44, %v6583_v21  ;;  %v2398_v3 = vpack.c.bf16 %v2390_v26, %v2390_v26  ;;  %v2468_v21 = vld [vmem:[#allocation3 + $0x51] sm:$0xff] }
 0x1ad   : > { %v2111_v49 = vpop.f32.mrf.mxu3  ;;  %4748 = vmatpush.bf16.msra.mxu1 %v4727_v29 }
 0x1ae   : > { %v2112_v7 = vadd.f32 %v2111_v49, %v6468_v51  ;;  %3320 = vmatmul.bf16.gmra.mxu2 %v6635_v42  ;;  %v6708_v32 = vunpack.c.l.b16 %v2398_v3 }
 0x1af   : > { %3532 = vmatpush.bf16.msra.mxu2 %v4734_v31 }
 0x1b0   : > { %v2066_v15 = vpop.f32.mrf.mxu1  ;;  %v6652_v17 = vadd.f32 %v6553_v30, %v2112_v7  ;;  %v4707_v30 = vld [vmem:[%s6837_s2 + $0x148] sm:$0xff]  ;;  %v2399_v7 = vpack.c.bf16 %v2391_v55, %v2391_v55 }
 0x1b1   : > { %v2097_v14 = vpop.f32.mrf.mxu2  ;;  %v6655_v51 = vadd.f32 %v2095_v20, %v2066_v15  ;;  %3448 = vmatpush.bf16.msra.mxu3 %v4707_v30  ;;  %v4726_v30 = vld [vmem:[%s6837_s2 + $0x1e0] sm:$0xff] }
 0x1b2   : > { %3339 = vmatmul.bf16.gmra.mxu3 %v2538_v10  ;;  %v2148_v25 = vpop.f32.mrf.mxu0  ;;  %4749 = vmatpush.bf16.msra.mxu1 %v4726_v30 }
 0x1b3   : > { %2297 = vmatmul.bf16.gmra.mxu1 %v5976_v23  ;;  %v4715_v23 = vld [vmem:[%s6837_s2 + $0x188] sm:$0xff]  ;;  %3533 = vmatpush.bf16.msra.mxu2 %v4733_v41 }
 0x1b4   : > { %3477 = vmatpush.bf16.msra.mxu0 %v4715_v23 }
 0x1b5   : > { %v2114_v13 = vpop.f32.mrf.mxu3  ;;  %3373 = vmatmul.bf16.gmra.mxu0 %v6665_v48 }
 0x1b6   : > { %v2115_v10 = vadd.f32 %v2114_v13, %v6509_v36  ;;  %v4706_v36 = vld [vmem:[%s6837_s2 + $0x140] sm:$0xff]  ;;  %v6703_v13 = vunpack.c.l.b16 %v2399_v7 }
 0x1b7   : > { %3449 = vmatpush.bf16.msra.mxu3 %v4706_v36  ;;  %v4732_v36 = vld [vmem:[%s6837_s2 + $0x210] sm:$0xff] }
 0x1b8   : > { %v2068_v20 = vpop.f32.mrf.mxu1  ;;  %v6682_v24 = vadd.f32 %v6581_v34, %v2115_v10  ;;  %3534 = vmatpush.bf16.msra.mxu2 %v4732_v36 }
 0x1b9   : > { %v2196_v22 = vpop.f32.mrf.mxu2  ;;  %v6684_v28 = vadd.f32 %v2097_v14, %v2068_v20  ;;  %v4714_v14 = vld [vmem:[%s6837_s2 + $0x180] sm:$0xff] }
 0x1ba   : > { %v2150_v49 = vpop.f32.mrf.mxu0  ;;  %3478 = vmatpush.bf16.msra.mxu0 %v4714_v14 }
 0x1bb   : > { %4754 = vmatpush.bf16.msrb.mxu3 %v6596_v18 }
 0x1bd   : > { %v2116_v34 = vpop.f32.mrf.mxu3 }
 0x1be   : > { %v2117_v15 = vadd.f32 %v2116_v34, %v6544_v16  ;;  %3421 = vmatmul.bf16.vlgmr.msrb.gmra.mxu2 %v2609_v19  ;;  %3500 = vmatpush.bf16.msrb.mxu0 %v6610_v53  ;;  %v2586_v34 = vpack.c.b16 %v6549_v6, %v6476_v56  ;;  %v4723_v6 = vld [vmem:[%s6837_s2 + $0x1c8] sm:$0xff] }
 0x1bf   : > { %4755 = vmatpush.bf16.msrb.mxu3 %v6624_v38 }
 0x1c0   : > { %v2167_v10 = vpop.f32.mrf.mxu1  ;;  %v2146_v23 = vadd.f32 %v2145_v39, %v2117_v15  ;;  %v4730_v15 = vld [vmem:[%s6837_s2 + $0x200] sm:$0xff] }
 0x1c1   : > { %v2198_v18 = vpop.f32.mrf.mxu2  ;;  %v2168_v16 = vadd.f32 %v2167_v10, %v6613_v62  ;;  %v6719_v62 = vpack.c.b16 %v6703_v13, %v6708_v32  ;;  %v4722_v10 = vld [vmem:[%s6837_s2 + $0x1c0] sm:$0xff] }
 0x1c2   : > { %3344 = vmatmul.bf16.gmra.mxu3 %v2539_v45  ;;  %v2153_v19 = vpop.f32.mrf.mxu0  ;;  %v4725_v45 = vld [vmem:[%s6837_s2 + $0x1d8] sm:$0xff]  ;;  %3501 = vmatpush.bf16.msrb.mxu0 %v6647_v11 }
 0x1c3   : > { %3392 = vmatmul.bf16.vlgmr.msrb.gmra.mxu1 %v2585_v59  ;;  %v6715_v39 = vadd.f32 %v2196_v22, %v2168_v16  ;;  %4756 = vmatpush.bf16.msrb.mxu3 %v4735_v61 }
 0x1c4   : > { %4750 = vmatpush.bf16.msra.mxu1 %v4725_v45 }
 0x1c5   : > { %v2119_v37 = vpop.f32.mrf.mxu3  ;;  %3378 = vmatmul.bf16.gmra.mxu0 %v6719_v62 }
 0x1c6   : > { %v2120_v53 = vadd.f32 %v2119_v37, %v6576_v0  ;;  %3502 = vmatpush.bf16.msrb.mxu0 %v4727_v29  ;;  %v2407_v37 = vld [vmem:[#allocation3 + $0x80] sm:$0xff] }
 0x1c7   : > { %4757 = vmatpush.bf16.msrb.mxu3 %v4734_v31 }
 0x1c8   : > { %v2169_v38 = vpop.f32.mrf.mxu1  ;;  %v2149_v22 = vadd.f32 %v2148_v25, %v2120_v53 }
 0x1c9   : > { %v2201_v20 = vpop.f32.mrf.mxu2  ;;  %v2170_v55 = vadd.f32 %v2169_v38, %v6652_v17  ;;  %v4724_v17 = vld [vmem:[%s6837_s2 + $0x1d0] sm:$0xff] }
 0x1ca   : > { %v2155_v26 = vpop.f32.mrf.mxu0  ;;  %3503 = vmatpush.bf16.msrb.mxu0 %v4726_v30  ;;  %4751 = vmatpush.bf16.msra.mxu1 %v4724_v17 }
 0x1cb   : > { %v6734_v0 = vadd.f32 %v2198_v18, %v2170_v55  ;;  %4758 = vmatpush.bf16.msrb.mxu3 %v4733_v41 }
 0x1cd   : > { %v2121_v7 = vpop.f32.mrf.mxu3 }
 0x1ce   : > { %v2122_v11 = vadd.f32 %v2121_v7, %v6616_v52  ;;  %3426 = vmatmul.bf16.gmra.mxu2 %v2610_v50  ;;  %3504 = vmatpush.bf16.msrb.mxu0 %v4725_v45  ;;  %v4731_v50 = vld [vmem:[%s6837_s2 + $0x208] sm:$0xff]  ;;  %v2415_v45 = vpack.c.bf16 %v2407_v37, %v2407_v37 }
 0x1cf   : > { %4759 = vmatpush.bf16.msrb.mxu3 %v4732_v36  ;;  %3535 = vmatpush.bf16.msra.mxu2 %v4731_v50 }
 0x1d0   : > { %v2172_v25 = vpop.f32.mrf.mxu1  ;;  %v2151_v29 = vadd.f32 %v2150_v49, %v2122_v11  ;;  %4752 = vmatpush.bf16.msra.mxu1 %v4723_v6 }
 0x1d1   : > { %v2203_v61 = vpop.f32.mrf.mxu2  ;;  %v2173_v31 = vadd.f32 %v2172_v25, %v6682_v24 }
 0x1d2   : > { %3349 = vmatmul.bf16.gmra.mxu3 %v2540_v58  ;;  %v2254_v35 = vpop.f32.mrf.mxu0  ;;  %3505 = vmatpush.bf16.msrb.mxu0 %v4724_v17 }
 0x1d3   : > { %3397 = vmatmul.bf16.gmra.mxu1 %v2586_v34  ;;  %v6749_v33 = vadd.f32 %v2201_v20, %v2173_v31  ;;  %4760 = vmatpush.bf16.msrb.mxu3 %v4731_v50 }
 0x1d4   : > { %3536 = vmatpush.bf16.msra.mxu2 %v4730_v15  ;;  %4753 = vmatpush.bf16.msra.mxu1 %v4722_v10 }
 0x1d5   : > { %v2124_v52 = vpop.f32.mrf.mxu3  ;;  %3479 = vmatmul.bf16.vlgmr.msra.gmra.mxu0 %v6495_v54 }
 0x1d6   : > { %v2125_v56 = vadd.f32 %v2124_v52, %v6655_v51  ;;  %3506 = vmatpush.bf16.msrb.mxu0 %v4723_v6 }
 0x1d7   : > { %4761 = vmatpush.bf16.msrb.mxu3 %v4730_v15 }
 0x1d8   : > { %v2174_v58 = vpop.f32.mrf.mxu1  ;;  %v2154_v24 = vadd.f32 %v2153_v19, %v2125_v56  ;;  %v2587_v19 = vpack.c.b16 %v6626_v43, %v6551_v46  ;;  %v2584_v46 = vunpack.c.l.b16 %v2415_v45 }
 0x1d9   : > { %v2175_v49 = vadd.f32 %v2174_v58, %v2146_v23  ;;  %v2206_v3 = vpop.f32.mrf.mxu2  ;;  %v2633_v23 = vpack.c.b16 %v6578_v47, %v6506_v2 }
 0x1da   : > { %v2256_v14 = vpop.f32.mrf.mxu0  ;;  %3507 = vmatpush.bf16.msrb.mxu0 %v4722_v10  ;;  %v2588_v7 = vpack.c.b16 %v2584_v46, %v6628_v1 }
 0x1db   : > { %v2204_v54 = vadd.f32 %v2203_v61, %v2175_v49  ;;  %v2467_v61 = vld [vmem:[#allocation3 + $0x41] sm:$0xff] }
 0x1dc   : > { %v2475_v1 = vpack.c.bf16 %v2467_v61, %v2467_v61 }
 0x1dd   : > { %v2126_v51 = vpop.f32.mrf.mxu3 }
 0x1de   : > { %v2127_v30 = vadd.f32 %v2126_v51, %v6684_v28  ;;  %3431 = vmatmul.bf16.gmra.mxu2 %v2611_v57  ;;  %v2675_v56 = vunpack.c.l.b16 %v2475_v1 }
 0x1e0   : > { %v2177_v18 = vpop.f32.mrf.mxu1  ;;  %v2156_v16 = vadd.f32 %v2155_v26, %v2127_v30  ;;  %v2470_v30 = vld [vmem:[#allocation3 + $0x71] sm:$0xff] }
 0x1e1   : > { %v2178_v59 = vadd.f32 %v2177_v18, %v2149_v22  ;;  %v2208_v27 = vpop.f32.mrf.mxu2 }
 0x1e2   : > { %3450 = vmatmul.bf16.vlgmr.msra.gmra.mxu3 %v2633_v23  ;;  %v2259_v28 = vpop.f32.mrf.mxu0  ;;  %v2469_v23 = vld [vmem:[#allocation3 + $0x61] sm:$0xff] }
 0x1e3   : > { %3402 = vmatmul.bf16.gmra.mxu1 %v2587_v19  ;;  %v2207_v9 = vadd.f32 %v2206_v3, %v2178_v59  ;;  %v2478_v19 = vpack.c.bf16 %v2470_v30, %v2470_v30 }
 0x1e5   : > { %v2225_v57 = vpop.f32.mrf.mxu3  ;;  %3484 = vmatmul.bf16.gmra.mxu0 %v6561_v5 }
 0x1e6   : > { %v2226_v41 = vadd.f32 %v2225_v57, %v6715_v39  ;;  %v2634_v39 = vpack.c.b16 %v6657_v40, %v6572_v60  ;;  %v2476_v40 = vpack.c.bf16 %v2468_v21, %v2468_v21  ;;  %v2472_v21 = vld [vmem:[#allocation3 + $0x91] sm:$0xff] }
 0x1e8   : > { %v2179_v53 = vpop.f32.mrf.mxu1  ;;  %v2255_v2 = vadd.f32 %v2254_v35, %v2226_v41  ;;  %v2676_v50 = vunpack.c.l.b16 %v2476_v40  ;;  %v2477_v41 = vpack.c.bf16 %v2469_v23, %v2469_v23  ;;  %v2480_v40 = vpack.c.bf16 %v2472_v21, %v2472_v21 }
 0x1e9   : > { %v2180_v47 = vadd.f32 %v2179_v53, %v2151_v29  ;;  %v2211_v43 = vpop.f32.mrf.mxu2 }
 0x1ea   : > { %v2261_v38 = vpop.f32.mrf.mxu0  ;;  %v2677_v45 = vunpack.c.l.b16 %v2477_v41 }
 0x1eb   : > { %v6775_v20 = vadd.f32 %v2208_v27, %v2180_v47  ;;  %v2465_v27 = vld [vmem:[#allocation3 + $0x21] sm:$0xff] }
 0x1ec   : > { %v2473_v47 = vpack.c.bf16 %v2465_v27, %v2465_v27 }
 0x1ed   : > { %v2227_v22 = vpop.f32.mrf.mxu3 }
 0x1ee   : > { %v2228_v55 = vadd.f32 %v2227_v22, %v6734_v0  ;;  %3436 = vmatmul.bf16.gmra.mxu2 %v2612_v8 }
 0x1f0   : > { %v2182_v5 = vpop.f32.mrf.mxu1  ;;  %v2257_v36 = vadd.f32 %v2256_v14, %v2228_v55  ;;  %v2660_v14 = vpack.c.b16 %v6396_v63, %v2584_v46 }
 0x1f1   : > { %v2183_v26 = vadd.f32 %v2182_v5, %v2154_v24  ;;  %v2213_v44 = vpop.f32.mrf.mxu2  ;;  %v2682_v24 = vpack.c.b16 %v2676_v50, %v2675_v56  ;;  %v2680_v56 = vunpack.c.l.b16 %v2480_v40 }
 0x1f2   : > { %3455 = vmatmul.bf16.gmra.mxu3 %v2634_v39  ;;  %v2264_v11 = vpop.f32.mrf.mxu0 }
 0x1f3   : > { %3407 = vmatmul.bf16.gmra.mxu1 %v2588_v7  ;;  %v6784_v17 = vadd.f32 %v2211_v43, %v2183_v26 }
 0x1f5   : > { %v2230_v25 = vpop.f32.mrf.mxu3  ;;  %3489 = vmatmul.bf16.gmra.mxu0 %v6635_v42 }
 0x1f6   : > { %v2231_v0 = vadd.f32 %v2230_v25, %v6749_v33  ;;  %v2635_v33 = vpack.c.b16 %v6708_v32, %v6649_v4  ;;  %v2466_v32 = vld [vmem:[#allocation3 + $0x31] sm:$0xff] }
 0x1f7   : > { %v2474_v37 = vpack.c.bf16 %v2466_v32, %v2466_v32 }
 0x1f8   : > { %v2184_v8 = vpop.f32.mrf.mxu1  ;;  %v2260_v29 = vadd.f32 %v2259_v28, %v2231_v0  ;;  %v2471_v0 = vld [vmem:[#allocation3 + $0x81] sm:$0xff] }
 0x1f9   : > { %v2185_v60 = vadd.f32 %v2184_v8, %v2156_v16 }
 0x1fa   : > { %v2266_v31 = vpop.f32.mrf.mxu0 }
 0x1fb   : > { %v6788_v34 = vadd.f32 %v2213_v44, %v2185_v60  ;;  %v2479_v60 = vpack.c.bf16 %v2471_v0, %v2471_v0 }
 0x1fd   : > { %v2232_v35 = vpop.f32.mrf.mxu3 }
 0x1fe   : > { %v2233_v52 = vadd.f32 %v2232_v35, %v2204_v54  ;;  %3537 = vmatmul.bf16.vlgmr.msra.gmra.mxu2 %v6588_v12  ;;  %v2439_v54 = vld [vmem:[#allocation3 + $0x82] sm:$0xff] }
 0x1ff   : > { %v2447_v18 = vpack.c.bf16 %v2439_v54, %v2439_v54 }
 0x200   : > { %v2283_v42 = vpop.f32.mrf.mxu1  ;;  %v2262_v6 = vadd.f32 %v2261_v38, %v2233_v52  ;;  %v2674_v38 = vunpack.c.l.b16 %v2474_v37  ;;  %v2679_v52 = vunpack.c.l.b16 %v2479_v60 }
 0x201   : > { %v2284_v58 = vadd.f32 %v2283_v42, %v2255_v2  ;;  %v3306_v49 = vpop.f32.mrf.mxu2  ;;  %v2632_v63 = vunpack.c.l.b16 %v2447_v18  ;;  %v2678_v2 = vunpack.c.l.b16 %v2478_v19 }
 0x202   : > { %3460 = vmatmul.bf16.gmra.mxu3 %v2635_v33  ;;  %v2269_v3 = vpop.f32.mrf.mxu0 }
 0x203   : > { %3513 = vmatmul.bf16.vlgmr.msra.gmra.mxu1 %v2682_v24  ;;  %v6793_v15 = vadd.f32 %v3306_v49, %v2284_v58  ;;  %v2636_v46 = vpack.c.b16 %v2632_v63, %v6703_v13  ;;  %v2683_v5 = vpack.c.b16 %v2678_v2, %v2677_v45  ;;  %v2684_v49 = vpack.c.b16 %v2680_v56, %v2679_v52 }
 0x205   : > { %v2235_v51 = vpop.f32.mrf.mxu3  ;;  %3494 = vmatmul.bf16.gmra.mxu0 %v2660_v14 }
 0x206   : > { %v2236_v12 = vadd.f32 %v2235_v51, %v2207_v9 }
 0x208   : > { %v2285_v10 = vpop.f32.mrf.mxu1  ;;  %v2265_v4 = vadd.f32 %v2264_v11, %v2236_v12 }
 0x209   : > { %v2286_v16 = vadd.f32 %v2285_v10, %v2257_v36  ;;  %v3308_v59 = vpop.f32.mrf.mxu2  ;;  %v2673_v36 = vunpack.c.l.b16 %v2473_v47 }
 0x20a   : > { %v2271_v28 = vpop.f32.mrf.mxu0 }
 0x20b   : > { %v6796_v57 = vadd.f32 %v3308_v59, %v2286_v16  ;;  %v2681_v11 = vpack.c.b16 %v2674_v38, %v2673_v36 }
 0x20d   : > { %v2237_v53 = vpop.f32.mrf.mxu3 }
 0x20e   : > { %v2238_v9 = vadd.f32 %v2237_v53, %v6775_v20  ;;  %3542 = vmatmul.bf16.gmra.mxu2 %v6665_v48  ;;  %v2488_v20 = vld [vmem:[#allocation3 + $0x92] sm:$0xff] }
 0x20f   : > { %v2496_v8 = vpack.c.bf16 %v2488_v20, %v2488_v20 }
 0x210   : > { %v2288_v22 = vpop.f32.mrf.mxu1  ;;  %v2267_v43 = vadd.f32 %v2266_v31, %v2238_v9 }
 0x211   : > { %v2289_v55 = vadd.f32 %v2288_v22, %v2260_v29  ;;  %v3311_v39 = vpop.f32.mrf.mxu2  ;;  %v2704_v35 = vunpack.c.l.b16 %v2496_v8 }
 0x212   : > { %3465 = vmatmul.bf16.gmra.mxu3 %v2636_v46  ;;  %v3364_v26 = vpop.f32.mrf.mxu0 }
 0x213   : > { %3518 = vmatmul.bf16.gmra.mxu1 %v2683_v5  ;;  %v3312_v7 = vadd.f32 %v3311_v39, %v2289_v55  ;;  %v2708_v33 = vpack.c.b16 %v2704_v35, %v2632_v63 }
 0x215   : > { %v2240_v25 = vpop.f32.mrf.mxu3  ;;  %3508 = vmatmul.bf16.vlgmr.msrb.gmra.mxu0 %v2681_v11 }
 0x216   : > { %v2241_v48 = vadd.f32 %v2240_v25, %v6784_v17 }
 0x218   : > { %v2290_v44 = vpop.f32.mrf.mxu1  ;;  %v2270_v13 = vadd.f32 %v2269_v3, %v2241_v48 }
 0x219   : > { %v2291_v61 = vadd.f32 %v2290_v44, %v2262_v6  ;;  %v3313_v29 = vpop.f32.mrf.mxu2 }
 0x21a   : > { %v3366_v31 = vpop.f32.mrf.mxu0 }
 0x21b   : > { %v3314_v1 = vadd.f32 %v3313_v29, %v2291_v61 }
 0x21d   : > { %v2242_v50 = vpop.f32.mrf.mxu3 }
 0x21e   : > { %v2243_v42 = vadd.f32 %v2242_v50, %v6788_v34  ;;  %3547 = vmatmul.bf16.gmra.mxu2 %v6719_v62 }
 0x220   : > { %v2293_v17 = vpop.f32.mrf.mxu1  ;;  %v2272_v58 = vadd.f32 %v2271_v28, %v2243_v42 }
 0x221   : > { %v2294_v24 = vadd.f32 %v2293_v17, %v2265_v4  ;;  %v3316_v3 = vpop.f32.mrf.mxu2 }
 0x222   : > { %3552 = vmatmul.bf16.vlgmr.msrb.gmra.mxu3 %v2708_v33  ;;  %v3369_v6 = vpop.f32.mrf.mxu0 }
 0x223   : > { %3523 = vmatmul.bf16.gmra.mxu1 %v2684_v49  ;;  %v3317_v14 = vadd.f32 %v3316_v3, %v2294_v24 }
 0x225   : > { %v3335_v51 = vpop.f32.mrf.mxu3 }
 0x226   : > { %v3336_v54 = vadd.f32 %v3335_v51, %v6793_v15 }
 0x228   : > { %v2295_v12 = vpop.f32.mrf.mxu1  ;;  %v3365_v30 = vadd.f32 %v3364_v26, %v3336_v54 }
 0x229   : > { %v2296_v10 = vadd.f32 %v2295_v12, %v2267_v43  ;;  %v3318_v18 = vpop.f32.mrf.mxu2 }
 0x22a   : > { %v3371_v34 = vpop.f32.mrf.mxu0 }
 0x22b   : > { %v3319_v23 = vadd.f32 %v3318_v18, %v2296_v10 }
 0x22d   : > { %v3337_v62 = vpop.f32.mrf.mxu3 }
 0x22e   : > { %v3338_v32 = vadd.f32 %v3337_v62, %v6796_v57 }
 0x230   : > { %v2298_v16 = vpop.f32.mrf.mxu1  ;;  %v3367_v4 = vadd.f32 %v3366_v31, %v3338_v32 }
 0x231   : > { %v2299_v59 = vadd.f32 %v2298_v16, %v2270_v13  ;;  %v3321_v19 = vpop.f32.mrf.mxu2 }
 0x232   : > { %v3374_v28 = vpop.f32.mrf.mxu0 }
 0x233   : > { %v3322_v27 = vadd.f32 %v3321_v19, %v2299_v59 }
 0x235   : > { %v3340_v41 = vpop.f32.mrf.mxu3 }
 0x236   : > { %v3341_v37 = vadd.f32 %v3340_v41, %v3312_v7 }
 0x238   : > { %v2300_v63 = vpop.f32.mrf.mxu1  ;;  %v3370_v53 = vadd.f32 %v3369_v6, %v3341_v37 }
 0x239   : > { %v2301_v15 = vadd.f32 %v2300_v63, %v2272_v58  ;;  %v3323_v2 = vpop.f32.mrf.mxu2 }
 0x23a   : > { %v3376_v47 = vpop.f32.mrf.mxu0 }
 0x23b   : > { %v3324_v9 = vadd.f32 %v3323_v2, %v2301_v15 }
 0x23d   : > { %v3342_v45 = vpop.f32.mrf.mxu3 }
 0x23e   : > { %v3343_v38 = vadd.f32 %v3342_v45, %v3314_v1 }
 0x240   : > { %v3393_v22 = vpop.f32.mrf.mxu1  ;;  %v3372_v46 = vadd.f32 %v3371_v34, %v3343_v38 }
 0x241   : > { %v3394_v43 = vadd.f32 %v3393_v22, %v3365_v30  ;;  %v3422_v57 = vpop.f32.mrf.mxu2 }
 0x242   : > { %v3379_v55 = vpop.f32.mrf.mxu0 }
 0x243   : > { %v3423_v5 = vadd.f32 %v3422_v57, %v3394_v43 }
 0x245   : > { %v3345_v39 = vpop.f32.mrf.mxu3 }
 0x246   : > { %v3346_v36 = vadd.f32 %v3345_v39, %v3317_v14 }
 0x248   : > { %v3395_v26 = vpop.f32.mrf.mxu1  ;;  %v6806_v11 = vadd.f32 %v3374_v28, %v3346_v36 }
 0x249   : > { %v3396_v7 = vadd.f32 %v3395_v26, %v3367_v4  ;;  %v3424_v25 = vpop.f32.mrf.mxu2 }
 0x24a   : > { %v3381_v20 = vpop.f32.mrf.mxu0 }
 0x24b   : > { %v3425_v48 = vadd.f32 %v3424_v25, %v3396_v7 }
 0x24d   : > { %v3347_v0 = vpop.f32.mrf.mxu3 }
 0x24e   : > { %v3348_v21 = vadd.f32 %v3347_v0, %v3319_v23 }
 0x250   : > { %v3398_v44 = vpop.f32.mrf.mxu1  ;;  %v6808_v8 = vadd.f32 %v3376_v47, %v3348_v21 }
 0x251   : > { %v3427_v13 = vpop.f32.mrf.mxu2  ;;  %v3399_v4 = vadd.f32 %v3398_v44, %v3370_v53 }
 0x252   : > { %v3480_v61 = vpop.f32.mrf.mxu0 }
 0x253   : > { %v3428_v59 = vadd.f32 %v3427_v13, %v3399_v4 }
 0x255   : > { %v3350_v29 = vpop.f32.mrf.mxu3 }
 0x256   : > { %v3351_v60 = vadd.f32 %v3350_v29, %v3322_v27 }
 0x258   : > { %v3400_v40 = vpop.f32.mrf.mxu1  ;;  %v3380_v31 = vadd.f32 %v3379_v55, %v3351_v60 }
 0x259   : > { %v3429_v1 = vpop.f32.mrf.mxu2  ;;  %v3401_v15 = vadd.f32 %v3400_v40, %v3372_v46 }
 0x25a   : > { %v3482_v35 = vpop.f32.mrf.mxu0 }
 0x25b   : > { %v3430_v47 = vadd.f32 %v3429_v1, %v3401_v15 }
 0x25d   : > { %v3352_v50 = vpop.f32.mrf.mxu3 }
 0x25e   : > { %v3353_v52 = vadd.f32 %v3352_v50, %v3324_v9 }
 0x260   : > { %v3403_v56 = vpop.f32.mrf.mxu1  ;;  %v6810_v42 = vadd.f32 %v3381_v20, %v3353_v52 }
 0x261   : > { %v3432_v17 = vpop.f32.mrf.mxu2  ;;  %v3404_v36 = vadd.f32 %v3403_v56, %v6806_v11 }
 0x262   : > { %v3485_v33 = vpop.f32.mrf.mxu0 }
 0x263   : > { %v3433_v7 = vadd.f32 %v3432_v17, %v3404_v36 }
 0x265   : > { %v3451_v58 = vpop.f32.mrf.mxu3 }
 0x266   : > { %v3452_v37 = vadd.f32 %v3451_v58, %v3423_v5 }
 0x268   : > { %v3405_v24 = vpop.f32.mrf.mxu1  ;;  %v3481_v38 = vadd.f32 %v3480_v61, %v3452_v37 }
 0x269   : > { %v3434_v49 = vpop.f32.mrf.mxu2  ;;  %v3406_v11 = vadd.f32 %v3405_v24, %v6808_v8 }
 0x26a   : > { %v3487_v3 = vpop.f32.mrf.mxu0 }
 0x26b   : > { %v3435_v56 = vadd.f32 %v3434_v49, %v3406_v11 }
 0x26d   : > { %v3453_v6 = vpop.f32.mrf.mxu3 }
 0x26e   : > { %v3454_v46 = vadd.f32 %v3453_v6, %v3425_v48 }
 0x270   : > { %v3408_v14 = vpop.f32.mrf.mxu1  ;;  %v3483_v21 = vadd.f32 %v3482_v35, %v3454_v46 }
 0x271   : > { %v3437_v51 = vpop.f32.mrf.mxu2  ;;  %v3409_v44 = vadd.f32 %v3408_v14, %v3380_v31 }
 0x272   : > { %v3490_v54 = vpop.f32.mrf.mxu0 }
 0x273   : > { %v3438_v40 = vadd.f32 %v3437_v51, %v3409_v44 }
 0x275   : > { %v3456_v12 = vpop.f32.mrf.mxu3 }
 0x276   : > { %v3457_v27 = vadd.f32 %v3456_v12, %v3428_v59 }
 0x278   : > { %v3410_v30 = vpop.f32.mrf.mxu1  ;;  %v3486_v2 = vadd.f32 %v3485_v33, %v3457_v27 }
 0x279   : > { %v3439_v10 = vpop.f32.mrf.mxu2  ;;  %v3411_v31 = vadd.f32 %v3410_v30, %v6810_v42 }
 0x27a   : > { %v6812_v18 = vpop.f32.mrf.mxu0 }
 0x27b   : > { %v3440_v14 = vadd.f32 %v3439_v10, %v3411_v31 }
 0x27d   : > { %v3458_v34 = vpop.f32.mrf.mxu3 }
 0x27e   : > { %v3459_v22 = vadd.f32 %v3458_v34, %v3430_v47 }
 0x280   : > { %v3514_v23 = vpop.f32.mrf.mxu1  ;;  %v3488_v26 = vadd.f32 %v3487_v3, %v3459_v22 }
 0x281   : > { %v3538_v62 = vpop.f32.mrf.mxu2  ;;  %v3515_v9 = vadd.f32 %v3514_v23, %v3486_v2 }
 0x282   : > { %v3495_v32 = vpop.f32.mrf.mxu0 }
 0x285   : > { %v3461_v16 = vpop.f32.mrf.mxu3 }
 0x286   : > { %v3462_v13 = vadd.f32 %v3461_v16, %v3433_v7 }
 0x288   : > { %v3516_v19 = vpop.f32.mrf.mxu1  ;;  %v3491_v50 = vadd.f32 %v3490_v54, %v3462_v13 }
 0x289   : > { %v3540_v28 = vpop.f32.mrf.mxu2  ;;  %v3517_v25 = vadd.f32 %v3516_v19, %v3488_v26 }
 0x28a   : > { %v3497_v41 = vpop.f32.mrf.mxu0 }
 0x28d   : > { %v3463_v63 = vpop.f32.mrf.mxu3 }
 0x28e   : > { %v3464_v58 = vadd.f32 %v3463_v63, %v3435_v56 }
 0x290   : > { %v3519_v45 = vpop.f32.mrf.mxu1  ;;  %v3493_v8 = vadd.f32 %v6812_v18, %v3464_v58 }
 0x291   : > { %v3543_v53 = vpop.f32.mrf.mxu2  ;;  %v3520_v17 = vadd.f32 %v3519_v45, %v3491_v50 }
 0x292   : > { %v3544_v43 = vadd.f32 %v3543_v53, %v3515_v9  ;;  %v3509_v57 = vpop.f32.mrf.mxu0 }
 0x293   : > { %v3510_v55 = vadd.f32 %v3509_v57, %v3481_v38 }
 0x294   : > { %3560 = vst [vmem:[%s6818_s21 + $0x10] sm:$0xff] %v3544_v43 }
 0x295   : > { %v3466_v5 = vpop.f32.mrf.mxu3  ;;  %v3539_v39 = vadd.f32 %v3538_v62, %v3510_v55 }
 0x296   : > { %v3467_v52 = vadd.f32 %v3466_v5, %v3438_v40 }
 0x297   : > { %3558 = vst [vmem:[%s6818_s21] sm:$0xff] %v3539_v39 }
 0x298   : > { %v3521_v20 = vpop.f32.mrf.mxu1  ;;  %v3496_v3 = vadd.f32 %v3495_v32, %v3467_v52 }
 0x299   : > { %v3545_v0 = vpop.f32.mrf.mxu2  ;;  %v3522_v49 = vadd.f32 %v3521_v20, %v3493_v8 }
 0x29a   : > { %v3546_v61 = vadd.f32 %v3545_v0, %v3517_v25  ;;  %v3511_v29 = vpop.f32.mrf.mxu0 }
 0x29b   : > { %v3512_v60 = vadd.f32 %v3511_v29, %v3483_v21 }
 0x29c   : > { %3561 = vst [vmem:[%s6818_s21 + $0x18] sm:$0xff] %v3546_v61 }
 0x29d   : > { %v3468_v48 = vpop.f32.mrf.mxu3  ;;  %v3541_v1 = vadd.f32 %v3540_v28, %v3512_v60 }
 0x29e   : > { %v3469_v24 = vadd.f32 %v3468_v48, %v3440_v14 }
 0x29f   : > { %3559 = vst [vmem:[%s6818_s21 + $0x8] sm:$0xff] %v3541_v1 }
 0x2a0   : > { %v3524_v33 = vpop.f32.mrf.mxu1  ;;  %v3498_v62 = vadd.f32 %v3497_v41, %v3469_v24 }
 0x2a1   : > { %v3548_v35 = vpop.f32.mrf.mxu2  ;;  %v3525_v51 = vadd.f32 %v3524_v33, %v3496_v3 }
 0x2a2   : > { %v3549_v6 = vadd.f32 %v3548_v35, %v3520_v17 }
 0x2a4   : > { %3562 = vst [vmem:[%s6818_s21 + $0x20] sm:$0xff] %v3549_v6 }
 0x2a5   : > { %v3553_v12 = vpop.f32.mrf.mxu3 }
 0x2a6   : > { %v3554_v54 = vadd.f32 %v3553_v12, %v3525_v51 }
 0x2a8   : > { %3564 = vst [vmem:[%s6818_s21 + $0x30] sm:$0xff] %v3554_v54  ;;  %v3526_v34 = vpop.f32.mrf.mxu1 }
 0x2a9   : > { %v3550_v23 = vpop.f32.mrf.mxu2  ;;  %v3527_v42 = vadd.f32 %v3526_v34, %v3498_v62 }
 0x2aa   : > { %v3551_v16 = vadd.f32 %v3550_v23, %v3522_v49 }
 0x2ac   : > { %3563 = vst [vmem:[%s6818_s21 + $0x28] sm:$0xff] %v3551_v16 }
 0x2ad   : > { %v3555_v30 = vpop.f32.mrf.mxu3 }
 0x2ae   : > { %v3556_v32 = vadd.f32 %v3555_v30, %v3527_v42 }
 0x2b0   : > { %3565 = vst [vmem:[%s6818_s21 + $0x38] sm:$0xff] %v3556_v32 }
 0x2b1 PF: > { %s17_s24 = sadd.s32 1, %s4784_s24  }
 0x2b2   : > { %p14_p4 = scmp.ge.s32.totalorder %s17_s24, 4  }
 0x2b4   :  { %16 = sbr.rel (!%p14_p4) target bundleno = 1 (0x1), region = 89 }

</bundles_post_ra>
